<compile_context>
chip_gen: v7x
topology: tpu7x:2x2x1
jax: 0.10.0
libtpu: 0.0.40
codegen_flags: <defaults>
</compile_context>

<pallas_src>
import functools

import jax
import jax.numpy as jnp
from jax.experimental import pallas as pl
from jax.experimental.pallas import tpu as pltpu


def _round_up(x, m):
    return (x + m - 1) // m * m


def _conv_lstm_kernel(patch_ref, w_ref, b_ref, wci_ref, wcf_ref, wco_ref,
                      c_ref, out_ref, *, hidden):
    """One row-tile per grid step.

    patch_ref: (TM, K_tot) bf16 im2col patches (x-taps then h-taps)
    w_ref:     (K_tot, 4*hidden) bf16 fused conv weights
    b_ref:     (1, 4*hidden) f32 bias (hidden conv bias, added once)
    wci/wcf/wco_ref: (1, hidden) f32 peephole weights
    c_ref:     (TM, hidden) f32 previous cell state
    out_ref:   (TM, 2*hidden) f32  ->  [h_next | c_next]
    """
    # Single im2col matmul on the MXU, f32 accumulation.
    acc = jnp.dot(patch_ref[...], w_ref[...],
                  preferred_element_type=jnp.float32)
    acc = acc + b_ref[...]                       # (1, 4*hidden) broadcast

    c = c_ref[...].astype(jnp.float32)           # (TM, hidden)

    # Gate order i, f, o, g — same as torch.split(out, hidden, dim=1).
    gi = acc[:, 0 * hidden:1 * hidden]
    gf = acc[:, 1 * hidden:2 * hidden]
    go = acc[:, 2 * hidden:3 * hidden]
    gg = acc[:, 3 * hidden:4 * hidden]

    i = jax.nn.sigmoid(gi + wci_ref[...] * c)
    f = jax.nn.sigmoid(gf + wcf_ref[...] * c)
    c_next = f * c + i * jnp.tanh(gg)
    o = jax.nn.sigmoid(go + wco_ref[...] * c_next)
    h_next = o * jnp.tanh(c_next)

    # Lane-dense combined writeback: h_next || c_next.
    out_ref[...] = jnp.concatenate([h_next, c_next],
                                   axis=-1).astype(out_ref.dtype)


def _im2col(x_pad_nhwc, k, H, W):
    """(N, H+k-1, W+k-1, C) -> (N, H, W, k*k*C); tap order (ky, kx, channel)."""
    taps = [x_pad_nhwc[:, ky:ky + H, kx:kx + W, :]
            for ky in range(k) for kx in range(k)]
    return jnp.concatenate(taps, axis=-1)


def conv_lstm_cell_forward(x, h, c, w_in_oihw, w_h_oihw, b, wci, wcf, wco,
                           *, row_tile=256):
    """Forward pass matching ConvLSTMCell.forward (with_input=True).

    x: (N, Cin, H, W), h/c: (N, hidden, H, W)      (PyTorch NCHW convention)
    w_in_oihw: (4*hidden, Cin, kin, kin)
    w_h_oihw:  (4*hidden, hidden, khid, khid)
    b: (4*hidden,), wci/wcf/wco: (hidden,)
    Returns (h_next, c_next) in NCHW.
    """
    N, cin, H, W = x.shape
    hidden = h.shape[1]
    kin = w_in_oihw.shape[-1]
    khid = w_h_oihw.shape[-1]
    assert kin % 2 == 1 and khid % 2 == 1, "only 'same'-padding odd kernels supported"
    pin = (kin - 1) // 2
    phid = (khid - 1) // 2
    four_h = 4 * hidden
    k_tot = kin * kin * cin + khid * khid * hidden

    # ---- layout prep in plain JAX (NCHW -> NHWC, pad, im2col) --------------
    x_nhwc = jnp.transpose(x, (0, 2, 3, 1))
    h_nhwc = jnp.transpose(h, (0, 2, 3, 1))
    c_nhwc = jnp.transpose(c, (0, 2, 3, 1))
    x_pad = jnp.pad(x_nhwc, ((0, 0), (pin, pin), (pin, pin), (0, 0)))
    h_pad = jnp.pad(h_nhwc, ((0, 0), (phid, phid), (phid, phid), (0, 0)))

    patches = jnp.concatenate(
        [_im2col(x_pad, kin, H, W), _im2col(h_pad, khid, H, W)], axis=-1)
    patches = patches.reshape(N * H * W, k_tot).astype(jnp.bfloat16)

    # OIHW -> (kH, kW, Cin, Cout) -> 2-D (kH*kW*Cin, Cout); row order matches
    # the patch tap order (ky, kx, channel). Stack x-weights over h-weights.
    w_in2d = jnp.transpose(w_in_oihw, (2, 3, 1, 0)).reshape(kin * kin * cin, four_h)
    w_h2d = jnp.transpose(w_h_oihw, (2, 3, 1, 0)).reshape(khid * khid * hidden, four_h)
    w2d = jnp.concatenate([w_in2d, w_h2d], axis=0).astype(jnp.bfloat16)

    c_rows = c_nhwc.reshape(N * H * W, hidden).astype(jnp.float32)

    # ---- row tiling: flatten (N, H, W) into one parallel M axis -------------
    total = N * H * W
    tm = min(row_tile, _round_up(total, 8))
    padded = _round_up(total, tm)
    if padded != total:
        patches = jnp.pad(patches, ((0, padded - total), (0, 0)))
        c_rows = jnp.pad(c_rows, ((0, padded - total), (0, 0)))
    grid = padded // tm

    kern = functools.partial(_conv_lstm_kernel, hidden=hidden)
    out = pl.pallas_call(
        kern,
        out_shape=jax.ShapeDtypeStruct((padded, 2 * hidden), jnp.float32),
        grid=(grid,),
        in_specs=[
            pl.BlockSpec((tm, k_tot), lambda m: (m, 0)),        # patches
            pl.BlockSpec((k_tot, four_h), lambda m: (0, 0)),    # fused weights
            pl.BlockSpec((1, four_h), lambda m: (0, 0)),        # bias
            pl.BlockSpec((1, hidden), lambda m: (0, 0)),        # Wci
            pl.BlockSpec((1, hidden), lambda m: (0, 0)),        # Wcf
            pl.BlockSpec((1, hidden), lambda m: (0, 0)),        # Wco
            pl.BlockSpec((tm, hidden), lambda m: (m, 0)),       # c
        ],
        out_specs=pl.BlockSpec((tm, 2 * hidden), lambda m: (m, 0)),
        compiler_params=pltpu.CompilerParams(
            dimension_semantics=("parallel",)),
    )(patches, w2d,
      b.reshape(1, four_h).astype(jnp.float32),
      wci.reshape(1, hidden).astype(jnp.float32),
      wcf.reshape(1, hidden).astype(jnp.float32),
      wco.reshape(1, hidden).astype(jnp.float32),
      c_rows)

    out = out[:total]
    h_next = out[:, :hidden].reshape(N, H, W, hidden)
    c_next = out[:, hidden:].reshape(N, H, W, hidden)
    h_next = jnp.transpose(h_next, (0, 3, 1, 2)).astype(x.dtype)
    c_next = jnp.transpose(c_next, (0, 3, 1, 2)).astype(x.dtype)
    return h_next, c_next


def _reference_forward(x, h, c, w_in_oihw, w_h_oihw, b, wci, wcf, wco):
    """Pure-JAX reference reproducing the PyTorch forward semantics (NCHW)."""
    hidden = h.shape[1]
    pin = (w_in_oihw.shape[-1] - 1) // 2
    phid = (w_h_oihw.shape[-1] - 1) // 2
    out_in = jax.lax.conv_general_dilated(
        x, w_in_oihw, (1, 1), [(pin, pin), (pin, pin)],
        dimension_numbers=("NCHW", "OIHW", "NCHW"))
    out_h = jax.lax.conv_general_dilated(
        h, w_h_oihw, (1, 1), [(phid, phid), (phid, phid)],
        dimension_numbers=("NCHW", "OIHW", "NCHW")) + b.reshape(1, -1, 1, 1)
    ii, ff, oo, gg = jnp.split(out_in, 4, axis=1)
    hi, hf, ho, hg = jnp.split(out_h, 4, axis=1)
    wci4 = wci.reshape(1, hidden, 1, 1)
    wcf4 = wcf.reshape(1, hidden, 1, 1)
    wco4 = wco.reshape(1, hidden, 1, 1)
    i = jax.nn.sigmoid(ii + hi + wci4 * c)
    f = jax.nn.sigmoid(ff + hf + wcf4 * c)
    c_next = f * c + i * jnp.tanh(gg + hg)
    o = jax.nn.sigmoid(oo + ho + wco4 * c_next)
    h_next = o * jnp.tanh(c_next)
    return h_next, c_next


if __name__ == "__main__":
    # Small, deterministic configuration.
    N, CIN, H, W = 2, 4, 16, 16
    HIDDEN = 32
    K_IN, K_HID = 3, 3

    key = jax.random.PRNGKey(0)
    keys = jax.random.split(key, 8)
    w_in = jax.random.uniform(keys[0], (4 * HIDDEN, CIN, K_IN, K_IN),
                              jnp.float32, -0.1, 0.1)
    w_h = jax.random.uniform(keys[1], (4 * HIDDEN, HIDDEN, K_HID, K_HID),
                             jnp.float32, -0.1, 0.1)
    b = jax.random.uniform(keys[2], (4 * HIDDEN,), jnp.float32, -0.1, 0.1)
    wci = jax.random.uniform(keys[3], (HIDDEN,), jnp.float32, 0.0, 1.0)
    wcf = jax.random.uniform(keys[4], (HIDDEN,), jnp.float32, 0.0, 1.0)
    wco = jax.random.uniform(keys[5], (HIDDEN,), jnp.float32, 0.0, 1.0)

    x = jax.random.normal(keys[6], (N, CIN, H, W), jnp.float32)
    hc_key0, hc_key1 = jax.random.split(keys[7])
    h0 = jax.random.normal(hc_key0, (N, HIDDEN, H, W), jnp.float32)
    c0 = jax.random.normal(hc_key1, (N, HIDDEN, H, W), jnp.float32)

    h_next, c_next = jax.jit(conv_lstm_cell_forward)(
        x, h0, c0, w_in, w_h, b, wci, wcf, wco)
    jax.block_until_ready((h_next, c_next))

    h_ref, c_ref = _reference_forward(x, h0, c0, w_in, w_h, b, wci, wcf, wco)
    assert h_next.shape == (N, HIDDEN, H, W) and c_next.shape == (N, HIDDEN, H, W)
    # Tolerance loosened vs the pure-f32 version: conv matmuls now run on the
    # MXU in bf16 (f32 accumulation); gate math stays in f32.
    assert jnp.allclose(h_next, h_ref, atol=3e-2, rtol=3e-2)
    assert jnp.allclose(c_next, c_ref, atol=3e-2, rtol=3e-2)

    print("KERNEL_OK")
</pallas_src>

<mosaic_0001>
module attributes {stable_mosaic.version = 11 : i64} {
  func.func @_conv_lstm_kernel(%arg0: i32, %arg1: memref<256x324xbf16, #tpu.memory_space<vmem>>, %arg2: memref<324x128xbf16, #tpu.memory_space<vmem>>, %arg3: memref<1x128xf32, #tpu.memory_space<vmem>>, %arg4: memref<1x32xf32, #tpu.memory_space<vmem>>, %arg5: memref<1x32xf32, #tpu.memory_space<vmem>>, %arg6: memref<1x32xf32, #tpu.memory_space<vmem>>, %arg7: memref<256x32xf32, #tpu.memory_space<vmem>>, %arg8: memref<256x64xf32, #tpu.memory_space<vmem>>) attributes {dimension_semantics = [#tpu.dimension_semantics<parallel>], iteration_bounds = array<i64: 2>, scalar_prefetch = 0 : i64, scratch_operands = 0 : i64, tpu.core_type = #tpu.core_type<tc>, window_params = [{transform_indices = @transform_0, window_bounds = array<i64: 256, 324>}, {pipeline_mode = #tpu.pipeline_mode<synchronous>, transform_indices = @transform_1, window_bounds = array<i64: 324, 128>}, {pipeline_mode = #tpu.pipeline_mode<synchronous>, transform_indices = @transform_2, window_bounds = array<i64: 1, 128>}, {pipeline_mode = #tpu.pipeline_mode<synchronous>, transform_indices = @transform_3, window_bounds = array<i64: 1, 32>}, {pipeline_mode = #tpu.pipeline_mode<synchronous>, transform_indices = @transform_4, window_bounds = array<i64: 1, 32>}, {pipeline_mode = #tpu.pipeline_mode<synchronous>, transform_indices = @transform_5, window_bounds = array<i64: 1, 32>}, {transform_indices = @transform_6, window_bounds = array<i64: 256, 32>}, {transform_indices = @transform_7, window_bounds = array<i64: 256, 64>}]} {
    %c0 = arith.constant 0 : index
    %c0_0 = arith.constant 0 : index
    %0 = vector.load %arg1[%c0, %c0_0] : memref<256x324xbf16, #tpu.memory_space<vmem>>, vector<256x324xbf16>
    %c0_1 = arith.constant 0 : index
    %c0_2 = arith.constant 0 : index
    %1 = vector.load %arg2[%c0_1, %c0_2] : memref<324x128xbf16, #tpu.memory_space<vmem>>, vector<324x128xbf16>
    %cst = arith.constant dense<0.000000e+00> : vector<256x128xf32>
    %2 = tpu.matmul %0, %1, %cst {dimension_numbers = #tpu.dot_dimension_numbers<[1], [0], [0], [1], [0, 0, 1, 1], [], []>} : vector<256x324xbf16>, vector<324x128xbf16>, vector<256x128xf32> -> vector<256x128xf32>
    %c0_3 = arith.constant 0 : index
    %c0_4 = arith.constant 0 : index
    %3 = vector.load %arg3[%c0_3, %c0_4] : memref<1x128xf32, #tpu.memory_space<vmem>>, vector<1x128xf32>
    %4 = vector.broadcast %3 : vector<1x128xf32> to vector<256x128xf32>
    %5 = arith.addf %2, %4 : vector<256x128xf32>
    %c0_5 = arith.constant 0 : index
    %c0_6 = arith.constant 0 : index
    %6 = vector.load %arg7[%c0_5, %c0_6] : memref<256x32xf32, #tpu.memory_space<vmem>>, vector<256x32xf32>
    %7 = vector.extract_strided_slice %5 {offsets = [0, 0], sizes = [256, 32], strides = [1, 1]} : vector<256x128xf32> to vector<256x32xf32>
    %8 = vector.extract_strided_slice %5 {offsets = [0, 32], sizes = [256, 32], strides = [1, 1]} : vector<256x128xf32> to vector<256x32xf32>
    %9 = vector.extract_strided_slice %5 {offsets = [0, 64], sizes = [256, 32], strides = [1, 1]} : vector<256x128xf32> to vector<256x32xf32>
    %10 = vector.extract_strided_slice %5 {offsets = [0, 96], sizes = [256, 32], strides = [1, 1]} : vector<256x128xf32> to vector<256x32xf32>
    %c0_7 = arith.constant 0 : index
    %c0_8 = arith.constant 0 : index
    %11 = vector.load %arg4[%c0_7, %c0_8] : memref<1x32xf32, #tpu.memory_space<vmem>>, vector<1x32xf32>
    %12 = vector.broadcast %11 : vector<1x32xf32> to vector<256x32xf32>
    %13 = arith.mulf %12, %6 : vector<256x32xf32>
    %14 = arith.addf %7, %13 : vector<256x32xf32>
    %15 = arith.negf %14 : vector<256x32xf32>
    %16 = math.exp %15 : vector<256x32xf32>
    %cst_9 = arith.constant 1.000000e+00 : f32
    %17 = vector.broadcast %cst_9 : f32 to vector<256x32xf32>
    %18 = arith.addf %17, %16 : vector<256x32xf32>
    %19 = arith.divf %17, %18 : vector<256x32xf32>
    %c0_10 = arith.constant 0 : index
    %c0_11 = arith.constant 0 : index
    %20 = vector.load %arg5[%c0_10, %c0_11] : memref<1x32xf32, #tpu.memory_space<vmem>>, vector<1x32xf32>
    %21 = vector.broadcast %20 : vector<1x32xf32> to vector<256x32xf32>
    %22 = arith.mulf %21, %6 : vector<256x32xf32>
    %23 = arith.addf %8, %22 : vector<256x32xf32>
    %24 = arith.negf %23 : vector<256x32xf32>
    %25 = math.exp %24 : vector<256x32xf32>
    %cst_12 = arith.constant 1.000000e+00 : f32
    %26 = vector.broadcast %cst_12 : f32 to vector<256x32xf32>
    %27 = arith.addf %26, %25 : vector<256x32xf32>
    %28 = arith.divf %26, %27 : vector<256x32xf32>
    %29 = arith.mulf %28, %6 : vector<256x32xf32>
    %30 = math.tanh %10 : vector<256x32xf32>
    %31 = arith.mulf %19, %30 : vector<256x32xf32>
    %32 = arith.addf %29, %31 : vector<256x32xf32>
    %c0_13 = arith.constant 0 : index
    %c0_14 = arith.constant 0 : index
    %33 = vector.load %arg6[%c0_13, %c0_14] : memref<1x32xf32, #tpu.memory_space<vmem>>, vector<1x32xf32>
    %34 = vector.broadcast %33 : vector<1x32xf32> to vector<256x32xf32>
    %35 = arith.mulf %34, %32 : vector<256x32xf32>
    %36 = arith.addf %9, %35 : vector<256x32xf32>
    %37 = arith.negf %36 : vector<256x32xf32>
    %38 = math.exp %37 : vector<256x32xf32>
    %cst_15 = arith.constant 1.000000e+00 : f32
    %39 = vector.broadcast %cst_15 : f32 to vector<256x32xf32>
    %40 = arith.addf %39, %38 : vector<256x32xf32>
    %41 = arith.divf %39, %40 : vector<256x32xf32>
    %42 = math.tanh %32 : vector<256x32xf32>
    %43 = arith.mulf %41, %42 : vector<256x32xf32>
    %44 = tpu.concatenate %43, %32 in 1 : vector<256x32xf32>, vector<256x32xf32> -> vector<256x64xf32>
    %c0_16 = arith.constant 0 : index
    %c0_17 = arith.constant 0 : index
    %45 = vector.load %arg8[%c0_16, %c0_17] : memref<256x64xf32, #tpu.memory_space<vmem>>, vector<256x64xf32>
    tpu.vector_store %arg8[%c0_16, %c0_17], %44 {strides = array<i32>} : memref<256x64xf32, #tpu.memory_space<vmem>>, vector<256x64xf32>,
    return
  }
  func.func @transform_0(%arg0: i32) -> (i32, i32) {
    %c0_i32 = arith.constant 0 : i32
    %c0_i32_0 = arith.constant 0 : i32
    return %arg0, %c0_i32 : i32, i32
  }
  func.func @transform_1(%arg0: i32) -> (i32, i32) {
    %c0_i32 = arith.constant 0 : i32
    %c0_i32_0 = arith.constant 0 : i32
    %c0_i32_1 = arith.constant 0 : i32
    return %c0_i32, %c0_i32_0 : i32, i32
  }
  func.func @transform_2(%arg0: i32) -> (i32, i32) {
    %c0_i32 = arith.constant 0 : i32
    %c0_i32_0 = arith.constant 0 : i32
    %c0_i32_1 = arith.constant 0 : i32
    return %c0_i32, %c0_i32_0 : i32, i32
  }
  func.func @transform_3(%arg0: i32) -> (i32, i32) {
    %c0_i32 = arith.constant 0 : i32
    %c0_i32_0 = arith.constant 0 : i32
    %c0_i32_1 = arith.constant 0 : i32
    return %c0_i32, %c0_i32_0 : i32, i32
  }
  func.func @transform_4(%arg0: i32) -> (i32, i32) {
    %c0_i32 = arith.constant 0 : i32
    %c0_i32_0 = arith.constant 0 : i32
    %c0_i32_1 = arith.constant 0 : i32
    return %c0_i32, %c0_i32_0 : i32, i32
  }
  func.func @transform_5(%arg0: i32) -> (i32, i32) {
    %c0_i32 = arith.constant 0 : i32
    %c0_i32_0 = arith.constant 0 : i32
    %c0_i32_1 = arith.constant 0 : i32
    return %c0_i32, %c0_i32_0 : i32, i32
  }
  func.func @transform_6(%arg0: i32) -> (i32, i32) {
    %c0_i32 = arith.constant 0 : i32
    %c0_i32_0 = arith.constant 0 : i32
    return %arg0, %c0_i32 : i32, i32
  }
  func.func @transform_7(%arg0: i32) -> (i32, i32) {
    %c0_i32 = arith.constant 0 : i32
    %c0_i32_0 = arith.constant 0 : i32
    return %arg0, %c0_i32 : i32, i32
  }
}

</mosaic_0001>

<bundles_post_ra>
// kernel: conv_lstm_cell_forward.1
= control target key start
LH: loop header
LB: loop body
LE: loop exit
PB: predicated region body
PF: predicated region fallthrough
CT: control target
= control target key end

     0   :  { %s4405_s24 = smov 0   ;;  %s5868_s0 = inlined_call_operand.vmem [shape: bf16[512,324], index: 0, kind: input, shape index: {}]   ;;  %s5869_s1 = inlined_call_operand.vmem [shape: bf16[324,128], index: 1, kind: input, shape index: {}]   ;;  %s5870_s2 = inlined_call_operand.vmem [shape: f32[1,128], index: 2, kind: input, shape index: {}]   ;;  %s5871_s3 = inlined_call_operand.vmem [shape: f32[1,32], index: 3, kind: input, shape index: {}]   ;;  %s5872_s4 = inlined_call_operand.vmem [shape: f32[1,32], index: 4, kind: input, shape index: {}]   ;;  %s5873_s5 = inlined_call_operand.vmem [shape: f32[1,32], index: 5, kind: input, shape index: {}]   ;;  %s5874_s6 = inlined_call_operand.vmem [shape: f32[512,32], index: 6, kind: input, shape index: {}]   ;;  %s5875_s7 = inlined_call_operand.vmem [shape: f32[512,64], index: 7, kind: output, shape index: {}]  }
   0x1 LB: > { %s3329_s25 = sadd.s32 4294967295, %s4360_s24   ;;  %p3333_p0 = scmp.ge.s32.totalorder %s4360_s24, 1  ;;  %s4360_s24 = sphi %s4405_s24, %s17_s24  }
   0x2   : > { %p250_p1 = scmp.lt.s32.totalorder %s4360_s24, 3 }
   0x4   : > { %p251_p2 = pnand %p3333_p0, %p250_p1 }
   0x6   : > { %254 = sbr.rel (%p251_p2) target bundleno = 1032 (0x408), region = 48 }
   0xd   : > { %v3731_v0 = vld [vmem:[%s5869_s1 + $0x40] sm:$0xff]   ;;  %s3334_s28 = sshll.u32 %s3329_s25, 5  ;;  %v3733_v2 = vld [vmem:[%s5869_s1 + $0x48] sm:$0xff]   ;;  %v3735_v4 = vld [vmem:[%s5869_s1 + $0x50] sm:$0xff]   ;;  %vm832_vm0 = vcmask 1041408   ;;  %vm783_vm1 = vcmask 556032  }
   0xe   : > { %v3732_v1 = vld [vmem:[%s5869_s1] sm:$0xff]   ;;  %3527 = vmatprep.subr.bf16.mxu0 %v3731_v0  ;;  %3702 = vmatprep.subr.bf16.mxu1 %v3731_v0  ;;  %p289_p3 = scmp.lt.s32.totalorder %s3334_s28, 63  ;;  %v3734_v3 = vld [vmem:[%s5869_s1 + $0x8] sm:$0xff]   ;;  %v3736_v5 = vld [vmem:[%s5869_s1 + $0x10] sm:$0xff]   ;;  %s4362_s15 = smov 32   ;;  %vm3195_vm2 = vcmask 261120  }
   0xf   : > { %3528 = vmatpush3.bf16.msra.mxu0 %v3732_v1  ;;  %3710 = vmatpush3.bf16.msra.mxu1 %v3732_v1  ;;  %v3737_v6 = vld [vmem:[%s5869_s1 + $0x58] sm:$0xff]   ;;  %v3739_v8 = vld [vmem:[%s5869_s1 + $0x60] sm:$0xff]   ;;  %v3741_v10 = vld [vmem:[%s5869_s1 + $0x68] sm:$0xff]   ;;  %s4363_s19 = smov 96   ;;  %s4364_s22 = smov 64   ;;  %vm3228_vm3 = vcmask 523264  }
  0x10   : > { %3529 = vmatprep.subr.bf16.mxu0 %v3733_v2  ;;  %3703 = vmatprep.subr.bf16.mxu1 %v3733_v2  ;;  %s6095_s28 = smov (!%p289_p3, %s3334_s28), 63  ;;  %v3738_v7 = vld [vmem:[%s5869_s1 + $0x18] sm:$0xff]   ;;  %v3740_v9 = vld [vmem:[%s5869_s1 + $0x20] sm:$0xff]   ;;  %v3742_v13 = vld [vmem:[%s5869_s1 + $0x28] sm:$0xff]  }
  0x11   : > { %s3719_s18 = smul.u32 12, %s6095_s28  ;;  %v3743_v14 = vld [vmem:[%s5869_s1 + $0x70] sm:$0xff]   ;;  %v3745_v16 = vld [vmem:[%s5869_s1 + $0x78] sm:$0xff]   ;;  %v3753_v18 = vld [vmem:[%s5869_s1 + $0x80] sm:$0xff]   ;;  %s3337_s9 = sshll.u32 %s6095_s28, 3 }
  0x12   : > { %v3744_v15 = vld [vmem:[%s5869_s1 + $0x30] sm:$0xff]   ;;  %v3746_v17 = vld [vmem:[%s5869_s1 + $0x38] sm:$0xff]   ;;  %v3758_v23 = vld [vmem:[%s5869_s1 + $0x88] sm:$0xff]   ;;  %s4508_s12 = scalar_lea.vmem %s5874_s6, %s3337_s9  ;;  %s5735_s27 = scalar_lea.vmem %s5875_s7, %s3337_s9 }
  0x13   : > { %3530 = vmatpush3.bf16.msra.mxu0 %v3734_v3  ;;  %3711 = vmatpush3.bf16.msra.mxu1 %v3734_v3  ;;  %s4446_s26 = scalar_lea.vmem %s5868_s0, %s3719_s18  ;;  %v3761_v25 = vld [vmem:[%s5869_s1 + $0x90] sm:$0xff]   ;;  %v3768_v29 = vld [vmem:[%s5869_s1 + $0x98] sm:$0xff]   ;;  %v3775_v30 = vld [vmem:[%s5869_s1 + $0xa0] ss:$0 sps:$4 sm:$0x33]  }
  0x14   : > { %3531 = vmatprep.subr.bf16.mxu0 %v3735_v4  ;;  %3704 = vmatprep.subr.bf16.mxu1 %v3735_v4  ;;  %v3749_v11 = vld [vmem:[%s4446_s26 + $0x4] ss:$12 sps:$4 sm:$0xff]   ;;  %v3747_v19 = vld [vmem:[%s4446_s26] ss:$12 sps:$4 sm:$0xff]   ;;  %v3754_v21 = vld [vmem:[%s4446_s26 + $0x1c] ss:$12 sps:$4 sm:$0xff]  }
  0x15   : > { %v3752_v12 = vld [vmem:[%s4446_s26 + $0x124] ss:$12 sps:$4 sm:$0xff]   ;;  %868 = vmatprep.mubr.bf16.mxu0 %v3749_v11  ;;  %v3750_v20 = vld [vmem:[%s4446_s26 + $0x120] ss:$12 sps:$4 sm:$0xff]   ;;  %v3756_v22 = vld [vmem:[%s4446_s26 + $0x13c] ss:$12 sps:$4 sm:$0xff]  }
  0x16   : > { %964 = vmatprep.mubr.bf16.mxu1 %v3752_v12  ;;  %v3759_v24 = vld [vmem:[%s4446_s26 + $0x18] ss:$12 sps:$4 sm:$0xff]   ;;  %v3762_v27 = vld [vmem:[%s4446_s26 + $0x34] ss:$12 sps:$4 sm:$0xff]   ;;  %v3766_v31 = vld [vmem:[%s4446_s26 + $0x30] ss:$12 sps:$4 sm:$0xff]  }
  0x17   : > { %3532 = vmatpush3.bf16.msra.mxu0 %v3736_v5  ;;  %3712 = vmatpush3.bf16.msra.mxu1 %v3736_v5  ;;  %v3760_v26 = vld [vmem:[%s4446_s26 + $0x138] ss:$12 sps:$4 sm:$0xff]   ;;  %v3764_v28 = vld [vmem:[%s4446_s26 + $0x154] ss:$12 sps:$4 sm:$0xff]   ;;  %v3767_v32 = vld [vmem:[%s4446_s26 + $0x150] ss:$12 sps:$4 sm:$0xff]  }
  0x18   : > { %3533 = vmatprep.subr.bf16.mxu0 %v3737_v6  ;;  %3705 = vmatprep.subr.bf16.mxu1 %v3737_v6  ;;  %v3769_v33 = vld [vmem:[%s4446_s26 + $0x4c] ss:$12 sps:$4 sm:$0xff]   ;;  %v834_v35 = vsel %vm832_vm0, %v3775_v30, 0  ;;  %v3773_v36 = vld [vmem:[%s4446_s26 + $0x48] ss:$12 sps:$4 sm:$0xff]   ;;  %v4511_v40 = vld [vmem:[%s4508_s12] sm:$0xff] }
  0x19   : > { %v3771_v34 = vld [vmem:[%s4446_s26 + $0x16c] ss:$12 sps:$4 sm:$0xff]   ;;  %v3774_v37 = vld [vmem:[%s4446_s26 + $0x168] ss:$12 sps:$4 sm:$0xff]   ;;  %v3776_v38 = vld [vmem:[%s4446_s26 + $0x64] ss:$12 sps:$4 sm:$0xff]  }
  0x1a   : > { %v3778_v39 = vld [vmem:[%s4446_s26 + $0x8] ss:$12 sps:$4 sm:$0xff]   ;;  %v4516_v41 = vld [vmem:[%s5872_s4] ss:$0 sm:$0xff]  ;;  %v4533_v47 = vld [vmem:[%s4508_s12 + $0x18] sm:$0xff] }
  0x1b   : > { %3534 = vmatpush3.bf16.msra.mxu0 %v3738_v7  ;;  %3713 = vmatpush3.bf16.msra.mxu1 %v3738_v7  ;;  %v1460_v42 = vmul.f32 %v4516_v41, %v4511_v40  ;;  %v4522_v43 = vld [vmem:[%s4508_s12 + $0x10] sm:$0xff]  ;;  %v4525_v44 = vld [vmem:[%s4508_s12 + $0x8] sm:$0xff]  ;;  %v4539_v50 = vld [vmem:[%s4508_s12 + $0x20] sm:$0xff]  ;;  %v1463_v53 = vmul.f32 %v4516_v41, %v4533_v47 }
  0x1c   : > { %3535 = vmatprep.subr.bf16.mxu0 %v3739_v8  ;;  %3706 = vmatprep.subr.bf16.mxu1 %v3739_v8  ;;  %v1462_v45 = vmul.f32 %v4516_v41, %v4522_v43  ;;  %v1461_v46 = vmul.f32 %v4516_v41, %v4525_v44  ;;  %v3779_v48 = vld [vmem:[%s4446_s26 + $0x60] ss:$12 sps:$4 sm:$0xff]   ;;  %v3781_v51 = vld [vmem:[%s4446_s26 + $0x7c] ss:$12 sps:$4 sm:$0xff]   ;;  %v3783_v52 = vld [vmem:[%s4446_s26 + $0x38] ss:$12 sps:$4 sm:$0xff]   ;;  %v1464_v54 = vmul.f32 %v4516_v41, %v4539_v50 }
  0x1d   : > { %1524 = vrot.lane.b32.xlu0 %v1460_v42, %s4362_s15  ;;  %v3780_v49 = vld [vmem:[%s4446_s26 + $0x20] ss:$12 sps:$4 sm:$0xff]   ;;  %v4553_v56 = vld [vmem:[%s4508_s12 + $0x30] sm:$0xff]  ;;  %v4563_v59 = vld [vmem:[%s4508_s12 + $0x38] sm:$0xff] }
  0x1e   : > { %1528 = vrot.lane.b32.xlu1 %v1462_v45, %s4362_s15  ;;  %v4549_v55 = vld [vmem:[%s4508_s12 + $0x28] sm:$0xff]  ;;  %v1466_v58 = vmul.f32 %v4516_v41, %v4553_v56  ;;  %v3784_v60 = vld [vmem:[%s4446_s26 + $0x78] ss:$12 sps:$4 sm:$0xff]   ;;  %v3785_v61 = vld [vmem:[%s4446_s26 + $0x50] ss:$12 sps:$4 sm:$0xff]   ;;  %v1467_v1 = vmul.f32 %v4516_v41, %v4563_v59 }
  0x1f   : > { %3536 = vmatpush3.bf16.msra.mxu0 %v3740_v9  ;;  %3714 = vmatpush3.bf16.msra.mxu1 %v3740_v9  ;;  %v1465_v57 = vmul.f32 %v4516_v41, %v4549_v55  ;;  %v4568_v62 = vld [vmem:[%s4508_s12 + $0x40] sm:$0xff]  ;;  %v3788_v0 = vld [vmem:[%s4446_s26 + $0x68] ss:$12 sps:$4 sm:$0xff]   ;;  %v4593_v7 = vld [vmem:[%s4508_s12 + $0x58] sm:$0xff] }
  0x20   : > { %3537 = vmatprep.subr.bf16.mxu0 %v3741_v10  ;;  %3707 = vmatprep.subr.bf16.mxu1 %v3741_v10  ;;  %v3786_v63 = vld [vmem:[%s4446_s26 + $0x94] ss:$12 sps:$4 sm:$0xff]   ;;  %v1468_v2 = vmul.f32 %v4516_v41, %v4568_v62  ;;  %v4579_v3 = vld [vmem:[%s4508_s12 + $0x48] sm:$0xff]  ;;  %v3789_v8 = vld [vmem:[%s4446_s26 + $0x90] ss:$12 sps:$4 sm:$0xff]  }
  0x21   : > { %1526 = vrot.lane.b32.xlu0 %v1461_v46, %s4362_s15  ;;  %v4583_v4 = vld [vmem:[%s4508_s12 + $0x50] sm:$0xff]  ;;  %v1469_v5 = vmul.f32 %v4516_v41, %v4579_v3  ;;  %v3790_v9 = vld [vmem:[%s4446_s26 + $0x80] ss:$12 sps:$4 sm:$0xff]   ;;  %v3793_v12 = vld [vmem:[%s4446_s26 + $0x98] ss:$12 sps:$4 sm:$0xff]  }
  0x22   : > { %1530 = vrot.lane.b32.xlu1 %v1463_v53, %s4362_s15  ;;  %v1470_v6 = vmul.f32 %v4516_v41, %v4583_v4  ;;  %v4598_v10 = vld [vmem:[%s4508_s12 + $0x60] sm:$0xff]  ;;  %v3791_v11 = vld [vmem:[%s4446_s26 + $0xac] ss:$12 sps:$4 sm:$0xff]   ;;  %v4673_v42 = vld [vmem:[%s4508_s12 + $0xb0] sm:$0xff] }
  0x23   : > { %3538 = vmatpush3.bf16.msra.mxu0 %v3742_v13  ;;  %3715 = vmatpush3.bf16.msra.mxu1 %v3742_v13  ;;  %v1471_v13 = vmul.f32 %v4516_v41, %v4593_v7  ;;  %v1482_v46 = vmul.f32 %v4516_v41, %v4673_v42  ;;  %v3806_v53 = vld [vmem:[%s4446_s26 + $0xf4] ss:$12 sps:$4 sm:$0xff]  }
  0x24   : > { %3539 = vmatprep.subr.bf16.mxu0 %v3743_v14  ;;  %3708 = vmatprep.subr.bf16.mxu1 %v3743_v14  ;;  %v1472_v14 = vmul.f32 %v4516_v41, %v4598_v10 }
  0x25   : > { %1532 = vrot.lane.b32.xlu0 %v1464_v54, %s4362_s15  ;;  %v3808_v54 = vld [vmem:[%s4446_s26 + $0x128] ss:$12 sps:$4 sm:$0xff]  }
  0x26   : > { %1534 = vrot.lane.b32.xlu1 %v1465_v57, %s4362_s15 }
  0x27   : > { %3540 = vmatpush3.bf16.msra.mxu0 %v3744_v15  ;;  %3716 = vmatpush3.bf16.msra.mxu1 %v3744_v15  ;;  %v4609_v15 = vld [vmem:[%s4508_s12 + $0x68] sm:$0xff] }
  0x28   : > { %3541 = vmatprep.subr.bf16.mxu0 %v3745_v16  ;;  %3709 = vmatprep.subr.bf16.mxu1 %v3745_v16  ;;  %v4613_v16 = vld [vmem:[%s4508_s12 + $0x70] sm:$0xff] }
  0x29   : > { %1536 = vrot.lane.b32.xlu0 %v1466_v58, %s4362_s15 }
  0x2a   : > { %1538 = vrot.lane.b32.xlu1 %v1467_v1, %s4362_s15  ;;  %v1185_v1 = vld [vmem:[%s4508_s12 + $0xd8] sm:$0xff] }
  0x2b   : > { %3542 = vmatpush3.bf16.msra.mxu0 %v3746_v17  ;;  %3717 = vmatpush3.bf16.msra.mxu1 %v3746_v17  ;;  %v1473_v17 = vmul.f32 %v4516_v41, %v4609_v15 }
  0x2c   : > { %3660 = vmatprep.subr.bf16.mxu1 %v3753_v18 }
  0x2d   : > { %1540 = vrot.lane.b32.xlu0 %v1468_v2, %s4362_s15  ;;  %v3809_v2 = vld [vmem:[%s4446_s26 + $0xf0] ss:$12 sps:$4 sm:$0xff]  }
  0x2e   : > { %869 = vmatmul.mubr.bf16.vlgmr.msra.gmra.mrb[0].mxu0 %v3747_v19  ;;  %965 = vmatmul.mubr.bf16.vlgmr.msra.gmra.mrb[0].mxu1 %v3750_v20  ;;  %v4623_v19 = vld [vmem:[%s4508_s12 + $0x78] sm:$0xff]  ;;  %v3794_v20 = vld [vmem:[%s4446_s26 + $0xa8] ss:$12 sps:$4 sm:$0xff]  }
  0x2f   : > { %3661 = vmatpush3.bf16.msra.mxu1 %v3753_v18  ;;  %876 = vmatprep.mubr.bf16.mxu0 %v3754_v21  ;;  %v1474_v18 = vmul.f32 %v4516_v41, %v4613_v16  ;;  %v3795_v21 = vld [vmem:[%s4446_s26 + $0xb0] ss:$12 sps:$4 sm:$0xff]  }
  0x30   : > { %972 = vmatprep.mubr.bf16.mxu1 %v3756_v22  ;;  %3662 = vmatprep.subr.bf16.mxu1 %v3758_v23  ;;  %v4628_v22 = vld [vmem:[%s4508_s12 + $0x80] sm:$0xff] }
  0x31   : > { %1542 = vrot.lane.b32.xlu1 %v1469_v5, %s4362_s15  ;;  %1544 = vrot.lane.b32.xlu0 %v1470_v6, %s4362_s15  ;;  %v3810_v5 = vld [vmem:[%s4446_s26 + $0x140] ss:$12 sps:$4 sm:$0xff]  }
  0x32   : > { %v1186_v6 = vld [vmem:[%s4508_s12 + $0xe0] sm:$0xff] }
  0x33   : > { %3663 = vmatpush3.bf16.msra.mxu1 %v3758_v23  ;;  %v3796_v23 = vld [vmem:[%s4446_s26 + $0xc4] ss:$12 sps:$4 sm:$0xff]  }
  0x34   : > { %3664 = vmatprep.subr.bf16.mxu1 %v3761_v25 }
  0x35   : > { %1546 = vrot.lane.b32.xlu1 %v1471_v13, %s4362_s15  ;;  %1548 = vrot.lane.b32.xlu0 %v1472_v14, %s4362_s15  ;;  %v1187_v13 = vld [vmem:[%s4508_s12 + $0xe8] sm:$0xff]  ;;  %v1188_v14 = vld [vmem:[%s4508_s12 + $0xf0] sm:$0xff] }
  0x36   : > { %877 = vmatmul.mubr.bf16.gmra.mrb[4].mxu0 %v3759_v24  ;;  %973 = vmatmul.mubr.bf16.gmra.mrb[4].mxu1 %v3760_v26  ;;  %v3798_v24 = vld [vmem:[%s4446_s26 + $0xc8] ss:$12 sps:$4 sm:$0xff]   ;;  %v1476_v26 = vmul.f32 %v4516_v41, %v4628_v22 }
  0x37   : > { %3665 = vmatpush3.bf16.msra.mxu1 %v3761_v25  ;;  %884 = vmatprep.mubr.bf16.mxu0 %v3762_v27  ;;  %v1475_v25 = vmul.f32 %v4516_v41, %v4623_v19  ;;  %v4639_v27 = vld [vmem:[%s4508_s12 + $0x88] sm:$0xff] }
  0x38   : > { %980 = vmatprep.mubr.bf16.mxu1 %v3764_v28  ;;  %3666 = vmatprep.subr.bf16.mxu1 %v3768_v29  ;;  %v4643_v28 = vld [vmem:[%s4508_s12 + $0x90] sm:$0xff] }
  0x39   : > { %1550 = vrot.lane.b32.xlu1 %v1473_v17, %s4362_s15  ;;  %1552 = vrot.lane.b32.xlu0 %v1474_v18, %s4362_s15  ;;  %v1489_v17 = vmul.f32 %v4516_v41, %v1187_v13  ;;  %v1490_v18 = vmul.f32 %v4516_v41, %v1188_v14 }
  0x3b   : > { %3667 = vmatpush3.bf16.msra.mxu1 %v3768_v29  ;;  %v1477_v29 = vmul.f32 %v4516_v41, %v4639_v27 }
  0x3c   : > { %3718 = vmatprep.subr.msk.bf16.mxu1 %vm832_vm0, %v3775_v30  ;;  %v1478_v30 = vmul.f32 %v4516_v41, %v4643_v28 }
  0x3d   : > { %1554 = vrot.lane.b32.xlu1 %v1475_v25, %s4362_s15  ;;  %1556 = vrot.lane.b32.xlu0 %v1476_v26, %s4362_s15 }
  0x3e   : > { %885 = vmatmul.mubr.bf16.gmra.mrb[8].mxu0 %v3766_v31  ;;  %981 = vmatmul.mubr.bf16.gmra.mrb[8].mxu1 %v3767_v32  ;;  %v4653_v31 = vld [vmem:[%s4508_s12 + $0x98] sm:$0xff]  ;;  %v3799_v32 = vld [vmem:[%s4446_s26 + $0xc0] ss:$12 sps:$4 sm:$0xff]  }
  0x3f   : > { %892 = vmatprep.mubr.bf16.mxu0 %v3769_v33  ;;  %988 = vmatprep.mubr.bf16.mxu1 %v3771_v34  ;;  %v3800_v33 = vld [vmem:[%s4446_s26 + $0xe0] ss:$12 sps:$4 sm:$0xff]  }
  0x40   : > { %3669 = vmatpush3.bf16.msra.mxu1 %v834_v35  ;;  %v4658_v34 = vld [vmem:[%s4508_s12 + $0xa0] sm:$0xff]  ;;  %v3801_v35 = vld [vmem:[%s4446_s26 + $0xdc] ss:$12 sps:$4 sm:$0xff]  }
  0x41   : > { %1558 = vrot.lane.b32.xlu1 %v1477_v29, %s4362_s15  ;;  %1560 = vrot.lane.b32.xlu0 %v1478_v30, %s4362_s15 }
  0x46   : > { %893 = vmatmul.mubr.bf16.gmra.mrb[12].mxu0 %v3773_v36  ;;  %989 = vmatmul.mubr.bf16.gmra.mrb[12].mxu1 %v3774_v37  ;;  %v3803_v36 = vld [vmem:[%s4446_s26 + $0xf8] ss:$12 sps:$4 sm:$0xff]   ;;  %v1479_v37 = vmul.f32 %v4516_v41, %v4653_v31 }
  0x47   : > { %900 = vmatprep.mubr.bf16.mxu0 %v3776_v38  ;;  %3670 = vmatprep.mubr.msk.bf16.mxu1 %vm783_vm1, %v3778_v39  ;;  %v1480_v38 = vmul.f32 %v4516_v41, %v4658_v34  ;;  %v4669_v39 = vld [vmem:[%s4508_s12 + $0xa8] sm:$0xff] }
  0x48   : > { %1562 = vrot.lane.b32.xlu1 %v1479_v37, %s4362_s15  ;;  %v1481_v45 = vmul.f32 %v4516_v41, %v4669_v39 }
  0x49   : > { %1564 = vrot.lane.b32.xlu0 %v1480_v38, %s4362_s15 }
  0x4c   : > { %1566 = vrot.lane.b32.xlu1 %v1481_v45, %s4362_s15 }
  0x4d   : > { %1568 = vrot.lane.b32.xlu0 %v1482_v46, %s4362_s15 }
  0x4e   : > { %901 = vmatmul.mubr.bf16.gmra.mrb[16].mxu0 %v3779_v48  ;;  %3671 = vmatmul.mubr.msk.bf16.vlgmr.msra.gmra.mrb[16].mxu1 %vm783_vm1, %v3780_v49  ;;  %v4683_v48 = vld [vmem:[%s4508_s12 + $0xb8] sm:$0xff] }
  0x4f   : > { %908 = vmatprep.mubr.bf16.mxu0 %v3781_v51  ;;  %3674 = vmatprep.mubr.msk.bf16.mxu1 %vm783_vm1, %v3783_v52  ;;  %v3804_v49 = vld [vmem:[%s4446_s26 + $0xd8] ss:$12 sps:$4 sm:$0xff]   ;;  %v3805_v51 = vld [vmem:[%s4446_s26 + $0x110] ss:$12 sps:$4 sm:$0xff]   ;;  %v1483_v57 = vmul.f32 %v4516_v41, %v4683_v48 }
  0x50   : > { %v4688_v52 = vld [vmem:[%s4508_s12 + $0xc0] sm:$0xff] }
  0x51   : > { %v1484_v58 = vmul.f32 %v4516_v41, %v4688_v52  ;;  %1570 = vrot.lane.b32.xlu1 %v1483_v57, %s4362_s15 }
  0x53   : > { %1572 = vrot.lane.b32.xlu0 %v1484_v58, %s4362_s15 }
  0x56   : > { %909 = vmatmul.mubr.bf16.gmra.mrb[20].mxu0 %v3784_v60  ;;  %3675 = vmatmul.mubr.msk.bf16.gmra.mrb[20].mxu1 %vm783_vm1, %v3785_v61  ;;  %v4699_v60 = vld [vmem:[%s4508_s12 + $0xc8] sm:$0xff]  ;;  %v1184_v61 = vld [vmem:[%s4508_s12 + $0xd0] sm:$0xff] }
  0x57   : > { %916 = vmatprep.mubr.bf16.mxu0 %v3786_v63  ;;  %3678 = vmatprep.mubr.msk.bf16.mxu1 %vm783_vm1, %v3788_v0  ;;  %v1485_v63 = vmul.f32 %v4516_v41, %v4699_v60  ;;  %v1486_v0 = vmul.f32 %v4516_v41, %v1184_v61 }
  0x59   : > { %1574 = vrot.lane.b32.xlu1 %v1485_v63, %s4362_s15  ;;  %1576 = vrot.lane.b32.xlu0 %v1486_v0, %s4362_s15 }
  0x5e   : > { %917 = vmatmul.mubr.bf16.gmra.mrb[24].mxu0 %v3789_v8  ;;  %3679 = vmatmul.mubr.msk.bf16.gmra.mrb[24].mxu1 %vm783_vm1, %v3790_v9  ;;  %v3811_v8 = vld [vmem:[%s4446_s26 + $0x10c] ss:$12 sps:$4 sm:$0xff]  }
  0x5f   : > { %924 = vmatprep.mubr.bf16.mxu0 %v3791_v11  ;;  %3682 = vmatprep.mubr.msk.bf16.mxu1 %vm783_vm1, %v3793_v12  ;;  %v3813_v9 = vld [vmem:[%s4446_s26 + $0x158] ss:$12 sps:$4 sm:$0xff]   ;;  %v1487_v11 = vmul.f32 %v4516_v41, %v1185_v1  ;;  %v1488_v12 = vmul.f32 %v4516_v41, %v1186_v6 }
  0x61   : > { %1578 = vrot.lane.b32.xlu1 %v1487_v11, %s4362_s15  ;;  %1580 = vrot.lane.b32.xlu0 %v1488_v12, %s4362_s15 }
  0x65   : > { %1582 = vrot.lane.b32.xlu1 %v1489_v17, %s4362_s15  ;;  %1584 = vrot.lane.b32.xlu0 %v1490_v18, %s4362_s15 }
  0x66   : > { %925 = vmatmul.mubr.bf16.gmra.mrb[28].mxu0 %v3794_v20  ;;  %3683 = vmatmul.mubr.msk.bf16.gmra.mrb[28].mxu1 %vm783_vm1, %v3795_v21  ;;  %v1189_v20 = vld [vmem:[%s4508_s12 + $0xf8] sm:$0xff]  ;;  %v3814_v21 = vld [vmem:[%s4446_s26 + $0x108] ss:$12 sps:$4 sm:$0xff]  }
  0x67   : > { %932 = vmatprep.mubr.bf16.mxu0 %v3796_v23  ;;  %3686 = vmatprep.mubr.msk.bf16.mxu1 %vm783_vm1, %v3798_v24  ;;  %v3815_v23 = vld [vmem:[%s4446_s26 + $0x170] ss:$12 sps:$4 sm:$0xff]   ;;  %v1491_v24 = vmul.f32 %v4516_v41, %v1189_v20 }
  0x69   : > { %1586 = vrot.lane.b32.xlu1 %v1491_v24, %s4362_s15  ;;  %1876 = vrot.lane.b32.xlu0 %v4511_v40, %s4362_s15 }
  0x6d   : > { %1878 = vrot.lane.b32.xlu1 %v4525_v44, %s4362_s15  ;;  %1880 = vrot.lane.b32.xlu0 %v4522_v43, %s4362_s15 }
  0x6e   : > { %933 = vmatmul.mubr.bf16.gmra.mrb[32].mxu0 %v3799_v32  ;;  %3687 = vmatmul.mubr.msk.bf16.gmra.mrb[32].mxu1 %vm783_vm1, %v3800_v33 }
  0x6f   : > { %940 = vmatprep.mubr.bf16.mxu0 %v3801_v35  ;;  %3690 = vmatprep.mubr.msk.bf16.mxu1 %vm783_vm1, %v3803_v36 }
  0x71   : > { %1882 = vrot.lane.b32.xlu1 %v4533_v47, %s4362_s15  ;;  %1884 = vrot.lane.b32.xlu0 %v4539_v50, %s4362_s15 }
  0x75   : > { %1886 = vrot.lane.b32.xlu1 %v4549_v55, %s4362_s15  ;;  %1888 = vrot.lane.b32.xlu0 %v4553_v56, %s4362_s15 }
  0x76   : > { %941 = vmatmul.mubr.bf16.gmra.mrb[36].mxu0 %v3804_v49  ;;  %3691 = vmatmul.mubr.msk.bf16.gmra.mrb[36].mxu1 %vm783_vm1, %v3805_v51 }
  0x77   : > { %948 = vmatprep.mubr.bf16.mxu0 %v3806_v53  ;;  %3694 = vmatprep.mubr.msk.bf16.mxu1 %vm783_vm1, %v3808_v54 }
  0x79   : > { %1890 = vrot.lane.b32.xlu1 %v4563_v59, %s4362_s15  ;;  %1892 = vrot.lane.b32.xlu0 %v4568_v62, %s4362_s15 }
  0x7d   : > { %1894 = vrot.lane.b32.xlu1 %v4579_v3, %s4362_s15  ;;  %1896 = vrot.lane.b32.xlu0 %v4583_v4, %s4362_s15 }
  0x7e   : > { %949 = vmatmul.mubr.bf16.gmra.mrb[40].mxu0 %v3809_v2  ;;  %3695 = vmatmul.mubr.msk.bf16.gmra.mrb[40].mxu1 %vm783_vm1, %v3810_v5 }
  0x7f   : > { %956 = vmatprep.mubr.bf16.mxu0 %v3811_v8  ;;  %3698 = vmatprep.mubr.msk.bf16.mxu1 %vm783_vm1, %v3813_v9 }
  0x81   : > { %1898 = vrot.lane.b32.xlu1 %v4593_v7, %s4362_s15  ;;  %1900 = vrot.lane.b32.xlu0 %v4598_v10, %s4362_s15 }
  0x85   : > { %1902 = vrot.lane.b32.xlu1 %v4609_v15, %s4362_s15  ;;  %1904 = vrot.lane.b32.xlu0 %v4613_v16, %s4362_s15 }
  0x86   : > { %957 = vmatmul.mubr.bf16.gmra.mrb[44].mxu0 %v3814_v21  ;;  %3699 = vmatmul.mubr.msk.bf16.gmra.mrb[44].mxu1 %vm783_vm1, %v3815_v23 }
  0x89   : > { %1906 = vrot.lane.b32.xlu1 %v4623_v19, %s4362_s15  ;;  %1908 = vrot.lane.b32.xlu0 %v4628_v22, %s4362_s15 }
  0x8d   : > { %1910 = vrot.lane.b32.xlu1 %v4639_v27, %s4362_s15  ;;  %1912 = vrot.lane.b32.xlu0 %v4643_v28, %s4362_s15 }
  0x8f   : > { %v4793_v40 = vpop.permute.xlu0 %1524 }
  0x90   : > { %v4795_v41 = vpop.permute.xlu1 %1528 }
  0x91   : > { %1914 = vrot.lane.b32.xlu1 %v4653_v31, %s4362_s15  ;;  %1916 = vrot.lane.b32.xlu0 %v4658_v34, %s4362_s15 }
  0x93   : > { %v4797_v44 = vpop.permute.xlu0 %1526 }
  0x94   : > { %v4799_v50 = vpop.permute.xlu1 %1530 }
  0x95   : > { %1918 = vrot.lane.b32.xlu1 %v4669_v39, %s4362_s15  ;;  %1920 = vrot.lane.b32.xlu0 %v4673_v42, %s4362_s15 }
  0x97   : > { %v4801_v55 = vpop.permute.xlu0 %1532 }
  0x98   : > { %5910 = vst [vmem:[#allocation2_spill] sm:$0xff] %v4801_v55  ;;  %v4803_v62 = vpop.permute.xlu1 %1534 }
  0x99   : > { %1922 = vrot.lane.b32.xlu1 %v4683_v48, %s4362_s15  ;;  %1924 = vrot.lane.b32.xlu0 %v4688_v52, %s4362_s15  ;;  %5911 = vst [vmem:[#allocation3_spill] sm:$0xff] %v4803_v62 }
  0x9b   : > { %v4805_v3 = vpop.permute.xlu0 %1536 }
  0x9c   : > { %v4807_v10 = vpop.permute.xlu1 %1538 }
  0x9d   : > { %1926 = vrot.lane.b32.xlu1 %v4699_v60, %s4362_s15  ;;  %1928 = vrot.lane.b32.xlu0 %v1184_v61, %s4362_s15  ;;  %5912 = vst [vmem:[#allocation4_spill] sm:$0xff] %v4807_v10 }
  0x9f   : > { %v4809_v15 = vpop.permute.xlu0 %1540 }
  0xa0   : > { %5913 = vst [vmem:[#allocation5_spill] sm:$0xff] %v4809_v15 }
  0xa1   : > { %1930 = vrot.lane.b32.xlu1 %v1185_v1, %s4362_s15  ;;  %1932 = vrot.lane.b32.xlu0 %v1186_v6, %s4362_s15 }
  0xa3   : > { %v4811_v16 = vpop.permute.xlu1 %1542  ;;  %v4813_v19 = vpop.permute.xlu0 %1544 }
  0xa4   : > { %5914 = vst [vmem:[#allocation6_spill] sm:$0xff] %v4811_v16  ;;  %5915 = vst [vmem:[#allocation7_spill] sm:$0xff] %v4813_v19 }
  0xa5   : > { %1934 = vrot.lane.b32.xlu1 %v1187_v13, %s4362_s15  ;;  %1936 = vrot.lane.b32.xlu0 %v1188_v14, %s4362_s15 }
  0xa7   : > { %v4815_v22 = vpop.permute.xlu1 %1546  ;;  %v4817_v25 = vpop.permute.xlu0 %1548 }
  0xa8   : > { %5916 = vst [vmem:[#allocation8_spill] sm:$0xff] %v4815_v22  ;;  %5917 = vst [vmem:[#allocation9_spill] sm:$0xff] %v4817_v25 }
  0xa9   : > { %1938 = vrot.lane.b32.xlu1 %v1189_v20, %s4362_s15 }
  0xab   : > { %v4819_v26 = vpop.permute.xlu1 %1550  ;;  %v4821_v27 = vpop.permute.xlu0 %1552 }
  0xac   : > { %5918 = vst [vmem:[#allocation10_spill] sm:$0xff] %v4819_v26  ;;  %5919 = vst [vmem:[#allocation11_spill] sm:$0xff] %v4821_v27 }
  0xaf   : > { %v4823_v28 = vpop.permute.xlu1 %1554  ;;  %v4829_v45 = vpop.permute.xlu0 %1556 }
  0xb0   : > { %5920 = vst [vmem:[#allocation12_spill] sm:$0xff] %v4823_v28  ;;  %5921 = vst [vmem:[#allocation13_spill] sm:$0xff] %v4829_v45 }
  0xb3   : > { %v4831_v46 = vpop.permute.xlu1 %1558  ;;  %v4837_v1 = vpop.permute.xlu0 %1560 }
  0xb4   : > { %5922 = vst [vmem:[#allocation14_spill] sm:$0xff] %v4831_v46  ;;  %5923 = vst [vmem:[#allocation15_spill] sm:$0xff] %v4837_v1 }
  0xba   : > { %v4839_v2 = vpop.permute.xlu1 %1562 }
  0xbb   : > { %5924 = vst [vmem:[#allocation16_spill] sm:$0xff] %v4839_v2  ;;  %v4845_v23 = vpop.permute.xlu0 %1564 }
  0xbc   : > { %5925 = vst [vmem:[#allocation17_spill] sm:$0xff] %v4845_v23 }
  0xbe   : > { %v4847_v24 = vpop.permute.xlu1 %1566 }
  0xbf   : > { %5926 = vst [vmem:[#allocation18_spill] sm:$0xff] %v4847_v24 }
 0x101   : > { %v3615_v29 = vpop.f32.mrb[0].mxu1  ;;  %v3543_v30 = vpop.f32.mrb[0].mxu0 }
 0x102   : > { %v3616_v31 = vpop.f32.mrb[1].mxu1  ;;  %v3544_v32 = vpop.f32.mrb[1].mxu0 }
 0x103   : > { %v4825_v33 = vadd.f32 %v3616_v31, %v3615_v29  ;;  %v3618_v34 = vpop.f32.mrb[2].mxu1  ;;  %v3545_v35 = vadd.f32 %v3544_v32, %v3543_v30  ;;  %v3546_v36 = vpop.f32.mrb[2].mxu0 }
 0x104   : > { %v3619_v37 = vpop.f32.mrb[3].mxu1  ;;  %v3547_v38 = vpop.f32.mrb[3].mxu0 }
 0x105   : > { %v4827_v39 = vadd.f32 %v3619_v37, %v3618_v34  ;;  %v3548_v42 = vadd.f32 %v3547_v38, %v3546_v36 }
 0x109   : > { %v3621_v48 = vpop.f32.mrb[4].mxu1  ;;  %v3549_v49 = vpop.f32.mrb[4].mxu0 }
 0x10a   : > { %v3622_v51 = vpop.f32.mrb[5].mxu1  ;;  %v3550_v52 = vpop.f32.mrb[5].mxu0 }
 0x10b   : > { %v4833_v53 = vadd.f32 %v3622_v51, %v3621_v48  ;;  %v3624_v54 = vpop.f32.mrb[6].mxu1  ;;  %v3551_v57 = vadd.f32 %v3550_v52, %v3549_v49  ;;  %v3552_v58 = vpop.f32.mrb[6].mxu0 }
 0x10c   : > { %v3625_v60 = vpop.f32.mrb[7].mxu1  ;;  %v3553_v61 = vpop.f32.mrb[7].mxu0 }
 0x10d   : > { %v4835_v63 = vadd.f32 %v3625_v60, %v3624_v54  ;;  %v3554_v0 = vadd.f32 %v3553_v61, %v3552_v58  ;;  %v4856_v54 = vld [vmem:[%s5870_s2] ss:$0 sm:$0xff]  ;;  %v4859_v60 = vpop.permute.xlu0 %1568  ;;  %v4861_v61 = vpop.permute.xlu1 %1570 }
 0x10e   : > { %v879_v58 = vadd.f32 %v3551_v57, %v4856_v54  ;;  %5927 = vst [vmem:[#allocation19_spill] sm:$0xff] %v4859_v60  ;;  %5928 = vst [vmem:[#allocation20_spill] sm:$0xff] %v4861_v61 }
 0x111   : > { %v3627_v5 = vpop.f32.mrb[8].mxu1  ;;  %v3555_v6 = vpop.f32.mrb[8].mxu0 }
 0x112   : > { %v3628_v8 = vpop.f32.mrb[9].mxu1  ;;  %v3556_v9 = vpop.f32.mrb[9].mxu0 }
 0x113   : > { %v4841_v11 = vadd.f32 %v3628_v8, %v3627_v5  ;;  %v3630_v12 = vpop.f32.mrb[10].mxu1  ;;  %v3557_v13 = vadd.f32 %v3556_v9, %v3555_v6  ;;  %v3558_v14 = vpop.f32.mrb[10].mxu0  ;;  %v871_v6 = vadd.f32 %v3545_v35, %v4856_v54 }
 0x114   : > { %v3631_v17 = vpop.f32.mrb[11].mxu1  ;;  %v3559_v18 = vpop.f32.mrb[11].mxu0 }
 0x115   : > { %v4843_v20 = vadd.f32 %v3631_v17, %v3630_v12  ;;  %v3560_v21 = vadd.f32 %v3559_v18, %v3558_v14  ;;  %v882_v14 = vadd.f32 %v3554_v0, %v4856_v54  ;;  %v4878_v0 = vpop.permute.xlu0 %1572 }
 0x116   : > { %5929 = vst [vmem:[#allocation21_spill] sm:$0xff] %v4878_v0 }
 0x119   : > { %v3633_v29 = vpop.f32.mrb[12].mxu1  ;;  %v3561_v30 = vpop.f32.mrb[12].mxu0 }
 0x11a   : > { %v3634_v31 = vpop.f32.mrb[13].mxu1  ;;  %v3562_v32 = vpop.f32.mrb[13].mxu0 }
 0x11b   : > { %v4849_v34 = vadd.f32 %v3634_v31, %v3633_v29  ;;  %v3636_v36 = vpop.f32.mrb[14].mxu1  ;;  %v3563_v37 = vadd.f32 %v3562_v32, %v3561_v30  ;;  %v3564_v38 = vpop.f32.mrb[14].mxu0  ;;  %v874_v30 = vadd.f32 %v3548_v42, %v4856_v54 }
 0x11c   : > { %v3637_v48 = vpop.f32.mrb[15].mxu1  ;;  %v3565_v49 = vpop.f32.mrb[15].mxu0 }
 0x11d   : > { %v4851_v51 = vadd.f32 %v3637_v48, %v3636_v36  ;;  %v3566_v52 = vadd.f32 %v3565_v49, %v3564_v38  ;;  %v895_v48 = vadd.f32 %v3563_v37, %v4856_v54  ;;  %v4880_v49 = vpop.permute.xlu1 %1574 }
 0x11e   : > { %5930 = vst [vmem:[#allocation22_spill] sm:$0xff] %v4880_v49 }
 0x121   : > { %v3672_v5 = vpop.f32.mrb[16].mxu1  ;;  %v3567_v8 = vpop.f32.mrb[16].mxu0 }
 0x122   : > { %v4864_v9 = vadd.f32 %v3672_v5, %v879_v58  ;;  %v1031_v12 = vpop.f32.mrb[17].mxu1  ;;  %v3568_v17 = vpop.f32.mrb[17].mxu0  ;;  %v887_v58 = vadd.f32 %v3557_v13, %v4856_v54 }
 0x123   : > { %v4867_v18 = vadd.f32 %v1031_v12, %v871_v6  ;;  %v3673_v29 = vpop.f32.mrb[18].mxu1  ;;  %v3569_v57 = vadd.f32 %v3568_v17, %v3567_v8  ;;  %v3570_v31 = vpop.f32.mrb[18].mxu0 }
 0x124   : > { %3816 = vtanh.f32 %v4864_v9  ;;  %v4871_v32 = vadd.f32 %v3673_v29, %v882_v14  ;;  %v1034_v36 = vpop.f32.mrb[19].mxu1  ;;  %v3571_v35 = vpop.f32.mrb[19].mxu0  ;;  %v898_v14 = vadd.f32 %v3566_v52, %v4856_v54 }
 0x125   : > { %v4873_v38 = vadd.f32 %v1034_v36, %v874_v30  ;;  %v3572_v5 = vadd.f32 %v3571_v35, %v3570_v31  ;;  %v890_v30 = vadd.f32 %v3560_v21, %v4856_v54  ;;  %v4895_v52 = vpop.permute.xlu0 %1576  ;;  %v4897_v35 = vpop.permute.xlu1 %1578 }
 0x126   : > { %3818 = vtanh.f32 %v4871_v32  ;;  %5931 = vst [vmem:[#allocation23_spill] sm:$0xff] %v4895_v52  ;;  %5932 = vst [vmem:[#allocation24_spill] sm:$0xff] %v4897_v35 }
 0x127   : > { %3820 = vtanh.f32 %v4867_v18  ;;  %v906_v0 = vadd.f32 %v3572_v5, %v4856_v54 }
 0x128   : > { %3822 = vtanh.f32 %v4873_v38 }
 0x129   : > { %v3676_v42 = vpop.f32.mrb[20].mxu1  ;;  %v3573_v6 = vpop.f32.mrb[20].mxu0 }
 0x12a   : > { %v4883_v8 = vadd.f32 %v3676_v42, %v895_v48  ;;  %v1047_v12 = vpop.f32.mrb[21].mxu1  ;;  %v3574_v17 = vpop.f32.mrb[21].mxu0 }
 0x12b   : > { %v4886_v37 = vadd.f32 %v1047_v12, %v887_v58  ;;  %v3677_v29 = vpop.f32.mrb[22].mxu1  ;;  %v3575_v36 = vadd.f32 %v3574_v17, %v3573_v6  ;;  %v3576_v61 = vpop.f32.mrb[22].mxu0  ;;  %v903_v6 = vadd.f32 %v3569_v57, %v4856_v54 }
 0x12c   : > { %v4889_v60 = vadd.f32 %v3677_v29, %v898_v14  ;;  %v1050_v24 = vpop.f32.mrb[23].mxu1  ;;  %v3577_v23 = vpop.f32.mrb[23].mxu0  ;;  %3824 = vtanh.f32 %v4883_v8 }
 0x12d   : > { %v4891_v13 = vadd.f32 %v1050_v24, %v890_v30  ;;  %v3578_v42 = vadd.f32 %v3577_v23, %v3576_v61  ;;  %v911_v21 = vadd.f32 %v3575_v36, %v4856_v54  ;;  %3826 = vtanh.f32 %v4886_v37  ;;  %v4913_v35 = vpop.permute.xlu1 %1582 }
 0x12e   : > { %v3817_v31 = vpop.eup %3816  ;;  %5934 = vst [vmem:[#allocation26_spill] sm:$0xff] %v4913_v35  ;;  %3828 = vtanh.f32 %v4889_v60 }
 0x12f   : > { %2072 = vrot.lane.b32.xlu0 %v3817_v31, %s4362_s15  ;;  %v914_v57 = vadd.f32 %v3578_v42, %v4856_v54  ;;  %3830 = vtanh.f32 %v4891_v13 }
 0x130   : > { %v3819_v48 = vpop.eup %3818 }
 0x131   : > { %v3680_v58 = vpop.f32.mrb[24].mxu1  ;;  %v3579_v12 = vpop.f32.mrb[24].mxu0  ;;  %2074 = vrot.lane.b32.xlu1 %v3819_v48, %s4362_s15 }
 0x132   : > { %v3821_v14 = vpop.eup %3820  ;;  %v1063_v24 = vpop.f32.mrb[25].mxu1  ;;  %v4903_v29 = vadd.f32 %v3680_v58, %v911_v21 }
 0x133   : > { %v3580_v17 = vpop.f32.mrb[25].mxu0  ;;  %v4905_v30 = vadd.f32 %v1063_v24, %v903_v6  ;;  %v3681_v31 = vpop.f32.mrb[26].mxu1  ;;  %2068 = vrot.lane.b32.xlu0 %v3821_v14, %s4362_s15 }
 0x134   : > { %v3582_v23 = vpop.f32.mrb[26].mxu0  ;;  %v1066_v61 = vpop.f32.mrb[27].mxu1  ;;  %v3581_v36 = vadd.f32 %v3580_v17, %v3579_v12  ;;  %v4916_v21 = vadd.f32 %v3681_v31, %v914_v57  ;;  %3832 = vtanh.f32 %v4903_v29 }
 0x135   : > { %v3583_v49 = vpop.f32.mrb[27].mxu0  ;;  %v4910_v48 = vpop.permute.xlu0 %1580  ;;  %v4918_v58 = vadd.f32 %v1066_v61, %v906_v0  ;;  %3834 = vtanh.f32 %v4905_v30 }
 0x136   : > { %5933 = vst [vmem:[#allocation25_spill] sm:$0xff] %v4910_v48  ;;  %v3823_v12 = vpop.eup %3822  ;;  %v3584_v24 = vadd.f32 %v3583_v49, %v3582_v23  ;;  %v919_v48 = vadd.f32 %v3581_v36, %v4856_v54  ;;  %v4930_v61 = vpop.permute.xlu1 %1586  ;;  %3836 = vtanh.f32 %v4916_v21 }
 0x137   : > { %2070 = vrot.lane.b32.xlu1 %v3823_v12, %s4362_s15  ;;  %v3825_v46 = vpop.eup %3824  ;;  %5936 = vst [vmem:[#allocation28_spill] sm:$0xff] %v4930_v61  ;;  %3838 = vtanh.f32 %v4918_v58 }
 0x138   : > { %2080 = vrot.lane.b32.xlu0 %v3825_v46, %s4362_s15  ;;  %v3827_v57 = vpop.eup %3826  ;;  %v922_v12 = vadd.f32 %v3584_v24, %v4856_v54 }
 0x139   : > { %v3585_v6 = vpop.f32.mrb[28].mxu0  ;;  %v3684_v14 = vpop.f32.mrb[28].mxu1 }
 0x13a   : > { %v3586_v17 = vpop.f32.mrb[29].mxu0  ;;  %v1079_v42 = vpop.f32.mrb[29].mxu1 }
 0x13b   : > { %v3588_v52 = vpop.f32.mrb[30].mxu0  ;;  %v3685_v5 = vpop.f32.mrb[30].mxu1  ;;  %v3587_v2 = vadd.f32 %v3586_v17, %v3585_v6  ;;  %v4928_v31 = vadd.f32 %v1079_v42, %v919_v48 }
 0x13c   : > { %v3589_v35 = vpop.f32.mrb[31].mxu0  ;;  %v1082_v1 = vpop.f32.mrb[31].mxu1  ;;  %2076 = vrot.lane.b32.xlu0 %v3827_v57, %s4362_s15 }
 0x13d   : > { %v4923_v0 = vpop.permute.xlu0 %1584  ;;  %v927_v49 = vadd.f32 %v3587_v2, %v4856_v54  ;;  %v3590_v23 = vadd.f32 %v3589_v35, %v3588_v52  ;;  %v3829_v45 = vpop.eup %3828  ;;  %v4944_v24 = vadd.f32 %v1082_v1, %v922_v12  ;;  %3840 = vtanh.f32 %v4928_v31 }
 0x13e   : > { %5935 = vst [vmem:[#allocation27_spill] sm:$0xff] %v4923_v0  ;;  %2082 = vrot.lane.b32.xlu1 %v3829_v45, %s4362_s15  ;;  %v3831_v57 = vpop.eup %3830  ;;  %v4946_v28 = vpop.permute.xlu1 %1878 }
 0x13f   : > { %v4932_v36 = vadd.f32 %v3684_v14, %v927_v49  ;;  %v930_v6 = vadd.f32 %v3590_v23, %v4856_v54  ;;  %5939 = vst [vmem:[#allocation31_spill] sm:$0xff] %v4946_v28  ;;  %v3833_v27 = vpop.eup %3832 }
 0x140   : > { %2088 = vrot.lane.b32.xlu0 %v3833_v27, %s4362_s15 }
 0x141   : > { %5937 = vst [vmem:[#allocation29_spill] sm:$0xff] %v4932_v36  ;;  %v3591_v17 = vpop.f32.mrb[32].mxu0  ;;  %v3688_v0 = vpop.f32.mrb[32].mxu1  ;;  %v4941_v35 = vadd.f32 %v3685_v5, %v930_v6  ;;  %3842 = vtanh.f32 %v4932_v36 }
 0x142   : > { %v3592_v46 = vpop.f32.mrb[33].mxu0  ;;  %v1095_v2 = vpop.f32.mrb[33].mxu1  ;;  %2078 = vrot.lane.b32.xlu1 %v3831_v57, %s4362_s15  ;;  %3844 = vtanh.f32 %v4944_v24 }
 0x143   : > { %v4938_v48 = vpop.permute.xlu0 %1876  ;;  %v3594_v52 = vpop.f32.mrb[34].mxu0  ;;  %v3593_v49 = vadd.f32 %v3592_v46, %v3591_v17  ;;  %3846 = vtanh.f32 %v4941_v35 }
 0x144   : > { %5938 = vst [vmem:[#allocation30_spill] sm:$0xff] %v4938_v48  ;;  %v3595_v14 = vpop.f32.mrb[35].mxu0  ;;  %v3689_v42 = vpop.f32.mrb[34].mxu1 }
 0x145   : > { %v1098_v23 = vpop.f32.mrb[35].mxu1  ;;  %v3596_v61 = vadd.f32 %v3595_v14, %v3594_v52  ;;  %v935_v6 = vadd.f32 %v3593_v49, %v4856_v54 }
 0x147   : > { %v4950_v45 = vpop.permute.xlu0 %1880  ;;  %v938_v1 = vadd.f32 %v3596_v61, %v4856_v54  ;;  %v4957_v28 = vadd.f32 %v1095_v2, %v935_v6 }
 0x148   : > { %5940 = vst [vmem:[#allocation32_spill] sm:$0xff] %v4950_v45  ;;  %v3835_v45 = vpop.eup %3834 }
 0x149   : > { %v3597_v5 = vpop.f32.mrb[36].mxu0  ;;  %v4955_v17 = vpop.f32.mrb[36].mxu1  ;;  %v4959_v57 = vadd.f32 %v1098_v23, %v938_v1  ;;  %2084 = vrot.lane.b32.xlu0 %v3835_v45, %s4362_s15  ;;  %v967_v45 = vadd.f32 %v4825_v33, %v4856_v54  ;;  %3848 = vtanh.f32 %v4957_v28 }
 0x14a   : > { %v3598_v12 = vpop.f32.mrb[37].mxu0  ;;  %v1111_v14 = vpop.f32.mrb[37].mxu1 }
 0x14b   : > { %v3599_v46 = vadd.f32 %v3598_v12, %v3597_v5  ;;  %v3600_v52 = vpop.f32.mrb[38].mxu0  ;;  %v4961_v26 = vpop.f32.mrb[38].mxu1  ;;  %3850 = vtanh.f32 %v4959_v57 }
 0x14c   : > { %v3601_v48 = vpop.f32.mrb[39].mxu0  ;;  %v1114_v49 = vpop.f32.mrb[39].mxu1 }
 0x14d   : > { %v943_v27 = vadd.f32 %v3599_v46, %v4856_v54  ;;  %v3602_v25 = vadd.f32 %v3601_v48, %v3600_v52  ;;  %v3837_v61 = vpop.eup %3836  ;;  %v4967_v5 = vpop.permute.xlu1 %1882  ;;  %v975_v48 = vadd.f32 %v4833_v53, %v4856_v54 }
 0x14e   : > { %5941 = vst [vmem:[#allocation33_spill] sm:$0xff] %v4967_v5  ;;  %2090 = vrot.lane.b32.xlu1 %v3837_v61, %s4362_s15  ;;  %v4972_v23 = vpop.permute.xlu0 %1884  ;;  %v3839_v46 = vpop.eup %3838 }
 0x14f   : > { %v4970_v2 = vadd.f32 %v3688_v0, %v943_v27  ;;  %5942 = vst [vmem:[#allocation34_spill] sm:$0xff] %v4972_v23  ;;  %v946_v52 = vadd.f32 %v3602_v25, %v4856_v54  ;;  %v3841_v25 = vpop.eup %3840 }
 0x150   : > { %2092 = vrot.lane.b32.xlu0 %v3841_v25, %s4362_s15 }
 0x151   : > { %v3603_v6 = vpop.f32.mrb[40].mxu0  ;;  %v3696_v1 = vpop.f32.mrb[40].mxu1  ;;  %v4985_v53 = vadd.f32 %v3689_v42, %v946_v52  ;;  %3852 = vtanh.f32 %v4970_v2 }
 0x152   : > { %v3604_v12 = vpop.f32.mrb[41].mxu0  ;;  %v4979_v16 = vadd.f32 %v3696_v1, %v975_v48  ;;  %v1127_v61 = vpop.f32.mrb[41].mxu1  ;;  %2086 = vrot.lane.b32.xlu1 %v3839_v46, %s4362_s15 }
 0x153   : > { %v3605_v5 = vadd.f32 %v3604_v12, %v3603_v6  ;;  %v3606_v0 = vpop.f32.mrb[42].mxu0  ;;  %v4982_v27 = vadd.f32 %v1127_v61, %v967_v45  ;;  %v3697_v23 = vpop.f32.mrb[42].mxu1  ;;  %v978_v12 = vadd.f32 %v4835_v63, %v4856_v54  ;;  %3854 = vtanh.f32 %v4985_v53 }
 0x154   : > { %v3607_v15 = vpop.f32.mrb[43].mxu0  ;;  %v1130_v22 = vpop.f32.mrb[43].mxu1  ;;  %3856 = vtanh.f32 %v4979_v16 }
 0x155   : > { %v951_v33 = vadd.f32 %v3605_v5, %v4856_v54  ;;  %v4989_v48 = vpop.permute.xlu1 %1886  ;;  %v4991_v6 = vpop.permute.xlu0 %1888  ;;  %v970_v5 = vadd.f32 %v4827_v39, %v4856_v54  ;;  %v5000_v19 = vadd.f32 %v3697_v23, %v978_v12  ;;  %3858 = vtanh.f32 %v4982_v27 }
 0x156   : > { %5943 = vst [vmem:[#allocation35_spill] sm:$0xff] %v4989_v48  ;;  %5944 = vst [vmem:[#allocation36_spill] sm:$0xff] %v4991_v6  ;;  %v3843_v46 = vpop.eup %3842  ;;  %v3608_v6 = vadd.f32 %v3607_v15, %v3606_v0 }
 0x157   : > { %v4994_v1 = vadd.f32 %v1111_v14, %v951_v33  ;;  %v5002_v55 = vadd.f32 %v1130_v22, %v970_v5  ;;  %2096 = vrot.lane.b32.xlu0 %v3843_v46, %s4362_s15  ;;  %v3845_v10 = vpop.eup %3844  ;;  %v991_v22 = vadd.f32 %v4849_v34, %v4856_v54  ;;  %v994_v34 = vadd.f32 %v4851_v51, %v4856_v54 }
 0x158   : > { %v954_v39 = vadd.f32 %v3608_v6, %v4856_v54  ;;  %2094 = vrot.lane.b32.xlu1 %v3845_v10, %s4362_s15  ;;  %v3847_v15 = vpop.eup %3846  ;;  %v983_v6 = vadd.f32 %v4841_v11, %v4856_v54 }
 0x159   : > { %v3609_v45 = vpop.f32.mrb[44].mxu0  ;;  %v3700_v42 = vpop.f32.mrb[44].mxu1  ;;  %5945 = vst [vmem:[#allocation37_spill] sm:$0xff] %v5002_v55  ;;  %3860 = vtanh.f32 %v4994_v1 }
 0x15a   : > { %v3610_v52 = vpop.f32.mrb[45].mxu0  ;;  %v1143_v61 = vpop.f32.mrb[45].mxu1  ;;  %v5012_v23 = vadd.f32 %v1114_v49, %v954_v39  ;;  %v5017_v0 = vadd.f32 %v3700_v42, %v991_v22  ;;  %3862 = vtanh.f32 %v5000_v19 }
 0x15b   : > { %v3612_v48 = vpop.f32.mrb[46].mxu0  ;;  %v3701_v62 = vpop.f32.mrb[46].mxu1  ;;  %v3611_v10 = vadd.f32 %v3610_v52, %v3609_v45  ;;  %v5027_v49 = vadd.f32 %v1143_v61, %v983_v6  ;;  %v986_v61 = vadd.f32 %v4843_v20, %v4856_v54  ;;  %3864 = vtanh.f32 %v5002_v55 }
 0x15c   : > { %v3613_v14 = vpop.f32.mrb[47].mxu0  ;;  %v1146_v33 = vpop.f32.mrb[47].mxu1  ;;  %5947 = vst [vmem:[#allocation39_spill] sm:$0xff] %v5012_v23  ;;  %5948 = vst [vmem:[#allocation40_spill] sm:$0xff] %v5017_v0  ;;  %2098 = vrot.lane.b32.xlu1 %v3847_v15, %s4362_s15  ;;  %v5034_v39 = vadd.f32 %v3701_v62, %v994_v34  ;;  %3866 = vtanh.f32 %v5012_v23 }
 0x15d   : > { %v5006_v63 = vpop.permute.xlu1 %1890  ;;  %v5008_v25 = vpop.permute.xlu0 %1892  ;;  %5951 = vst [vmem:[#allocation43_spill] sm:$0xff] %v5027_v49  ;;  %v959_v42 = vadd.f32 %v3611_v10, %v4856_v54  ;;  %v3614_v15 = vadd.f32 %v3613_v14, %v3612_v48  ;;  %v5051_v48 = vadd.f32 %v1146_v33, %v986_v61  ;;  %v5081_v61 = vld [vmem:[%s5871_s3] ss:$0 sm:$0xff]  ;;  %3868 = vtanh.f32 %v5017_v0 }
 0x15e   : > { %5946 = vst [vmem:[#allocation38_spill] sm:$0xff] %v5008_v25  ;;  %v3849_v5 = vpop.eup %3848  ;;  %5952 = vst [vmem:[#allocation44_spill] sm:$0xff] %v5034_v39  ;;  %3870 = vtanh.f32 %v5027_v49 }
 0x15f   : > { %2100 = vrot.lane.b32.xlu0 %v3849_v5, %s4362_s15  ;;  %v5041_v45 = vadd.f32 %v4955_v17, %v959_v42  ;;  %v3851_v52 = vpop.eup %3850  ;;  %v962_v51 = vadd.f32 %v3614_v15, %v4856_v54  ;;  %5957 = vst [vmem:[#allocation49_spill] sm:$0xff] %v5051_v48 }
 0x160   : > { %2102 = vrot.lane.b32.xlu1 %v3851_v52, %s4362_s15  ;;  %v3853_v6 = vpop.eup %3852 }
 0x161   : > { %v5019_v12 = vpop.permute.xlu1 %1894  ;;  %v5022_v46 = vpop.permute.xlu0 %1896  ;;  %5955 = vst [vmem:[#allocation47_spill] sm:$0xff] %v5041_v45  ;;  %v5049_v62 = vadd.f32 %v4961_v26, %v962_v51  ;;  %3872 = vtanh.f32 %v5041_v45 }
 0x162   : > { %5949 = vst [vmem:[#allocation41_spill] sm:$0xff] %v5019_v12  ;;  %5950 = vst [vmem:[#allocation42_spill] sm:$0xff] %v5022_v46  ;;  %v3855_v10 = vpop.eup %3854  ;;  %3874 = vtanh.f32 %v5034_v39 }
 0x163   : > { %5956 = vst [vmem:[#allocation48_spill] sm:$0xff] %v5049_v62  ;;  %2104 = vrot.lane.b32.xlu0 %v3853_v6, %s4362_s15  ;;  %v3857_v26 = vpop.eup %3856  ;;  %v1199_v6 = vmul.f32 %v5081_v61, %v4522_v43 }
 0x164   : > { %2106 = vrot.lane.b32.xlu1 %v3855_v10, %s4362_s15  ;;  %v3859_v34 = vpop.eup %3858  ;;  %v1200_v10 = vmul.f32 %v5081_v61, %v4533_v47  ;;  %v1203_v47 = vmul.f32 %v5081_v61, %v4553_v56 }
 0x165   : > { %v5036_v22 = vpop.permute.xlu1 %1898  ;;  %v5038_v11 = vpop.permute.xlu0 %1900 }
 0x166   : > { %5953 = vst [vmem:[#allocation45_spill] sm:$0xff] %v5036_v22  ;;  %5954 = vst [vmem:[#allocation46_spill] sm:$0xff] %v5038_v11  ;;  %v3861_v42 = vpop.eup %3860  ;;  %v1232_v43 = vadd.f32 %v1200_v10, %v4871_v32 }
 0x167   : > { %2120 = vrot.lane.b32.xlu0 %v3857_v26, %s4362_s15  ;;  %v3863_v51 = vpop.eup %3862 }
 0x168   : > { %2122 = vrot.lane.b32.xlu1 %v3863_v51, %s4362_s15  ;;  %v3430_v56 = vmul.f32 -1.442695, %v1232_v43 }
 0x169   : > { %v5053_v14 = vpop.permute.xlu1 %1902  ;;  %v5055_v17 = vpop.permute.xlu0 %1904 }
 0x16a   : > { %5958 = vst [vmem:[#allocation50_spill] sm:$0xff] %v5053_v14  ;;  %5959 = vst [vmem:[#allocation51_spill] sm:$0xff] %v5055_v17 }
 0x16b   : > { %2116 = vrot.lane.b32.xlu0 %v3859_v34, %s4362_s15 }
 0x16d   : > { %v5060_v20 = vpop.permute.xlu1 %1906  ;;  %v5062_v54 = vpop.permute.xlu0 %1908 }
 0x16e   : > { %5960 = vst [vmem:[#allocation52_spill] sm:$0xff] %v5060_v20  ;;  %5961 = vst [vmem:[#allocation53_spill] sm:$0xff] %v5062_v54  ;;  %v1231_v54 = vadd.f32 %v1199_v6, %v4864_v9 }
 0x16f   : > { %2108 = vrot.lane.b32.xlu0 %v3861_v42, %s4362_s15  ;;  %v4329_v42 = vld [vmem:[%s4508_s12 + $0x8] sm:$0xff] }
 0x171   : > { %v5067_v33 = vpop.permute.xlu1 %1910  ;;  %v5069_v5 = vpop.permute.xlu0 %1912 }
 0x172   : > { %5962 = vst [vmem:[#allocation54_spill] sm:$0xff] %v5067_v33  ;;  %5963 = vst [vmem:[#allocation55_spill] sm:$0xff] %v5069_v5  ;;  %v1198_v33 = vmul.f32 %v4329_v42, %v5081_v61  ;;  %v1204_v42 = vmul.f32 %v5081_v61, %v4563_v59 }
 0x174   : > { %v1230_v10 = vadd.f32 %v1198_v33, %v4873_v38 }
 0x175   : > { %v5074_v15 = vpop.permute.xlu1 %1914  ;;  %v5076_v52 = vpop.permute.xlu0 %1916 }
 0x176   : > { %5964 = vst [vmem:[#allocation56_spill] sm:$0xff] %v5074_v15  ;;  %5965 = vst [vmem:[#allocation57_spill] sm:$0xff] %v5076_v52  ;;  %v3865_v52 = vpop.eup %3864  ;;  %v4328_v15 = vld [vmem:[%s4508_s12] sm:$0xff]  ;;  %v3428_v59 = vmul.f32 -1.442695, %v1230_v10 }
 0x177   : > { %v1197_v5 = vmul.f32 %v4328_v15, %v5081_v61  ;;  %2118 = vrot.lane.b32.xlu1 %v3865_v52, %s4362_s15  ;;  %v3867_v51 = vpop.eup %3866 }
 0x178   : > { %v3869_v6 = vpop.eup %3868 }
 0x179   : > { %v5090_v26 = vpop.permute.xlu1 %1918  ;;  %v5092_v34 = vpop.permute.xlu0 %1920  ;;  %2128 = vrot.lane.b32.xlu0 %v3869_v6, %s4362_s15 }
 0x17a   : > { %5966 = vst [vmem:[#allocation58_spill] sm:$0xff] %v5090_v26  ;;  %5967 = vst [vmem:[#allocation59_spill] sm:$0xff] %v5092_v34  ;;  %v1229_v34 = vadd.f32 %v1197_v5, %v4867_v18  ;;  %v3429_v26 = vmul.f32 -1.442695, %v1231_v54  ;;  %v4330_v5 = vld [vmem:[%s4508_s12 + $0x20] sm:$0xff]  ;;  %v1236_v54 = vadd.f32 %v1204_v42, %v4889_v60  ;;  %v3871_v6 = vpop.eup %3870 }
 0x17b   : > { %2110 = vrot.lane.b32.xlu1 %v3867_v51, %s4362_s15  ;;  %v1201_v20 = vmul.f32 %v4330_v5, %v5081_v61  ;;  %v1235_v51 = vadd.f32 %v1203_v47, %v4883_v8 }
 0x17c   : > { %3876 = vpow2.f32 %v3429_v26  ;;  %v4332_v26 = vld [vmem:[%s4508_s12 + $0x40] sm:$0xff]  ;;  %v3434_v42 = vmul.f32 -1.442695, %v1236_v54 }
 0x17d   : > { %v5106_v15 = vpop.permute.xlu1 %1922  ;;  %v5109_v52 = vpop.permute.xlu0 %1924  ;;  %3878 = vpow2.f32 %v3430_v56  ;;  %v3433_v47 = vmul.f32 -1.442695, %v1235_v51  ;;  %v1233_v5 = vadd.f32 %v1201_v20, %v4886_v37  ;;  %2124 = vrot.lane.b32.xlu0 %v3871_v6, %s4362_s15 }
 0x17e   : > { %5968 = vst [vmem:[#allocation60_spill] sm:$0xff] %v5106_v15  ;;  %5969 = vst [vmem:[#allocation61_spill] sm:$0xff] %v5109_v52  ;;  %v3427_v15 = vmul.f32 -1.442695, %v1229_v34  ;;  %v4331_v52 = vld [vmem:[%s4508_s12 + $0x28] sm:$0xff]  ;;  %3880 = vtanh.f32 %v5051_v48  ;;  %v1207_v34 = vmul.f32 %v5081_v61, %v4583_v4  ;;  %v3873_v56 = vpop.eup %3872 }
 0x17f   : > { %v1202_v17 = vmul.f32 %v4331_v52, %v5081_v61  ;;  %v1205_v52 = vmul.f32 %v4332_v26, %v5081_v61  ;;  %v3431_v4 = vmul.f32 -1.442695, %v1233_v5 }
 0x180   : > { %3882 = vpow2.f32 %v3427_v15  ;;  %v1239_v20 = vadd.f32 %v1207_v34, %v4903_v29 }
 0x181   : > { %v5122_v33 = vpop.permute.xlu1 %1926  ;;  %v5124_v43 = vpop.permute.xlu0 %1928  ;;  %3884 = vpow2.f32 %v3428_v59  ;;  %v1234_v10 = vadd.f32 %v1202_v17, %v4891_v13  ;;  %2112 = vrot.lane.b32.xlu0 %v3873_v56, %s4362_s15  ;;  %v4334_v56 = vld [vmem:[%s4508_s12 + $0x60] sm:$0xff] }
 0x182   : > { %5970 = vst [vmem:[#allocation62_spill] sm:$0xff] %v5122_v33  ;;  %5971 = vst [vmem:[#allocation63_spill] sm:$0xff] %v5124_v43  ;;  %v1208_v33 = vmul.f32 %v5081_v61, %v4593_v7  ;;  %v3875_v43 = vpop.eup %3874  ;;  %3886 = vtanh.f32 %v5049_v62  ;;  %v1237_v7 = vadd.f32 %v1205_v52, %v4905_v30  ;;  %v1209_v14 = vmul.f32 %v4334_v56, %v5081_v61 }
 0x183   : > { %3888 = vpow2.f32 %v3433_v47  ;;  %2130 = vrot.lane.b32.xlu1 %v3875_v43, %s4362_s15  ;;  %v3432_v17 = vmul.f32 -1.442695, %v1234_v10  ;;  %v4333_v47 = vld [vmem:[%s4508_s12 + $0x48] sm:$0xff]  ;;  %v3437_v43 = vmul.f32 -1.442695, %v1239_v20 }
 0x184   : > { %3890 = vpow2.f32 %v3434_v42  ;;  %v1240_v59 = vadd.f32 %v1208_v33, %v4916_v21  ;;  %v1206_v34 = vmul.f32 %v4333_v47, %v5081_v61  ;;  %v3435_v26 = vmul.f32 -1.442695, %v1237_v7 }
 0x185   : > { %v5139_v15 = vpop.permute.xlu1 %1930  ;;  %v5141_v51 = vpop.permute.xlu0 %1932  ;;  %3892 = vpow2.f32 %v3431_v4  ;;  %v1241_v56 = vadd.f32 %v1209_v14, %v4928_v31 }
 0x186   : > { %5972 = vst [vmem:[#allocation64_spill] sm:$0xff] %v5139_v15  ;;  %5973 = vst [vmem:[#allocation65_spill] sm:$0xff] %v5141_v51  ;;  %v3877_v54 = vpop.eup %3876  ;;  %3894 = vpow2.f32 %v3432_v17  ;;  %v3438_v15 = vmul.f32 -1.442695, %v1240_v59  ;;  %v1238_v4 = vadd.f32 %v1206_v34, %v4918_v58 }
 0x187   : > { %v3879_v6 = vpop.eup %3878  ;;  %v1359_v10 = vadd.f32 1.0, %v3877_v54  ;;  %3896 = vpow2.f32 %v3437_v43  ;;  %v4335_v43 = vld [vmem:[%s4508_s12 + $0x70] sm:$0xff] }
 0x188   : > { %v3881_v5 = vpop.eup %3880  ;;  %v1360_v11 = vadd.f32 1.0, %v3879_v6  ;;  %3898 = vpow2.f32 %v3435_v26  ;;  %v3436_v54 = vmul.f32 -1.442695, %v1238_v4  ;;  %v1211_v26 = vmul.f32 %v4335_v43, %v5081_v61 }
 0x189   : > { %2126 = vrot.lane.b32.xlu1 %v3881_v5, %s4362_s15  ;;  %v5149_v42 = vpop.permute.xlu1 %1934  ;;  %v5151_v52 = vpop.permute.xlu0 %1936  ;;  %3900 = vpow2.f32 %v3438_v15 }
 0x18a   : > { %v3883_v51 = vpop.eup %3882  ;;  %5974 = vst [vmem:[#allocation66_spill] sm:$0xff] %v5149_v42  ;;  %5975 = vst [vmem:[#allocation67_spill] sm:$0xff] %v5151_v52  ;;  %3902 = vrcp.f32 %v1359_v10  ;;  %v3439_v10 = vmul.f32 -1.442695, %v1241_v56 }
 0x18b   : > { %v3885_v33 = vpop.eup %3884  ;;  %v1357_v17 = vadd.f32 1.0, %v3883_v51  ;;  %3904 = vrcp.f32 %v1360_v11 }
 0x18c   : > { %v3887_v20 = vpop.eup %3886  ;;  %v1358_v59 = vadd.f32 1.0, %v3885_v33 }
 0x18d   : > { %v3889_v7 = vpop.eup %3888  ;;  %2114 = vrot.lane.b32.xlu1 %v3887_v20, %s4362_s15  ;;  %v5158_v6 = vpop.permute.xlu1 %1938  ;;  %3906 = vrcp.f32 %v1357_v17  ;;  %v4336_v20 = vld [vmem:[%s4508_s12 + $0x68] sm:$0xff]  ;;  %v1243_v17 = vadd.f32 %v1211_v26, %v4932_v36 }
 0x18e   : > { %v3891_v5 = vpop.eup %3890  ;;  %5976 = vst [vmem:[#allocation68_spill] sm:$0xff] %v5158_v6  ;;  %v1363_v34 = vadd.f32 1.0, %v3889_v7  ;;  %3908 = vrcp.f32 %v1358_v59  ;;  %v1210_v42 = vmul.f32 %v4336_v20, %v5081_v61  ;;  %v4337_v20 = vld [vmem:[%s4508_s12 + $0x78] sm:$0xff] }
 0x18f   : > { %v3893_v51 = vpop.eup %3892  ;;  %v1364_v33 = vadd.f32 1.0, %v3891_v5  ;;  %3910 = vpow2.f32 %v3436_v54  ;;  %v1212_v54 = vmul.f32 %v4337_v20, %v5081_v61 }
 0x190   : > { %v3895_v15 = vpop.eup %3894  ;;  %v1361_v52 = vadd.f32 1.0, %v3893_v51  ;;  %3912 = vrcp.f32 %v1363_v34  ;;  %v1242_v59 = vadd.f32 %v1210_v42, %v4944_v24  ;;  %v3441_v51 = vmul.f32 -1.442695, %v1243_v17  ;;  %v4339_v17 = vld [vmem:[%s4508_s12 + $0x88] sm:$0xff] }
 0x191   : > { %v3897_v11 = vpop.eup %3896  ;;  %v1362_v7 = vadd.f32 1.0, %v3895_v15  ;;  %3914 = vrcp.f32 %v1364_v33 }
 0x192   : > { %v3899_v6 = vpop.eup %3898  ;;  %3916 = vpow2.f32 %v3439_v10  ;;  %v1367_v56 = vadd.f32 1.0, %v3897_v11  ;;  %v4338_v10 = vld [vmem:[%s4508_s12 + $0x80] sm:$0xff]  ;;  %v3440_v42 = vmul.f32 -1.442695, %v1242_v59 }
 0x193   : > { %v3901_v43 = vpop.eup %3900  ;;  %3918 = vrcp.f32 %v1361_v52  ;;  %v1213_v46 = vmul.f32 %v4338_v10, %v5081_v61  ;;  %v1365_v20 = vadd.f32 1.0, %v3899_v6  ;;  %v1244_v52 = vadd.f32 %v1212_v54, %v4941_v35 }
 0x194   : > { %v3903_v5 = vpop.eup %3902  ;;  %3920 = vrcp.f32 %v1362_v7  ;;  %v1368_v7 = vadd.f32 1.0, %v3901_v43 }
 0x195   : > { %v3905_v12 = vpop.eup %3904  ;;  %3922 = vrcp.f32 %v1367_v56  ;;  %v3442_v54 = vmul.f32 -1.442695, %v1244_v52 }
 0x196   : > { %3924 = vpow2.f32 %v3441_v51 }
 0x197   : > { %v3907_v26 = vpop.eup %3906  ;;  %3926 = vpow2.f32 %v3440_v42 }
 0x198   : > { %v3909_v22 = vpop.eup %3908  ;;  %3928 = vrcp.f32 %v1365_v20 }
 0x199   : > { %v3911_v11 = vpop.eup %3910  ;;  %3930 = vrcp.f32 %v1368_v7 }
 0x19a   : > { %v1366_v43 = vadd.f32 1.0, %v3911_v11  ;;  %3932 = vpow2.f32 %v3442_v54 }
 0x19c   : > { %3934 = vrcp.f32 %v1366_v43 }
 0x1a1   : > { %v2073_v47 = vpop.permute.xlu0 %2072 }
 0x1a2   : > { %v2166_v34 = vmul.f32 %v3903_v5, %v2073_v47  ;;  %v1214_v5 = vmul.f32 %v4339_v17, %v5081_v61 }
 0x1a3   : > { %v2075_v4 = vpop.permute.xlu1 %2074 }
 0x1a4   : > { %v2167_v33 = vmul.f32 %v3905_v12, %v2075_v4  ;;  %2232 = vrot.lane.b32.xlu0 %v2166_v34, %s4362_s15  ;;  %v3913_v12 = vpop.eup %3912  ;;  %v1245_v34 = vadd.f32 %v1213_v46, %v4957_v28  ;;  %v1246_v46 = vadd.f32 %v1214_v5, %v4959_v57 }
 0x1a5   : > { %v2069_v14 = vpop.permute.xlu0 %2068  ;;  %v3915_v4 = vpop.eup %3914 }
 0x1a6   : > { %v2164_v36 = vmul.f32 %v3907_v26, %v2069_v14  ;;  %2234 = vrot.lane.b32.xlu1 %v2167_v33, %s4362_s15  ;;  %v4340_v26 = vld [vmem:[%s4508_s12 + $0x90] sm:$0xff]  ;;  %v3443_v10 = vmul.f32 -1.442695, %v1245_v34  ;;  %v3444_v17 = vmul.f32 -1.442695, %v1246_v46 }
 0x1a7   : > { %v1215_v33 = vmul.f32 %v4340_v26, %v5081_v61 }
 0x1a8   : > { %2228 = vrot.lane.b32.xlu0 %v2164_v36, %s4362_s15  ;;  %3936 = vpow2.f32 %v3443_v10 }
 0x1a9   : > { %v2071_v25 = vpop.permute.xlu1 %2070 }
 0x1aa   : > { %v2081_v15 = vpop.permute.xlu0 %2080  ;;  %v2165_v47 = vmul.f32 %v3909_v22, %v2071_v25  ;;  %v3917_v22 = vpop.eup %3916 }
 0x1ab   : > { %v2170_v14 = vmul.f32 %v3913_v12, %v2081_v15  ;;  %v3919_v56 = vpop.eup %3918  ;;  %v4341_v12 = vld [vmem:[%s4508_s12 + $0x98] sm:$0xff] }
 0x1ac   : > { %2230 = vrot.lane.b32.xlu1 %v2165_v47, %s4362_s15  ;;  %v3921_v51 = vpop.eup %3920  ;;  %v1369_v47 = vadd.f32 1.0, %v3917_v22 }
 0x1ad   : > { %2240 = vrot.lane.b32.xlu0 %v2170_v14, %s4362_s15  ;;  %v3923_v52 = vpop.eup %3922  ;;  %v1247_v14 = vadd.f32 %v1215_v33, %v4970_v2 }
 0x1ae   : > { %v2077_v59 = vpop.permute.xlu0 %2076  ;;  %v3925_v11 = vpop.eup %3924  ;;  %3938 = vrcp.f32 %v1369_v47 }
 0x1af   : > { %v2168_v36 = vmul.f32 %v3919_v56, %v2077_v59  ;;  %v3927_v5 = vpop.eup %3926  ;;  %v1371_v54 = vadd.f32 1.0, %v3925_v11  ;;  %3940 = vpow2.f32 %v3444_v17  ;;  %v3445_v43 = vmul.f32 -1.442695, %v1247_v14 }
 0x1b0   : > { %v2083_v6 = vpop.permute.xlu1 %2082  ;;  %v3929_v59 = vpop.eup %3928  ;;  %v1370_v26 = vadd.f32 1.0, %v3927_v5 }
 0x1b1   : > { %v2171_v25 = vmul.f32 %v3915_v4, %v2083_v6  ;;  %2236 = vrot.lane.b32.xlu0 %v2168_v36, %s4362_s15  ;;  %v1216_v4 = vmul.f32 %v4341_v12, %v5081_v61  ;;  %v3931_v34 = vpop.eup %3930  ;;  %v4342_v36 = vld [vmem:[%s4508_s12 + $0xd0] sm:$0xff]  ;;  %3942 = vrcp.f32 %v1371_v54  ;;  %v4343_v12 = vld [vmem:[%s4508_s12 + $0xc0] sm:$0xff]  ;;  %v4344_v54 = vld [vmem:[%s4508_s12 + $0xd8] sm:$0xff] }
 0x1b2   : > { %v2089_v20 = vpop.permute.xlu0 %2088  ;;  %v3933_v33 = vpop.eup %3932  ;;  %3944 = vpow2.f32 %v3445_v43 }
 0x1b3   : > { %2242 = vrot.lane.b32.xlu1 %v2171_v25, %s4362_s15  ;;  %v2174_v7 = vmul.f32 %v3923_v52, %v2089_v20  ;;  %v1248_v56 = vadd.f32 %v1216_v4, %v4985_v53  ;;  %v3935_v10 = vpop.eup %3934  ;;  %3946 = vrcp.f32 %v1370_v26  ;;  %v1372_v52 = vadd.f32 1.0, %v3933_v33 }
 0x1b4   : > { %v2079_v15 = vpop.permute.xlu1 %2078  ;;  %v3937_v47 = vpop.eup %3936  ;;  %v1221_v4 = vmul.f32 %v4343_v12, %v5081_v61 }
 0x1b5   : > { %v2169_v42 = vmul.f32 %v3921_v51, %v2079_v15  ;;  %2248 = vrot.lane.b32.xlu0 %v2174_v7, %s4362_s15  ;;  %v1223_v15 = vmul.f32 %v4342_v36, %v5081_v61  ;;  %v1373_v14 = vadd.f32 1.0, %v3937_v47 }
 0x1b7   : > { %2238 = vrot.lane.b32.xlu1 %v2169_v42, %s4362_s15  ;;  %v3446_v42 = vmul.f32 -1.442695, %v1248_v56  ;;  %v1255_v11 = vadd.f32 %v1223_v15, %v4979_v16  ;;  %v1253_v56 = vadd.f32 %v1221_v4, %v4982_v27 }
 0x1b8   : > { %v3939_v7 = vpop.eup %3938 }
 0x1b9   : > { %3948 = vpow2.f32 %v3446_v42 }
 0x1ba   : > { %3950 = vrcp.f32 %v1372_v52 }
 0x1bb   : > { %v2085_v6 = vpop.permute.xlu0 %2084  ;;  %3952 = vrcp.f32 %v1373_v14 }
 0x1bc   : > { %v2172_v22 = vmul.f32 %v3929_v59, %v2085_v6  ;;  %v3941_v6 = vpop.eup %3940  ;;  %v3453_v59 = vmul.f32 -1.442695, %v1255_v11 }
 0x1bd   : > { %v1374_v26 = vadd.f32 1.0, %v3941_v6 }
 0x1be   : > { %2244 = vrot.lane.b32.xlu0 %v2172_v22, %s4362_s15  ;;  %v4345_v22 = vld [vmem:[%s4508_s12 + $0xa0] sm:$0xff]  ;;  %3954 = vpow2.f32 %v3453_v59 }
 0x1bf   : > { %v1217_v43 = vmul.f32 %v4345_v22, %v5081_v61  ;;  %3956 = vrcp.f32 %v1374_v26 }
 0x1c0   : > { %v2091_v25 = vpop.permute.xlu1 %2090 }
 0x1c1   : > { %v2175_v51 = vmul.f32 %v3931_v34, %v2091_v25  ;;  %v1224_v34 = vmul.f32 %v4344_v54, %v5081_v61  ;;  %v3943_v25 = vpop.eup %3942  ;;  %v1249_v42 = vadd.f32 %v1217_v43, %v4994_v1  ;;  %v4347_v54 = vld [vmem:[%s4508_s12 + $0xa8] sm:$0xff] }
 0x1c2   : > { %v2093_v17 = vpop.permute.xlu0 %2092  ;;  %v3945_v36 = vpop.eup %3944 }
 0x1c3   : > { %2250 = vrot.lane.b32.xlu1 %v2175_v51, %s4362_s15  ;;  %v2176_v5 = vmul.f32 %v3939_v7, %v2093_v17  ;;  %v3947_v15 = vpop.eup %3946  ;;  %v1375_v47 = vadd.f32 1.0, %v3945_v36  ;;  %v4346_v7 = vld [vmem:[%s4508_s12 + $0xc8] sm:$0xff] }
 0x1c4   : > { %v2087_v46 = vpop.permute.xlu1 %2086  ;;  %v3949_v11 = vpop.eup %3948  ;;  %v1222_v12 = vmul.f32 %v4346_v7, %v5081_v61 }
 0x1c5   : > { %v2173_v20 = vmul.f32 %v3935_v10, %v2087_v46  ;;  %2252 = vrot.lane.b32.xlu0 %v2176_v5, %s4362_s15  ;;  %v1256_v10 = vadd.f32 %v1224_v34, %v5000_v19  ;;  %v3951_v4 = vpop.eup %3950  ;;  %v3447_v5 = vmul.f32 -1.442695, %v1249_v42  ;;  %v1376_v59 = vadd.f32 1.0, %v3949_v11  ;;  %v4349_v11 = vld [vmem:[%s4508_s12 + $0xe0] sm:$0xff] }
 0x1c6   : > { %v1218_v34 = vmul.f32 %v4347_v54, %v5081_v61  ;;  %v3953_v22 = vpop.eup %3952  ;;  %v1225_v7 = vmul.f32 %v4349_v11, %v5081_v61 }
 0x1c7   : > { %2246 = vrot.lane.b32.xlu1 %v2173_v20, %s4362_s15  ;;  %v3451_v20 = vmul.f32 -1.442695, %v1253_v56  ;;  %v3454_v17 = vmul.f32 -1.442695, %v1256_v10 }
 0x1c8   : > { %v3955_v56 = vpop.eup %3954  ;;  %v1250_v36 = vadd.f32 %v1218_v34, %v5012_v23 }
 0x1c9   : > { %v2097_v51 = vpop.permute.xlu0 %2096  ;;  %3958 = vpow2.f32 %v3451_v20  ;;  %v3957_v10 = vpop.eup %3956 }
 0x1ca   : > { %v2178_v33 = vmul.f32 %v3943_v25, %v2097_v51  ;;  %v2095_v46 = vpop.permute.xlu1 %2094  ;;  %3960 = vrcp.f32 %v1375_v47  ;;  %v1254_v25 = vadd.f32 %v1222_v12, %v5002_v55  ;;  %v4348_v51 = vld [vmem:[%s4508_s12 + $0xf0] sm:$0xff]  ;;  %v3448_v12 = vmul.f32 -1.442695, %v1250_v36 }
 0x1cb   : > { %v2177_v52 = vmul.f32 %v3947_v15, %v2095_v46  ;;  %3962 = vpow2.f32 %v3454_v17  ;;  %v1227_v26 = vmul.f32 %v4348_v51, %v5081_v61  ;;  %v1383_v46 = vadd.f32 1.0, %v3955_v56 }
 0x1cc   : > { %2256 = vrot.lane.b32.xlu0 %v2178_v33, %s4362_s15  ;;  %3964 = vpow2.f32 %v3447_v5  ;;  %v3452_v15 = vmul.f32 -1.442695, %v1254_v25  ;;  %v1257_v56 = vadd.f32 %v1225_v7, %v5027_v49 }
 0x1cd   : > { %2254 = vrot.lane.b32.xlu1 %v2177_v52, %s4362_s15  ;;  %3966 = vrcp.f32 %v1376_v59  ;;  %v1259_v20 = vadd.f32 %v1227_v26, %v5017_v0  ;;  %v4350_v59 = vld [vmem:[%s4508_s12 + $0xf8] sm:$0xff] }
 0x1ce   : > { %v2099_v14 = vpop.permute.xlu1 %2098  ;;  %3968 = vpow2.f32 %v3452_v15  ;;  %v1228_v54 = vmul.f32 %v4350_v59, %v5081_v61 }
 0x1cf   : > { %v2179_v6 = vmul.f32 %v3951_v4, %v2099_v14  ;;  %3970 = vrcp.f32 %v1383_v46  ;;  %v3457_v14 = vmul.f32 -1.442695, %v1259_v20 }
 0x1d0   : > { %3972 = vpow2.f32 %v3448_v12  ;;  %v1260_v15 = vadd.f32 %v1228_v54, %v5034_v39 }
 0x1d1   : > { %2258 = vrot.lane.b32.xlu1 %v2179_v6, %s4362_s15  ;;  %v2101_v43 = vpop.permute.xlu0 %2100  ;;  %3974 = vpow2.f32 %v3457_v14 }
 0x1d2   : > { %v2180_v33 = vmul.f32 %v3953_v22, %v2101_v43  ;;  %v2103_v42 = vpop.permute.xlu1 %2102  ;;  %v4351_v22 = vld [vmem:[%s4508_s12 + $0xb0] sm:$0xff]  ;;  %v3458_v7 = vmul.f32 -1.442695, %v1260_v15 }
 0x1d3   : > { %v2181_v52 = vmul.f32 %v3957_v10, %v2103_v42  ;;  %v3959_v47 = vpop.eup %3958  ;;  %v1219_v43 = vmul.f32 %v4351_v22, %v5081_v61  ;;  %v3455_v42 = vmul.f32 -1.442695, %v1257_v56 }
 0x1d4   : > { %2260 = vrot.lane.b32.xlu0 %v2180_v33, %s4362_s15  ;;  %v3961_v4 = vpop.eup %3960  ;;  %v1381_v34 = vadd.f32 1.0, %v3959_v47 }
 0x1d5   : > { %2262 = vrot.lane.b32.xlu1 %v2181_v52, %s4362_s15  ;;  %v2105_v17 = vpop.permute.xlu0 %2104  ;;  %v3963_v6 = vpop.eup %3962  ;;  %v1251_v46 = vadd.f32 %v1219_v43, %v5041_v45  ;;  %v4352_v52 = vld [vmem:[%s4508_s12 + $0xe8] sm:$0xff] }
 0x1d6   : > { %v2182_v5 = vmul.f32 %v3961_v4, %v2105_v17  ;;  %v3965_v25 = vpop.eup %3964  ;;  %v2107_v26 = vpop.permute.xlu1 %2106  ;;  %v1384_v33 = vadd.f32 1.0, %v3963_v6  ;;  %3976 = vrcp.f32 %v1381_v34  ;;  %v1226_v47 = vmul.f32 %v4352_v52, %v5081_v61  ;;  %v4353_v6 = vld [vmem:[%s4508_s12 + $0xb8] sm:$0xff] }
 0x1d7   : > { %v3967_v51 = vpop.eup %3966  ;;  %v1377_v10 = vadd.f32 1.0, %v3965_v25  ;;  %v3449_v4 = vmul.f32 -1.442695, %v1251_v46  ;;  %v1220_v59 = vmul.f32 %v4353_v6, %v5081_v61  ;;  %v1623_v6 = vadd.f32 %v4799_v50, %v4871_v32 }
 0x1d8   : > { %2264 = vrot.lane.b32.xlu0 %v2182_v5, %s4362_s15  ;;  %v2183_v36 = vmul.f32 %v3967_v51, %v2107_v26  ;;  %v3969_v20 = vpop.eup %3968  ;;  %3978 = vrcp.f32 %v1384_v33  ;;  %v1258_v54 = vadd.f32 %v1226_v47, %v5051_v48 }
 0x1d9   : > { %v3971_v11 = vpop.eup %3970  ;;  %v2121_v12 = vpop.permute.xlu0 %2120  ;;  %3980 = vrcp.f32 %v1377_v10  ;;  %v1382_v14 = vadd.f32 1.0, %v3969_v20  ;;  %v1252_v56 = vadd.f32 %v1220_v59, %v5049_v62 }
 0x1da   : > { %2266 = vrot.lane.b32.xlu1 %v2183_v36, %s4362_s15  ;;  %3982 = vpow2.f32 %v3455_v42  ;;  %v2190_v17 = vmul.f32 %v3971_v11, %v2121_v12  ;;  %v3973_v5 = vpop.eup %3972  ;;  %v3456_v51 = vmul.f32 -1.442695, %v1258_v54  ;;  %v2123_v15 = vpop.permute.xlu1 %2122 }
 0x1db   : > { %3984 = vpow2.f32 %v3458_v7  ;;  %v3975_v34 = vpop.eup %3974  ;;  %v1378_v43 = vadd.f32 1.0, %v3973_v5  ;;  %v3450_v42 = vmul.f32 -1.442695, %v1252_v56 }
 0x1dc   : > { %2280 = vrot.lane.b32.xlu0 %v2190_v17, %s4362_s15  ;;  %3986 = vpow2.f32 %v3449_v4  ;;  %v1387_v33 = vadd.f32 1.0, %v3975_v34  ;;  %v1622_v17 = vadd.f32 %v4795_v41, %v4864_v9  ;;  %v3463_v41 = vmul.f32 -1.442695, %v1623_v6 }
 0x1dd   : > { %v2117_v22 = vpop.permute.xlu0 %2116  ;;  %3988 = vrcp.f32 %v1382_v14 }
 0x1de   : > { %3990 = vrcp.f32 %v1378_v43  ;;  %v1620_v43 = vadd.f32 %v4793_v40, %v4867_v18 }
 0x1df   : > { %3992 = vpow2.f32 %v3456_v51 }
 0x1e0   : > { %v3977_v25 = vpop.eup %3976  ;;  %3994 = vrcp.f32 %v1387_v33 }
 0x1e1   : > { %v2188_v26 = vmul.f32 %v3977_v25, %v2117_v22  ;;  %v2109_v10 = vpop.permute.xlu0 %2108  ;;  %3996 = vpow2.f32 %v3450_v42  ;;  %v3462_v22 = vmul.f32 -1.442695, %v1622_v17 }
 0x1e2   : > { %v3979_v36 = vpop.eup %3978 }
 0x1e3   : > { %2276 = vrot.lane.b32.xlu0 %v2188_v26, %s4362_s15  ;;  %v3981_v61 = vpop.eup %3980  ;;  %v2191_v20 = vmul.f32 %v3979_v36, %v2123_v15  ;;  %v1621_v26 = vadd.f32 %v4797_v44, %v4873_v38  ;;  %v3460_v15 = vmul.f32 -1.442695, %v1620_v43 }
 0x1e4   : > { %v3983_v46 = vpop.eup %3982  ;;  %v2184_v52 = vmul.f32 %v3981_v61, %v2109_v10  ;;  %v1626_v10 = vadd.f32 %v4805_v3, %v4883_v8  ;;  %v5979_v3 = vld [vmem:[#allocation3_spill] sm:$0xff] }
 0x1e5   : > { %2282 = vrot.lane.b32.xlu1 %v2191_v20, %s4362_s15  ;;  %v3985_v47 = vpop.eup %3984  ;;  %v1385_v11 = vadd.f32 1.0, %v3983_v46  ;;  %v3461_v40 = vmul.f32 -1.442695, %v1621_v26  ;;  %v5977_v46 = vld [vmem:[#allocation4_spill] sm:$0xff]  ;;  %v1625_v17 = vadd.f32 %v5979_v3, %v4891_v13 }
 0x1e6   : > { %v3987_v7 = vpop.eup %3986  ;;  %v1388_v14 = vadd.f32 1.0, %v3985_v47  ;;  %v1627_v42 = vadd.f32 %v5977_v46, %v4889_v60  ;;  %v3466_v47 = vmul.f32 -1.442695, %v1626_v10 }
 0x1e7   : > { %2268 = vrot.lane.b32.xlu0 %v2184_v52, %s4362_s15  ;;  %v3989_v12 = vpop.eup %3988  ;;  %3998 = vrcp.f32 %v1385_v11  ;;  %v1379_v59 = vadd.f32 1.0, %v3987_v7  ;;  %v5978_v11 = vld [vmem:[#allocation2_spill] sm:$0xff] }
 0x1e8   : > { %v3991_v54 = vpop.eup %3990  ;;  %4000 = vrcp.f32 %v1388_v14  ;;  %v1624_v7 = vadd.f32 %v5978_v11, %v4886_v37 }
 0x1e9   : > { %v2119_v4 = vpop.permute.xlu1 %2118  ;;  %v3993_v25 = vpop.eup %3992  ;;  %4002 = vrcp.f32 %v1379_v59 }
 0x1ea   : > { %v2189_v5 = vmul.f32 %v3989_v12, %v2119_v4  ;;  %v3995_v51 = vpop.eup %3994  ;;  %v1386_v36 = vadd.f32 1.0, %v3993_v25  ;;  %4004 = vpow2.f32 %v3462_v22  ;;  %v3467_v4 = vmul.f32 -1.442695, %v1627_v42 }
 0x1eb   : > { %v2129_v33 = vpop.permute.xlu0 %2128  ;;  %v3997_v61 = vpop.eup %3996  ;;  %4006 = vpow2.f32 %v3463_v41  ;;  %v3465_v22 = vmul.f32 -1.442695, %v1625_v17 }
 0x1ec   : > { %2278 = vrot.lane.b32.xlu1 %v2189_v5, %s4362_s15  ;;  %v2194_v50 = vmul.f32 %v3995_v51, %v2129_v33  ;;  %4008 = vrcp.f32 %v1386_v36  ;;  %v1380_v52 = vadd.f32 1.0, %v3997_v61 }
 0x1ed   : > { %v2111_v34 = vpop.permute.xlu1 %2110  ;;  %4010 = vpow2.f32 %v3460_v15  ;;  %v5980_v15 = vld [vmem:[#allocation7_spill] sm:$0xff] }
 0x1ee   : > { %v2185_v56 = vmul.f32 %v3991_v54, %v2111_v34  ;;  %2288 = vrot.lane.b32.xlu0 %v2194_v50, %s4362_s15  ;;  %4012 = vpow2.f32 %v3461_v40  ;;  %v3464_v54 = vmul.f32 -1.442695, %v1624_v7  ;;  %v1630_v10 = vadd.f32 %v5980_v15, %v4903_v29  ;;  %v5981_v40 = vld [vmem:[#allocation8_spill] sm:$0xff] }
 0x1ef   : > { %v2125_v20 = vpop.permute.xlu0 %2124  ;;  %4014 = vrcp.f32 %v1380_v52  ;;  %v1631_v46 = vadd.f32 %v5981_v40, %v4916_v21  ;;  %v5987_v40 = vld [vmem:[#allocation33_spill] sm:$0xff] }
 0x1f0   : > { %2270 = vrot.lane.b32.xlu1 %v2185_v56, %s4362_s15  ;;  %4016 = vpow2.f32 %v3466_v47 }
 0x1f1   : > { %v3999_v44 = vpop.eup %3998  ;;  %4018 = vpow2.f32 %v3467_v4  ;;  %v5982_v4 = vld [vmem:[#allocation5_spill] sm:$0xff]  ;;  %v3471_v17 = vmul.f32 -1.442695, %v1631_v46 }
 0x1f2   : > { %v2192_v12 = vmul.f32 %v3999_v44, %v2125_v20  ;;  %v4001_v14 = vpop.eup %4000  ;;  %4020 = vpow2.f32 %v3464_v54  ;;  %v1628_v3 = vadd.f32 %v5982_v4, %v4905_v30  ;;  %v5990_v4 = vld [vmem:[#allocation30_spill] sm:$0xff] }
 0x1f3   : > { %v4003_v5 = vpop.eup %4002  ;;  %v2113_v59 = vpop.permute.xlu0 %2112  ;;  %4022 = vpow2.f32 %v3465_v22 }
 0x1f4   : > { %2284 = vrot.lane.b32.xlu0 %v2192_v12, %s4362_s15  ;;  %v2186_v25 = vmul.f32 %v4003_v5, %v2113_v59  ;;  %v4005_v43 = vpop.eup %4004  ;;  %v3470_v12 = vmul.f32 -1.442695, %v1630_v10 }
 0x1f5   : > { %v2131_v6 = vpop.permute.xlu1 %2130  ;;  %v4007_v56 = vpop.eup %4006  ;;  %v1750_v41 = vadd.f32 1.0, %v4005_v43 }
 0x1f6   : > { %v2195_v34 = vmul.f32 %v4001_v14, %v2131_v6  ;;  %v4009_v51 = vpop.eup %4008  ;;  %v1751_v50 = vadd.f32 1.0, %v4007_v56  ;;  %v5983_v14 = vld [vmem:[#allocation6_spill] sm:$0xff] }
 0x1f7   : > { %v4011_v33 = vpop.eup %4010  ;;  %4024 = vrcp.f32 %v1750_v41  ;;  %v1629_v5 = vadd.f32 %v5983_v14, %v4918_v58 }
 0x1f8   : > { %2290 = vrot.lane.b32.xlu1 %v2195_v34, %s4362_s15  ;;  %2272 = vrot.lane.b32.xlu0 %v2186_v25, %s4362_s15  ;;  %v4013_v61 = vpop.eup %4012  ;;  %v1748_v44 = vadd.f32 1.0, %v4011_v33  ;;  %4026 = vrcp.f32 %v1751_v50  ;;  %v3468_v25 = vmul.f32 -1.442695, %v1628_v3  ;;  %v5985_v50 = vld [vmem:[#allocation10_spill] sm:$0xff] }
 0x1f9   : > { %v4015_v42 = vpop.eup %4014  ;;  %v1749_v47 = vadd.f32 1.0, %v4013_v61  ;;  %v3469_v22 = vmul.f32 -1.442695, %v1629_v5  ;;  %v5986_v61 = vld [vmem:[#allocation32_spill] sm:$0xff]  ;;  %v5991_v5 = vld [vmem:[#allocation31_spill] sm:$0xff] }
 0x1fa   : > { %v4017_v52 = vpop.eup %4016  ;;  %4028 = vrcp.f32 %v1748_v44 }
 0x1fb   : > { %v2127_v26 = vpop.permute.xlu1 %2126  ;;  %v4019_v7 = vpop.eup %4018  ;;  %v1754_v6 = vadd.f32 1.0, %v4017_v52  ;;  %4030 = vrcp.f32 %v1749_v47 }
 0x1fc   : > { %v2193_v36 = vmul.f32 %v4009_v51, %v2127_v26  ;;  %v4021_v59 = vpop.eup %4020  ;;  %v1755_v54 = vadd.f32 1.0, %v4019_v7  ;;  %4032 = vpow2.f32 %v3470_v12  ;;  %v5984_v26 = vld [vmem:[#allocation9_spill] sm:$0xff] }
 0x1fd   : > { %v4023_v34 = vpop.eup %4022  ;;  %4034 = vpow2.f32 %v3471_v17  ;;  %v1752_v43 = vadd.f32 1.0, %v4021_v59  ;;  %v1632_v33 = vadd.f32 %v5984_v26, %v4928_v31  ;;  %v5994_v26 = vld [vmem:[#allocation36_spill] sm:$0xff] }
 0x1fe   : > { %2286 = vrot.lane.b32.xlu1 %v2193_v36, %s4362_s15  ;;  %4036 = vrcp.f32 %v1754_v6  ;;  %v1753_v56 = vadd.f32 1.0, %v4023_v34  ;;  %v1633_v36 = vadd.f32 %v5985_v50, %v4944_v24 }
 0x1ff   : > { %v2115_v20 = vpop.permute.xlu1 %2114  ;;  %4038 = vrcp.f32 %v1755_v54 }
 0x200   : > { %v2187_v11 = vmul.f32 %v4015_v42, %v2115_v20  ;;  %4040 = vpow2.f32 %v3468_v25  ;;  %v3473_v17 = vmul.f32 -1.442695, %v1633_v36 }
 0x201   : > { %v4025_v51 = vpop.eup %4024  ;;  %4042 = vpow2.f32 %v3469_v22 }
 0x202   : > { %2274 = vrot.lane.b32.xlu1 %v2187_v11, %s4362_s15  ;;  %v4027_v41 = vpop.eup %4026  ;;  %4044 = vrcp.f32 %v1752_v43  ;;  %v1974_v15 = vmul.f32 %v4025_v51, %v5986_v61  ;;  %v3472_v11 = vmul.f32 -1.442695, %v1632_v33 }
 0x203   : > { %4046 = vrcp.f32 %v1753_v56  ;;  %v1975_v46 = vmul.f32 %v4027_v41, %v5987_v40 }
 0x204   : > { %v4029_v10 = vpop.eup %4028  ;;  %4048 = vpow2.f32 %v3472_v11  ;;  %v5999_v11 = vld [vmem:[#allocation34_spill] sm:$0xff] }
 0x205   : > { %v4031_v44 = vpop.eup %4030  ;;  %v1972_v3 = vmul.f32 %v4029_v10, %v5990_v4  ;;  %4050 = vpow2.f32 %v3473_v17  ;;  %v6000_v4 = vld [vmem:[#allocation35_spill] sm:$0xff] }
 0x206   : > { %v4033_v47 = vpop.eup %4032  ;;  %v1973_v6 = vmul.f32 %v4031_v44, %v5991_v5  ;;  %v5997_v44 = vld [vmem:[#allocation11_spill] sm:$0xff] }
 0x207   : > { %v4035_v12 = vpop.eup %4034  ;;  %v1758_v43 = vadd.f32 1.0, %v4033_v47 }
 0x208   : > { %v4037_v14 = vpop.eup %4036  ;;  %v1759_v41 = vadd.f32 1.0, %v4035_v12 }
 0x209   : > { %v4039_v54 = vpop.eup %4038  ;;  %v1978_v33 = vmul.f32 %v4037_v14, %v5994_v26  ;;  %v6001_v14 = vld [vmem:[#allocation12_spill] sm:$0xff] }
 0x20a   : > { %v4041_v22 = vpop.eup %4040  ;;  %v1979_v36 = vmul.f32 %v4039_v54, %v5006_v63  ;;  %v1635_v5 = vadd.f32 %v6001_v14, %v4941_v35 }
 0x20b   : > { %v4043_v51 = vpop.eup %4042 }
 0x20c   : > { %v4045_v50 = vpop.eup %4044  ;;  %v1757_v63 = vadd.f32 1.0, %v4043_v51  ;;  %v3475_v26 = vmul.f32 -1.442695, %v1635_v5  ;;  %v6007_v5 = vld [vmem:[#allocation45_spill] sm:$0xff] }
 0x20d   : > { %v1976_v12 = vmul.f32 %v4045_v50, %v5999_v11 }
 0x216   : > { %v2233_v42 = vpop.permute.xlu0 %2232 }
 0x217   : > { %v5279_v20 = vadd.f32 %v2233_v42, %v1974_v15  ;;  %v4047_v15 = vpop.eup %4046  ;;  %v5996_v42 = vld [vmem:[#allocation29_spill] sm:$0xff] }
 0x218   : > { %v2235_v52 = vpop.permute.xlu1 %2234  ;;  %v4049_v51 = vpop.eup %4048 }
 0x219   : > { %5988 = vst [vmem:[#allocation4_spill] sm:$0xff] %v5279_v20  ;;  %v5281_v7 = vadd.f32 %v2235_v52, %v1975_v46  ;;  %2399 = vrot.lane.b32.xlu0 %v5279_v20, %s4363_s19  ;;  %4052 = vtanh.f32 %v5279_v20  ;;  %v1756_v46 = vadd.f32 1.0, %v4041_v22  ;;  %v1634_v52 = vadd.f32 %v5997_v44, %v5996_v42  ;;  %v6004_v22 = vld [vmem:[#allocation13_spill] sm:$0xff] }
 0x21a   : > { %v2229_v59 = vpop.permute.xlu0 %2228 }
 0x21b   : > { %5989 = vst [vmem:[#allocation2_spill] sm:$0xff] %v5281_v7  ;;  %2401 = vrot.lane.b32.xlu1 %v5281_v7, %s4363_s19  ;;  %v5289_v34 = vadd.f32 %v2229_v59, %v1972_v3  ;;  %4054 = vtanh.f32 %v5281_v7  ;;  %v1977_v3 = vmul.f32 %v4047_v15, %v6000_v4  ;;  %v3474_v54 = vmul.f32 -1.442695, %v1634_v52 }
 0x21c   : > { %4056 = vrcp.f32 %v1758_v43  ;;  %v1636_v43 = vadd.f32 %v6004_v22, %v4957_v28  ;;  %v1760_v52 = vadd.f32 1.0, %v4049_v51  ;;  %v6008_v22 = vld [vmem:[#allocation15_spill] sm:$0xff] }
 0x21d   : > { %5992 = vst [vmem:[#allocation3_spill] sm:$0xff] %v5289_v34  ;;  %2395 = vrot.lane.b32.xlu0 %v5289_v34, %s4363_s19  ;;  %4058 = vrcp.f32 %v1759_v41  ;;  %v4051_v41 = vpop.eup %4050 }
 0x21e   : > { %v2231_v25 = vpop.permute.xlu1 %2230  ;;  %4060 = vtanh.f32 %v5289_v34  ;;  %v1761_v4 = vadd.f32 1.0, %v4051_v41 }
 0x21f   : > { %v5291_v56 = vadd.f32 %v2231_v25, %v1973_v6  ;;  %v2241_v61 = vpop.permute.xlu0 %2240 }
 0x220   : > { %v5301_v10 = vadd.f32 %v2241_v61, %v1978_v33 }
 0x221   : > { %5993 = vst [vmem:[#allocation7_spill] sm:$0xff] %v5291_v56  ;;  %2397 = vrot.lane.b32.xlu1 %v5291_v56, %s4363_s19  ;;  %4062 = vtanh.f32 %v5291_v56 }
 0x222   : > { %5995 = vst [vmem:[#allocation8_spill] sm:$0xff] %v5301_v10  ;;  %2407 = vrot.lane.b32.xlu0 %v5301_v10, %s4363_s19  ;;  %4064 = vrcp.f32 %v1756_v46 }
 0x223   : > { %v2237_v17 = vpop.permute.xlu0 %2236  ;;  %4066 = vrcp.f32 %v1757_v63  ;;  %v4053_v33 = vpop.eup %4052  ;;  %v6005_v63 = vld [vmem:[#allocation14_spill] sm:$0xff] }
 0x224   : > { %v5317_v6 = vadd.f32 %v2237_v17, %v1976_v12  ;;  %4068 = vpow2.f32 %v3474_v54  ;;  %v1637_v11 = vadd.f32 %v6005_v63, %v4959_v57 }
 0x225   : > { %v2243_v40 = vpop.permute.xlu1 %2242  ;;  %v4055_v50 = vpop.eup %4054  ;;  %4070 = vpow2.f32 %v3475_v26  ;;  %v6010_v26 = vld [vmem:[#allocation16_spill] sm:$0xff] }
 0x226   : > { %v5305_v47 = vadd.f32 %v2243_v40, %v1979_v36  ;;  %6002 = vst [vmem:[#allocation6_spill] sm:$0xff] %v5317_v6  ;;  %2403 = vrot.lane.b32.xlu0 %v5317_v6, %s4363_s19  ;;  %v3476_v36 = vmul.f32 -1.442695, %v1636_v43  ;;  %v4057_v61 = vpop.eup %4056  ;;  %v1638_v43 = vadd.f32 %v6008_v22, %v4970_v2  ;;  %v3477_v41 = vmul.f32 -1.442695, %v1637_v11  ;;  %v6017_v22 = vld [vmem:[#allocation24_spill] sm:$0xff] }
 0x227   : > { %v2249_v15 = vpop.permute.xlu0 %2248  ;;  %v4059_v40 = vpop.eup %4058 }
 0x228   : > { %5998 = vst [vmem:[#allocation5_spill] sm:$0xff] %v5305_v47  ;;  %2409 = vrot.lane.b32.xlu1 %v5305_v47, %s4363_s19  ;;  %v4061_v44 = vpop.eup %4060  ;;  %4072 = vpow2.f32 %v3476_v36 }
 0x229   : > { %v2239_v59 = vpop.permute.xlu1 %2238  ;;  %4074 = vtanh.f32 %v5301_v10 }
 0x22a   : > { %v5319_v25 = vadd.f32 %v2239_v59, %v1977_v3  ;;  %2943 = vrot.lane.b32.xlu0 %v4053_v33, %s4362_s15  ;;  %v6006_v3 = vld [vmem:[#allocation42_spill] sm:$0xff]  ;;  %v1983_v59 = vmul.f32 %v4059_v40, %v6007_v5  ;;  %4076 = vtanh.f32 %v5305_v47  ;;  %v1639_v33 = vadd.f32 %v6010_v26, %v4985_v53  ;;  %v6048_v47 = vld [vmem:[#allocation57_spill] sm:$0xff] }
 0x22b   : > { %v4063_v12 = vpop.eup %4062  ;;  %v1982_v17 = vmul.f32 %v4057_v61, %v6006_v3  ;;  %4078 = vrcp.f32 %v1760_v52  ;;  %v6012_v61 = vld [vmem:[#allocation38_spill] sm:$0xff] }
 0x22c   : > { %6003 = vst [vmem:[#allocation9_spill] sm:$0xff] %v5319_v25  ;;  %2405 = vrot.lane.b32.xlu1 %v5319_v25, %s4363_s19  ;;  %v4065_v14 = vpop.eup %4064  ;;  %4080 = vrcp.f32 %v1761_v4  ;;  %v3479_v52 = vmul.f32 -1.442695, %v1639_v33 }
 0x22d   : > { %v4067_v54 = vpop.eup %4066  ;;  %v5339_v51 = vadd.f32 %v2249_v15, %v1982_v17  ;;  %v1980_v40 = vmul.f32 %v4065_v14, %v6012_v61  ;;  %4082 = vtanh.f32 %v5317_v6  ;;  %v3478_v15 = vmul.f32 -1.442695, %v1638_v43  ;;  %v6016_v17 = vld [vmem:[#allocation23_spill] sm:$0xff] }
 0x22e   : > { %2939 = vrot.lane.b32.xlu0 %v4061_v44, %s4362_s15  ;;  %v4069_v63 = vpop.eup %4068  ;;  %4084 = vtanh.f32 %v5319_v25  ;;  %v1646_v14 = vadd.f32 %v6016_v17, %v4979_v16  ;;  %v1647_v43 = vadd.f32 %v6017_v22, %v5000_v19 }
 0x22f   : > { %6009 = vst [vmem:[#allocation10_spill] sm:$0xff] %v5339_v51  ;;  %4086 = vpow2.f32 %v3477_v41  ;;  %v4071_v4 = vpop.eup %4070  ;;  %v1762_v5 = vadd.f32 1.0, %v4069_v63 }
 0x230   : > { %2945 = vrot.lane.b32.xlu1 %v4055_v50, %s4362_s15  ;;  %v2245_v36 = vpop.permute.xlu0 %2244  ;;  %4088 = vpow2.f32 %v3478_v15  ;;  %v1763_v41 = vadd.f32 1.0, %v4071_v4  ;;  %v3486_v33 = vmul.f32 -1.442695, %v1646_v14 }
 0x231   : > { %4090 = vpow2.f32 %v3479_v52  ;;  %v6019_v52 = vld [vmem:[#allocation46_spill] sm:$0xff] }
 0x232   : > { %2415 = vrot.lane.b32.xlu0 %v5339_v51, %s4363_s19  ;;  %4092 = vrcp.f32 %v1762_v5  ;;  %v6020_v5 = vld [vmem:[#allocation50_spill] sm:$0xff] }
 0x233   : > { %4094 = vtanh.f32 %v5339_v51 }
 0x234   : > { %2941 = vrot.lane.b32.xlu1 %v4063_v12, %s4362_s15  ;;  %v6013_v12 = vld [vmem:[#allocation41_spill] sm:$0xff] }
 0x235   : > { %v2251_v46 = vpop.permute.xlu1 %2250  ;;  %v1981_v3 = vmul.f32 %v4067_v54, %v6013_v12  ;;  %v3487_v12 = vmul.f32 -1.442695, %v1647_v43 }
 0x236   : > { %v5343_v50 = vadd.f32 %v2251_v46, %v1983_v59  ;;  %v5353_v46 = vadd.f32 %v2245_v36, %v1980_v40  ;;  %v4073_v59 = vpop.eup %4072  ;;  %v6018_v40 = vld [vmem:[#allocation21_spill] sm:$0xff] }
 0x237   : > { %v4075_v54 = vpop.eup %4074 }
 0x238   : > { %6011 = vst [vmem:[#allocation32_spill] sm:$0xff] %v5343_v50  ;;  %2417 = vrot.lane.b32.xlu1 %v5343_v50, %s4363_s19  ;;  %6014 = vst [vmem:[#allocation33_spill] sm:$0xff] %v5353_v46  ;;  %2411 = vrot.lane.b32.xlu0 %v5353_v46, %s4363_s19  ;;  %v4077_v26 = vpop.eup %4076  ;;  %4096 = vtanh.f32 %v5343_v50 }
 0x239   : > { %v2247_v44 = vpop.permute.xlu1 %2246  ;;  %v4079_v36 = vpop.eup %4078  ;;  %4098 = vrcp.f32 %v1763_v41  ;;  %v1764_v41 = vadd.f32 1.0, %v4073_v59 }
 0x23a   : > { %v5355_v11 = vadd.f32 %v2247_v44, %v1981_v3  ;;  %v4081_v61 = vpop.eup %4080  ;;  %v1644_v44 = vadd.f32 %v6018_v40, %v4982_v27  ;;  %v2253_v3 = vpop.permute.xlu0 %2252  ;;  %4100 = vpow2.f32 %v3486_v33  ;;  %v1984_v4 = vmul.f32 %v4079_v36, %v6019_v52 }
 0x23b   : > { %v4083_v63 = vpop.eup %4082  ;;  %4102 = vtanh.f32 %v5353_v46 }
 0x23c   : > { %6015 = vst [vmem:[#allocation30_spill] sm:$0xff] %v5355_v11  ;;  %2413 = vrot.lane.b32.xlu1 %v5355_v11, %s4363_s19  ;;  %2951 = vrot.lane.b32.xlu0 %v4075_v54, %s4362_s15  ;;  %v4085_v15 = vpop.eup %4084  ;;  %v1985_v54 = vmul.f32 %v4081_v61, %v6020_v5  ;;  %v3484_v22 = vmul.f32 -1.442695, %v1644_v44  ;;  %4104 = vtanh.f32 %v5355_v11  ;;  %v5377_v43 = vadd.f32 %v2253_v3, %v1984_v4  ;;  %v6024_v61 = vld [vmem:[#allocation17_spill] sm:$0xff] }
 0x23d   : > { %v4087_v14 = vpop.eup %4086  ;;  %4106 = vpow2.f32 %v3487_v12  ;;  %v1640_v52 = vadd.f32 %v6024_v61, %v4994_v1  ;;  %v6026_v12 = vld [vmem:[#allocation27_spill] sm:$0xff] }
 0x23e   : > { %6021 = vst [vmem:[#allocation31_spill] sm:$0xff] %v5377_v43  ;;  %v4089_v40 = vpop.eup %4088  ;;  %4108 = vpow2.f32 %v3484_v22  ;;  %v1650_v4 = vadd.f32 %v6026_v12, %v5017_v0  ;;  %v2257_v22 = vpop.permute.xlu0 %2256 }
 0x23f   : > { %v2255_v17 = vpop.permute.xlu1 %2254  ;;  %v4091_v44 = vpop.eup %4090  ;;  %4110 = vrcp.f32 %v1764_v41  ;;  %v1766_v46 = vadd.f32 1.0, %v4089_v40  ;;  %v6031_v40 = vld [vmem:[#allocation28_spill] sm:$0xff] }
 0x240   : > { %2953 = vrot.lane.b32.xlu1 %v4077_v26, %s4362_s15  ;;  %2947 = vrot.lane.b32.xlu0 %v4083_v63, %s4362_s15  ;;  %v6022_v26 = vld [vmem:[#allocation22_spill] sm:$0xff]  ;;  %v5381_v36 = vadd.f32 %v2255_v17, %v1985_v54  ;;  %v1765_v63 = vadd.f32 1.0, %v4087_v14  ;;  %v4093_v59 = vpop.eup %4092  ;;  %v3480_v54 = vmul.f32 -1.442695, %v1640_v52  ;;  %v3490_v11 = vmul.f32 -1.442695, %v1650_v4 }
 0x241   : > { %v1645_v33 = vadd.f32 %v6022_v26, %v5002_v55  ;;  %v4095_v17 = vpop.eup %4094 }
 0x242   : > { %6023 = vst [vmem:[#allocation36_spill] sm:$0xff] %v5381_v36  ;;  %v4097_v5 = vpop.eup %4096  ;;  %4112 = vrcp.f32 %v1765_v63 }
 0x243   : > { %v3485_v14 = vmul.f32 -1.442695, %v1645_v33  ;;  %v4099_v26 = vpop.eup %4098  ;;  %4114 = vtanh.f32 %v5377_v43  ;;  %v6027_v33 = vld [vmem:[#allocation51_spill] sm:$0xff]  ;;  %v2259_v52 = vpop.permute.xlu1 %2258 }
 0x244   : > { %2949 = vrot.lane.b32.xlu1 %v4085_v15, %s4362_s15  ;;  %2419 = vrot.lane.b32.xlu0 %v5377_v43, %s4363_s19  ;;  %v6025_v15 = vld [vmem:[#allocation18_spill] sm:$0xff]  ;;  %4116 = vtanh.f32 %v5381_v36  ;;  %v1986_v41 = vmul.f32 %v4093_v59, %v6027_v33  ;;  %v1651_v59 = vadd.f32 %v6031_v40, %v5034_v39 }
 0x245   : > { %v1641_v3 = vadd.f32 %v6025_v15, %v5012_v23  ;;  %v4101_v15 = vpop.eup %4100  ;;  %4118 = vpow2.f32 %v3485_v14 }
 0x246   : > { %v4103_v12 = vpop.eup %4102  ;;  %4120 = vpow2.f32 %v3480_v54  ;;  %v1774_v14 = vadd.f32 1.0, %v4101_v15 }
 0x247   : > { %v3481_v61 = vmul.f32 -1.442695, %v1641_v3  ;;  %v4105_v63 = vpop.eup %4104  ;;  %v1767_v3 = vadd.f32 1.0, %v4091_v44  ;;  %v6032_v44 = vld [vmem:[#allocation19_spill] sm:$0xff]  ;;  %v2263_v40 = vpop.permute.xlu1 %2262 }
 0x248   : > { %2421 = vrot.lane.b32.xlu1 %v5381_v36, %s4363_s19  ;;  %2959 = vrot.lane.b32.xlu0 %v4095_v17, %s4362_s15  ;;  %v6028_v17 = vld [vmem:[#allocation52_spill] sm:$0xff]  ;;  %v4107_v43 = vpop.eup %4106 }
 0x249   : > { %v1987_v50 = vmul.f32 %v4099_v26, %v6028_v17  ;;  %4122 = vpow2.f32 %v3481_v61  ;;  %v4109_v54 = vpop.eup %4108  ;;  %v1775_v33 = vadd.f32 1.0, %v4107_v43  ;;  %v1642_v26 = vadd.f32 %v6032_v44, %v5041_v45  ;;  %v6035_v17 = vld [vmem:[#allocation53_spill] sm:$0xff] }
 0x24a   : > { %4124 = vpow2.f32 %v3490_v11  ;;  %v4111_v61 = vpop.eup %4110 }
 0x24b   : > { %v5403_v4 = vadd.f32 %v2259_v52, %v1987_v50  ;;  %4126 = vrcp.f32 %v1766_v46  ;;  %v6034_v46 = vld [vmem:[#allocation26_spill] sm:$0xff] }
 0x24c   : > { %2961 = vrot.lane.b32.xlu1 %v4097_v5, %s4362_s15  ;;  %2955 = vrot.lane.b32.xlu0 %v4103_v12, %s4362_s15  ;;  %v5400_v5 = vadd.f32 %v2257_v22, %v1986_v41  ;;  %4128 = vrcp.f32 %v1767_v3  ;;  %v6033_v22 = vld [vmem:[#allocation25_spill] sm:$0xff]  ;;  %v4113_v50 = vpop.eup %4112  ;;  %v1649_v43 = vadd.f32 %v6034_v46, %v5051_v48  ;;  %v3491_v12 = vmul.f32 -1.442695, %v1651_v59  ;;  %v2261_v41 = vpop.permute.xlu0 %2260 }
 0x24d   : > { %6030 = vst [vmem:[#allocation11_spill] sm:$0xff] %v5403_v4  ;;  %v1648_v11 = vadd.f32 %v6033_v22, %v5027_v49  ;;  %v4115_v15 = vpop.eup %4114  ;;  %v1988_v3 = vmul.f32 %v4111_v61, %v6035_v17  ;;  %v1772_v59 = vadd.f32 1.0, %v4109_v54  ;;  %v2267_v54 = vpop.permute.xlu1 %2266 }
 0x24e   : > { %6029 = vst [vmem:[#allocation29_spill] sm:$0xff] %v5400_v5  ;;  %4130 = vtanh.f32 %v5400_v5  ;;  %v4117_v52 = vpop.eup %4116 }
 0x24f   : > { %4132 = vtanh.f32 %v5403_v4  ;;  %v4119_v44 = vpop.eup %4118  ;;  %v3488_v22 = vmul.f32 -1.442695, %v1648_v11  ;;  %v5423_v51 = vadd.f32 %v2261_v41, %v1988_v3  ;;  %v6040_v41 = vld [vmem:[#allocation55_spill] sm:$0xff] }
 0x250   : > { %2957 = vrot.lane.b32.xlu1 %v4105_v63, %s4362_s15  ;;  %2423 = vrot.lane.b32.xlu0 %v5400_v5, %s4363_s19  ;;  %4134 = vrcp.f32 %v1774_v14  ;;  %v3482_v63 = vmul.f32 -1.442695, %v1642_v26  ;;  %v6036_v5 = vld [vmem:[#allocation54_spill] sm:$0xff]  ;;  %v4121_v46 = vpop.eup %4120  ;;  %v2265_v61 = vpop.permute.xlu0 %2264  ;;  %v1773_v17 = vadd.f32 1.0, %v4119_v44 }
 0x251   : > { %4136 = vrcp.f32 %v1775_v33  ;;  %v1989_v36 = vmul.f32 %v4113_v50, %v6036_v5  ;;  %6037 = vst [vmem:[#allocation34_spill] sm:$0xff] %v5423_v51  ;;  %v6039_v50 = vld [vmem:[#allocation20_spill] sm:$0xff] }
 0x252   : > { %4138 = vpow2.f32 %v3491_v12 }
 0x253   : > { %v4123_v14 = vpop.eup %4122  ;;  %v5425_v26 = vadd.f32 %v2263_v40, %v1989_v36  ;;  %4140 = vpow2.f32 %v3482_v63  ;;  %v6041_v40 = vld [vmem:[#allocation56_spill] sm:$0xff] }
 0x254   : > { %2425 = vrot.lane.b32.xlu1 %v5403_v4, %s4363_s19  ;;  %2963 = vrot.lane.b32.xlu0 %v4115_v15, %s4362_s15  ;;  %v3489_v4 = vmul.f32 -1.442695, %v1649_v43  ;;  %v4125_v33 = vpop.eup %4124  ;;  %4142 = vpow2.f32 %v3488_v22  ;;  %v1643_v43 = vadd.f32 %v6039_v50, %v5049_v62  ;;  %v1768_v15 = vadd.f32 1.0, %v4121_v46  ;;  %v2281_v22 = vpop.permute.xlu0 %2280 }
 0x255   : > { %6038 = vst [vmem:[#allocation35_spill] sm:$0xff] %v5425_v26  ;;  %v4127_v11 = vpop.eup %4126  ;;  %v1769_v63 = vadd.f32 1.0, %v4123_v14 }
 0x256   : > { %v4129_v5 = vpop.eup %4128  ;;  %4144 = vpow2.f32 %v3489_v4  ;;  %v3483_v50 = vmul.f32 -1.442695, %v1643_v43 }
 0x257   : > { %4146 = vrcp.f32 %v1772_v59  ;;  %v1991_v44 = vmul.f32 %v4129_v5, %v6041_v40  ;;  %v1778_v59 = vadd.f32 1.0, %v4125_v33 }
 0x258   : > { %2965 = vrot.lane.b32.xlu1 %v4117_v52, %s4362_s15  ;;  %2427 = vrot.lane.b32.xlu0 %v5423_v51, %s4363_s19  ;;  %v4131_v36 = vpop.eup %4130  ;;  %v1990_v52 = vmul.f32 %v4127_v11, %v6040_v41  ;;  %4148 = vrcp.f32 %v1773_v17  ;;  %v6044_v17 = vld [vmem:[#allocation63_spill] sm:$0xff]  ;;  %v6045_v41 = vld [vmem:[#allocation64_spill] sm:$0xff] }
 0x259   : > { %v4133_v12 = vpop.eup %4132  ;;  %4150 = vtanh.f32 %v5423_v51  ;;  %v5441_v14 = vadd.f32 %v2267_v54, %v1991_v44 }
 0x25a   : > { %v4135_v3 = vpop.eup %4134  ;;  %4152 = vtanh.f32 %v5425_v26  ;;  %v5439_v46 = vadd.f32 %v2265_v61, %v1990_v52 }
 0x25b   : > { %v4137_v4 = vpop.eup %4136  ;;  %4154 = vrcp.f32 %v1768_v15  ;;  %6043 = vst [vmem:[#allocation13_spill] sm:$0xff] %v5441_v14  ;;  %v1998_v11 = vmul.f32 %v4135_v3, %v6044_v17  ;;  %v2277_v15 = vpop.permute.xlu0 %2276  ;;  %v6046_v17 = vld [vmem:[#allocation61_spill] sm:$0xff] }
 0x25c   : > { %2429 = vrot.lane.b32.xlu1 %v5425_v26, %s4363_s19  ;;  %2967 = vrot.lane.b32.xlu0 %v4131_v36, %s4362_s15  ;;  %6042 = vst [vmem:[#allocation12_spill] sm:$0xff] %v5439_v46  ;;  %4156 = vrcp.f32 %v1769_v63  ;;  %v2283_v36 = vpop.permute.xlu1 %2282  ;;  %v4139_v5 = vpop.eup %4138 }
 0x25d   : > { %v4141_v43 = vpop.eup %4140  ;;  %4158 = vpow2.f32 %v3483_v50  ;;  %v5449_v61 = vadd.f32 %v2281_v22, %v1998_v11  ;;  %v1779_v63 = vadd.f32 1.0, %v4139_v5 }
 0x25e   : > { %v4143_v33 = vpop.eup %4142  ;;  %4160 = vrcp.f32 %v1778_v59  ;;  %v1770_v51 = vadd.f32 1.0, %v4141_v43 }
 0x25f   : > { %v1776_v50 = vadd.f32 1.0, %v4143_v33  ;;  %4162 = vrcp.f32 %v1779_v63 }
 0x260   : > { %2969 = vrot.lane.b32.xlu1 %v4133_v12, %s4362_s15  ;;  %2431 = vrot.lane.b32.xlu0 %v5439_v46, %s4363_s19  ;;  %v1999_v12 = vmul.f32 %v4137_v4, %v6045_v41  ;;  %v4145_v52 = vpop.eup %4144  ;;  %v2279_v44 = vpop.permute.xlu1 %2278 }
 0x261   : > { %v4147_v3 = vpop.eup %4146  ;;  %v2269_v41 = vpop.permute.xlu0 %2268  ;;  %4164 = vrcp.f32 %v1776_v50  ;;  %v1777_v6 = vadd.f32 1.0, %v4145_v52 }
 0x262   : > { %v5451_v54 = vadd.f32 %v2283_v36, %v1999_v12  ;;  %v4149_v40 = vpop.eup %4148  ;;  %v1996_v11 = vmul.f32 %v4147_v3, %v6046_v17  ;;  %v6047_v36 = vld [vmem:[#allocation62_spill] sm:$0xff]  ;;  %4166 = vtanh.f32 %v5439_v46 }
 0x263   : > { %v4151_v4 = vpop.eup %4150  ;;  %v1997_v5 = vmul.f32 %v4149_v40, %v6047_v36  ;;  %v6049_v40 = vld [vmem:[#allocation58_spill] sm:$0xff]  ;;  %4168 = vrcp.f32 %v1770_v51 }
 0x264   : > { %2433 = vrot.lane.b32.xlu1 %v5441_v14, %s4363_s19  ;;  %2447 = vrot.lane.b32.xlu0 %v5449_v61, %s4363_s19  ;;  %v4153_v22 = vpop.eup %4152  ;;  %v5461_v26 = vadd.f32 %v2277_v15, %v1996_v11  ;;  %v2271_v63 = vpop.permute.xlu1 %2270  ;;  %4170 = vrcp.f32 %v1777_v6 }
 0x265   : > { %v4155_v59 = vpop.eup %4154  ;;  %v5463_v25 = vadd.f32 %v2279_v44, %v1997_v5  ;;  %v2289_v52 = vpop.permute.xlu0 %2288  ;;  %4172 = vtanh.f32 %v5441_v14 }
 0x266   : > { %v4157_v12 = vpop.eup %4156  ;;  %v1992_v3 = vmul.f32 %v4155_v59, %v6048_v47  ;;  %v6050_v47 = vld [vmem:[#allocation67_spill] sm:$0xff]  ;;  %v6052_v59 = vld [vmem:[#allocation68_spill] sm:$0xff] }
 0x267   : > { %v4159_v33 = vpop.eup %4158  ;;  %v1993_v17 = vmul.f32 %v4157_v12, %v6049_v40 }
 0x268   : > { %2449 = vrot.lane.b32.xlu1 %v5451_v54, %s4363_s19  ;;  %2971 = vrot.lane.b32.xlu0 %v4151_v4, %s4362_s15  ;;  %v4161_v4 = vpop.eup %4160  ;;  %v5472_v43 = vadd.f32 %v2269_v41, %v1992_v3  ;;  %v1771_v44 = vadd.f32 1.0, %v4159_v33  ;;  %v6053_v33 = vld [vmem:[#allocation65_spill] sm:$0xff] }
 0x269   : > { %v5474_v15 = vadd.f32 %v2271_v63, %v1993_v17  ;;  %v2002_v50 = vmul.f32 %v4161_v4, %v6050_v47  ;;  %v2285_v36 = vpop.permute.xlu0 %2284 }
 0x26a   : > { %4174 = vrcp.f32 %v1771_v44  ;;  %v2291_v5 = vpop.permute.xlu1 %2290  ;;  %v6054_v44 = vld [vmem:[#allocation59_spill] sm:$0xff] }
 0x26b   : > { %v5482_v11 = vadd.f32 %v2289_v52, %v2002_v50  ;;  %4176 = vtanh.f32 %v5472_v43 }
 0x26c   : > { %2973 = vrot.lane.b32.xlu1 %v4153_v22, %s4362_s15  ;;  %2443 = vrot.lane.b32.xlu0 %v5461_v26, %s4363_s19  ;;  %v4163_v22 = vpop.eup %4162 }
 0x26d   : > { %6051 = vst [vmem:[#allocation14_spill] sm:$0xff] %v5482_v11  ;;  %v4165_v51 = vpop.eup %4164  ;;  %v2003_v6 = vmul.f32 %v4163_v22, %v6052_v59  ;;  %v2273_v17 = vpop.permute.xlu0 %2272  ;;  %v6055_v22 = vld [vmem:[#allocation66_spill] sm:$0xff] }
 0x26e   : > { %v4167_v41 = vpop.eup %4166  ;;  %v2000_v3 = vmul.f32 %v4165_v51, %v6053_v33 }
 0x26f   : > { %v5487_v12 = vadd.f32 %v2291_v5, %v2003_v6  ;;  %v4169_v63 = vpop.eup %4168 }
 0x270   : > { %2445 = vrot.lane.b32.xlu1 %v5463_v25, %s4363_s19  ;;  %2435 = vrot.lane.b32.xlu0 %v5472_v43, %s4363_s19  ;;  %v4171_v4 = vpop.eup %4170  ;;  %v5493_v40 = vadd.f32 %v2285_v36, %v2000_v3  ;;  %v1994_v47 = vmul.f32 %v4169_v63, %v6054_v44  ;;  %v2287_v50 = vpop.permute.xlu1 %2286  ;;  %v6058_v36 = vld [vmem:[#allocation60_spill] sm:$0xff]  ;;  %v5516_v63 = vld [vmem:[%s5873_s5] ss:$0 sm:$0xff] }
 0x271   : > { %v4173_v52 = vpop.eup %4172  ;;  %v2001_v59 = vmul.f32 %v4171_v4, %v6055_v22 }
 0x272   : > { %v5500_v6 = vadd.f32 %v2273_v17, %v1994_v47 }
 0x273   : > { %v5502_v5 = vadd.f32 %v2287_v50, %v2001_v59 }
 0x274   : > { %2437 = vrot.lane.b32.xlu1 %v5474_v15, %s4363_s19  ;;  %2455 = vrot.lane.b32.xlu0 %v5482_v11, %s4363_s19  ;;  %v4175_v51 = vpop.eup %4174  ;;  %6056 = vst [vmem:[#allocation42_spill] sm:$0xff] %v5500_v6  ;;  %4178 = vtanh.f32 %v5500_v6 }
 0x275   : > { %6057 = vst [vmem:[#allocation45_spill] sm:$0xff] %v5502_v5  ;;  %v1995_v33 = vmul.f32 %v4175_v51, %v6058_v36  ;;  %4180 = vtanh.f32 %v5474_v15 }
 0x276   : > { %4182 = vtanh.f32 %v5461_v26 }
 0x278   : > { %2975 = vrot.lane.b32.xlu0 %v4167_v41, %s4362_s15  ;;  %2457 = vrot.lane.b32.xlu1 %v5487_v12, %s4363_s19  ;;  %v2275_v41 = vpop.permute.xlu1 %2274 }
 0x279   : > { %v5509_v3 = vadd.f32 %v2275_v41, %v1995_v33 }
 0x27b   : > { %6059 = vst [vmem:[#allocation15_spill] sm:$0xff] %v5509_v3  ;;  %4184 = vtanh.f32 %v5509_v3 }
 0x27c   : > { %2451 = vrot.lane.b32.xlu0 %v5493_v40, %s4363_s19  ;;  %2977 = vrot.lane.b32.xlu1 %v4173_v52, %s4362_s15  ;;  %4186 = vtanh.f32 %v5449_v61 }
 0x27d   : > { %4188 = vtanh.f32 %v5463_v25 }
 0x27e   : > { %4190 = vtanh.f32 %v5493_v40 }
 0x27f   : > { %4192 = vtanh.f32 %v5451_v54 }
 0x280   : > { %2439 = vrot.lane.b32.xlu0 %v5500_v6, %s4363_s19  ;;  %2453 = vrot.lane.b32.xlu1 %v5502_v5, %s4363_s19  ;;  %4194 = vtanh.f32 %v5482_v11 }
 0x281   : > { %4196 = vtanh.f32 %v5502_v5 }
 0x282   : > { %4198 = vtanh.f32 %v5487_v12 }
 0x284   : > { %2441 = vrot.lane.b32.xlu1 %v5509_v3, %s4363_s19 }
 0x28b   : > { %v2400_v4 = vpop.permute.xlu0 %2399 }
 0x28c   : > { %v2493_v17 = vmul.f32 %v5516_v63, %v2400_v4 }
 0x28d   : > { %v2402_v52 = vpop.permute.xlu1 %2401 }
 0x28e   : > { %v2494_v44 = vmul.f32 %v5516_v63, %v2402_v52  ;;  %2559 = vrot.lane.b32.xlu0 %v2493_v17, %s4364_s22 }
 0x28f   : > { %v2396_v47 = vpop.permute.xlu0 %2395 }
 0x290   : > { %2561 = vrot.lane.b32.xlu1 %v2494_v44, %s4364_s22  ;;  %v2491_v50 = vmul.f32 %v5516_v63, %v2396_v47 }
 0x292   : > { %2555 = vrot.lane.b32.xlu0 %v2491_v50, %s4364_s22 }
 0x293   : > { %v2398_v22 = vpop.permute.xlu1 %2397 }
 0x294   : > { %v2492_v59 = vmul.f32 %v5516_v63, %v2398_v22  ;;  %v2408_v51 = vpop.permute.xlu0 %2407 }
 0x295   : > { %v2497_v41 = vmul.f32 %v5516_v63, %v2408_v51 }
 0x296   : > { %2557 = vrot.lane.b32.xlu1 %v2492_v59, %s4364_s22 }
 0x297   : > { %2567 = vrot.lane.b32.xlu0 %v2497_v41, %s4364_s22 }
 0x298   : > { %v2404_v4 = vpop.permute.xlu0 %2403 }
 0x299   : > { %v2495_v17 = vmul.f32 %v5516_v63, %v2404_v4 }
 0x29a   : > { %v2410_v36 = vpop.permute.xlu1 %2409 }
 0x29b   : > { %v2498_v33 = vmul.f32 %v5516_v63, %v2410_v36  ;;  %2563 = vrot.lane.b32.xlu0 %v2495_v17, %s4364_s22 }
 0x29c   : > { %v5533_v47 = vpop.permute.xlu0 %2943 }
 0x29d   : > { %2569 = vrot.lane.b32.xlu1 %v2498_v33, %s4364_s22 }
 0x29e   : > { %v2406_v52 = vpop.permute.xlu1 %2405 }
 0x29f   : > { %v2496_v44 = vmul.f32 %v5516_v63, %v2406_v52 }
 0x2a0   : > { %v5538_v22 = vpop.permute.xlu0 %2939 }
 0x2a1   : > { %2565 = vrot.lane.b32.xlu1 %v2496_v44, %s4364_s22 }
 0x2a2   : > { %v5536_v50 = vpop.permute.xlu1 %2945 }
 0x2a4   : > { %v2416_v51 = vpop.permute.xlu0 %2415 }
 0x2a5   : > { %v2501_v41 = vmul.f32 %v5516_v63, %v2416_v51 }
 0x2a6   : > { %v5540_v59 = vpop.permute.xlu1 %2941 }
 0x2a7   : > { %2575 = vrot.lane.b32.xlu0 %v2501_v41, %s4364_s22 }
 0x2aa   : > { %v2418_v36 = vpop.permute.xlu1 %2417  ;;  %v2412_v4 = vpop.permute.xlu0 %2411 }
 0x2ab   : > { %v2502_v33 = vmul.f32 %v5516_v63, %v2418_v36  ;;  %v2499_v17 = vmul.f32 %v5516_v63, %v2412_v4 }
 0x2ad   : > { %2577 = vrot.lane.b32.xlu1 %v2502_v33, %s4364_s22  ;;  %2571 = vrot.lane.b32.xlu0 %v2499_v17, %s4364_s22 }
 0x2ae   : > { %v2414_v52 = vpop.permute.xlu1 %2413  ;;  %v5549_v14 = vpop.permute.xlu0 %2951 }
 0x2af   : > { %v2500_v44 = vmul.f32 %v5516_v63, %v2414_v52 }
 0x2b1   : > { %2573 = vrot.lane.b32.xlu1 %v2500_v44, %s4364_s22 }
 0x2b2   : > { %v5552_v51 = vpop.permute.xlu1 %2953  ;;  %v5554_v46 = vpop.permute.xlu0 %2947 }
 0x2b6   : > { %v5556_v36 = vpop.permute.xlu1 %2949  ;;  %v2420_v41 = vpop.permute.xlu0 %2419 }
 0x2b7   : > { %v2503_v33 = vmul.f32 %v5516_v63, %v2420_v41 }
 0x2b9   : > { %2579 = vrot.lane.b32.xlu0 %v2503_v33, %s4364_s22 }
 0x2ba   : > { %v2422_v10 = vpop.permute.xlu1 %2421  ;;  %v5561_v52 = vpop.permute.xlu0 %2959 }
 0x2bb   : > { %v2504_v4 = vmul.f32 %v5516_v63, %v2422_v10 }
 0x2bd   : > { %2581 = vrot.lane.b32.xlu1 %v2504_v4, %s4364_s22 }
 0x2be   : > { %v5564_v17 = vpop.permute.xlu1 %2961  ;;  %v5566_v44 = vpop.permute.xlu0 %2955 }
 0x2c2   : > { %v5568_v56 = vpop.permute.xlu1 %2957  ;;  %v2424_v34 = vpop.permute.xlu0 %2423 }
 0x2c3   : > { %v2505_v7 = vmul.f32 %v5516_v63, %v2424_v34 }
 0x2c5   : > { %2583 = vrot.lane.b32.xlu0 %v2505_v7, %s4364_s22 }
 0x2c6   : > { %v2426_v20 = vpop.permute.xlu1 %2425  ;;  %v5573_v10 = vpop.permute.xlu0 %2963 }
 0x2c7   : > { %v2506_v41 = vmul.f32 %v5516_v63, %v2426_v20 }
 0x2c9   : > { %2585 = vrot.lane.b32.xlu1 %v2506_v41, %s4364_s22 }
 0x2ca   : > { %v5576_v33 = vpop.permute.xlu1 %2965  ;;  %v2428_v4 = vpop.permute.xlu0 %2427 }
 0x2cb   : > { %v2507_v62 = vmul.f32 %v5516_v63, %v2428_v4 }
 0x2cd   : > { %2587 = vrot.lane.b32.xlu0 %v2507_v62, %s4364_s22 }
 0x2ce   : > { %v2430_v39 = vpop.permute.xlu1 %2429  ;;  %v5581_v34 = vpop.permute.xlu0 %2967 }
 0x2cf   : > { %v2508_v48 = vmul.f32 %v5516_v63, %v2430_v39 }
 0x2d1   : > { %2589 = vrot.lane.b32.xlu1 %v2508_v48, %s4364_s22 }
 0x2d2   : > { %v5584_v20 = vpop.permute.xlu1 %2969  ;;  %v2432_v7 = vpop.permute.xlu0 %2431 }
 0x2d3   : > { %v2509_v45 = vmul.f32 %v5516_v63, %v2432_v7 }
 0x2d5   : > { %2591 = vrot.lane.b32.xlu0 %v2509_v45, %s4364_s22 }
 0x2d6   : > { %v2434_v41 = vpop.permute.xlu1 %2433  ;;  %v2448_v4 = vpop.permute.xlu0 %2447 }
 0x2d7   : > { %v2510_v0 = vmul.f32 %v5516_v63, %v2434_v41  ;;  %v2517_v39 = vmul.f32 %v5516_v63, %v2448_v4 }
 0x2d9   : > { %2593 = vrot.lane.b32.xlu1 %v2510_v0, %s4364_s22  ;;  %2607 = vrot.lane.b32.xlu0 %v2517_v39, %s4364_s22 }
 0x2da   : > { %v2450_v62 = vpop.permute.xlu1 %2449  ;;  %v5593_v48 = vpop.permute.xlu0 %2971 }
 0x2db   : > { %v2518_v49 = vmul.f32 %v5516_v63, %v2450_v62 }
 0x2dd   : > { %2609 = vrot.lane.b32.xlu1 %v2518_v49, %s4364_s22 }
 0x2de   : > { %v5596_v7 = vpop.permute.xlu1 %2973  ;;  %v2444_v23 = vpop.permute.xlu0 %2443 }
 0x2df   : > { %6060 = vst [vmem:[#allocation16_spill] sm:$0xff] %v5596_v7  ;;  %v2515_v41 = vmul.f32 %v5516_v63, %v2444_v23 }
 0x2e1   : > { %2603 = vrot.lane.b32.xlu0 %v2515_v41, %s4364_s22 }
 0x2e2   : > { %v2446_v45 = vpop.permute.xlu1 %2445  ;;  %v2436_v0 = vpop.permute.xlu0 %2435 }
 0x2e3   : > { %v2516_v55 = vmul.f32 %v5516_v63, %v2446_v45  ;;  %v2511_v4 = vmul.f32 %v5516_v63, %v2436_v0 }
 0x2e5   : > { %2605 = vrot.lane.b32.xlu1 %v2516_v55, %s4364_s22  ;;  %2595 = vrot.lane.b32.xlu0 %v2511_v4, %s4364_s22 }
 0x2e6   : > { %v2438_v39 = vpop.permute.xlu1 %2437  ;;  %v2456_v49 = vpop.permute.xlu0 %2455 }
 0x2e7   : > { %v2512_v62 = vmul.f32 %v5516_v63, %v2438_v39  ;;  %v2521_v23 = vmul.f32 %v5516_v63, %v2456_v49 }
 0x2e9   : > { %2597 = vrot.lane.b32.xlu1 %v2512_v62, %s4364_s22  ;;  %2615 = vrot.lane.b32.xlu0 %v2521_v23, %s4364_s22 }
 0x2ea   : > { %v5608_v45 = vpop.permute.xlu0 %2975  ;;  %v2458_v41 = vpop.permute.xlu1 %2457 }
 0x2eb   : > { %v2522_v7 = vmul.f32 %v5516_v63, %v2458_v41  ;;  %v4177_v41 = vpop.eup %4176 }
 0x2ed   : > { %2617 = vrot.lane.b32.xlu1 %v2522_v7, %s4364_s22 }
 0x2ee   : > { %v2452_v55 = vpop.permute.xlu0 %2451  ;;  %v5613_v0 = vpop.permute.xlu1 %2977 }
 0x2ef   : > { %v2519_v4 = vmul.f32 %v5516_v63, %v2452_v55 }
 0x2f1   : > { %2611 = vrot.lane.b32.xlu0 %v2519_v4, %s4364_s22  ;;  %v4179_v4 = vpop.eup %4178 }
 0x2f2   : > { %v2440_v39 = vpop.permute.xlu0 %2439  ;;  %v2454_v62 = vpop.permute.xlu1 %2453 }
 0x2f3   : > { %v2513_v49 = vmul.f32 %v5516_v63, %v2440_v39  ;;  %v2520_v23 = vmul.f32 %v5516_v63, %v2454_v62  ;;  %v4181_v39 = vpop.eup %4180 }
 0x2f4   : > { %v4183_v62 = vpop.eup %4182 }
 0x2f5   : > { %2599 = vrot.lane.b32.xlu0 %v2513_v49, %s4364_s22  ;;  %2613 = vrot.lane.b32.xlu1 %v2520_v23, %s4364_s22 }
 0x2f6   : > { %v2442_v7 = vpop.permute.xlu1 %2441 }
 0x2f7   : > { %v2514_v55 = vmul.f32 %v5516_v63, %v2442_v7  ;;  %v4185_v63 = vpop.eup %4184 }
 0x2f8   : > { %v4187_v23 = vpop.eup %4186 }
 0x2f9   : > { %2979 = vrot.lane.b32.xlu0 %v4177_v41, %s4362_s15  ;;  %2601 = vrot.lane.b32.xlu1 %v2514_v55, %s4364_s22  ;;  %v4189_v55 = vpop.eup %4188 }
 0x2fd   : > { %2983 = vrot.lane.b32.xlu0 %v4179_v4, %s4362_s15  ;;  %2981 = vrot.lane.b32.xlu1 %v4181_v39, %s4362_s15 }
 0x300   : > { %v2560_v49 = vpop.permute.xlu0 %2559 }
 0x301   : > { %2987 = vrot.lane.b32.xlu0 %v4183_v62, %s4362_s15  ;;  %2985 = vrot.lane.b32.xlu1 %v4185_v63, %s4362_s15  ;;  %v2653_v7 = vadd.f32 %v2560_v49, %v4864_v9  ;;  %v4191_v63 = vpop.eup %4190 }
 0x302   : > { %v2562_v41 = vpop.permute.xlu1 %2561  ;;  %v4193_v6 = vpop.eup %4192 }
 0x303   : > { %v2654_v4 = vadd.f32 %v2562_v41, %v4871_v32  ;;  %v3495_v39 = vmul.f32 -1.442695, %v2653_v7  ;;  %v4195_v7 = vpop.eup %4194 }
 0x304   : > { %v2556_v3 = vpop.permute.xlu0 %2555 }
 0x305   : > { %2991 = vrot.lane.b32.xlu0 %v4187_v23, %s4362_s15  ;;  %2989 = vrot.lane.b32.xlu1 %v4189_v55, %s4362_s15  ;;  %v3496_v62 = vmul.f32 -1.442695, %v2654_v4  ;;  %4200 = vpow2.f32 %v3495_v39  ;;  %v2651_v11 = vadd.f32 %v2556_v3, %v4867_v18  ;;  %v4197_v4 = vpop.eup %4196 }
 0x306   : > { %v4199_v39 = vpop.eup %4198 }
 0x307   : > { %4202 = vpow2.f32 %v3496_v62  ;;  %v3493_v32 = vmul.f32 -1.442695, %v2651_v11 }
 0x308   : > { %v2558_v5 = vpop.permute.xlu1 %2557 }
 0x309   : > { %v2652_v9 = vadd.f32 %v2558_v5, %v4873_v38  ;;  %2995 = vrot.lane.b32.xlu0 %v4191_v63, %s4362_s15  ;;  %2993 = vrot.lane.b32.xlu1 %v4193_v6, %s4362_s15  ;;  %v2568_v23 = vpop.permute.xlu0 %2567  ;;  %4204 = vpow2.f32 %v3493_v32 }
 0x30a   : > { %v2657_v41 = vadd.f32 %v2568_v23, %v4883_v8 }
 0x30b   : > { %v3494_v49 = vmul.f32 -1.442695, %v2652_v9 }
 0x30c   : > { %v3499_v38 = vmul.f32 -1.442695, %v2657_v41 }
 0x30d   : > { %4206 = vpow2.f32 %v3494_v49  ;;  %2999 = vrot.lane.b32.xlu0 %v4195_v7, %s4362_s15  ;;  %2997 = vrot.lane.b32.xlu1 %v4197_v4, %s4362_s15  ;;  %v2564_v3 = vpop.permute.xlu0 %2563 }
 0x30e   : > { %4208 = vpow2.f32 %v3499_v38  ;;  %v2655_v11 = vadd.f32 %v2564_v3, %v4886_v37 }
 0x30f   : > { %v2570_v55 = vpop.permute.xlu1 %2569  ;;  %v4201_v62 = vpop.eup %4200 }
 0x310   : > { %v2658_v18 = vadd.f32 %v2570_v55, %v4889_v60  ;;  %v3497_v63 = vmul.f32 -1.442695, %v2655_v11  ;;  %v2781_v9 = vadd.f32 1.0, %v4201_v62 }
 0x311   : > { %3001 = vrot.lane.b32.xlu1 %v4199_v39, %s4362_s15  ;;  %v4203_v60 = vpop.eup %4202 }
 0x312   : > { %v3500_v5 = vmul.f32 -1.442695, %v2658_v18  ;;  %v2782_v49 = vadd.f32 1.0, %v4203_v60 }
 0x313   : > { %v2566_v6 = vpop.permute.xlu1 %2565  ;;  %v4205_v23 = vpop.eup %4204 }
 0x314   : > { %4210 = vpow2.f32 %v3500_v5  ;;  %v2656_v8 = vadd.f32 %v2566_v6, %v4891_v13  ;;  %v2779_v41 = vadd.f32 1.0, %v4205_v23 }
 0x315   : > { %4212 = vpow2.f32 %v3497_v63 }
 0x316   : > { %v3498_v32 = vmul.f32 -1.442695, %v2656_v8  ;;  %4214 = vrcp.f32 %v2781_v9 }
 0x317   : > { %4216 = vrcp.f32 %v2782_v49  ;;  %v4207_v7 = vpop.eup %4206 }
 0x318   : > { %4218 = vpow2.f32 %v3498_v32  ;;  %v2780_v37 = vadd.f32 1.0, %v4207_v7  ;;  %v4209_v55 = vpop.eup %4208 }
 0x319   : > { %4220 = vrcp.f32 %v2779_v41  ;;  %v2785_v4 = vadd.f32 1.0, %v4209_v55  ;;  %v2576_v18 = vpop.permute.xlu0 %2575 }
 0x31a   : > { %4222 = vrcp.f32 %v2780_v37  ;;  %v2661_v5 = vadd.f32 %v2576_v18, %v4903_v29 }
 0x31b   : > { %4224 = vrcp.f32 %v2785_v4 }
 0x31c   : > { %v3503_v39 = vmul.f32 -1.442695, %v2661_v5 }
 0x31e   : > { %v4211_v13 = vpop.eup %4210 }
 0x31f   : > { %v2786_v38 = vadd.f32 1.0, %v4211_v13  ;;  %v2578_v3 = vpop.permute.xlu1 %2577  ;;  %v4213_v6 = vpop.eup %4212 }
 0x320   : > { %v2662_v11 = vadd.f32 %v2578_v3, %v4916_v21  ;;  %v4215_v8 = vpop.eup %4214  ;;  %v2783_v62 = vadd.f32 1.0, %v4213_v6  ;;  %v2572_v60 = vpop.permute.xlu0 %2571 }
 0x321   : > { %4226 = vrcp.f32 %v2786_v38  ;;  %v4217_v9 = vpop.eup %4216  ;;  %v2659_v32 = vadd.f32 %v2572_v60, %v4905_v30  ;;  %v3037_v23 = vmul.f32 %v4215_v8, %v5533_v47 }
 0x322   : > { %v3504_v63 = vmul.f32 -1.442695, %v2662_v11  ;;  %4228 = vpow2.f32 %v3503_v39  ;;  %v4219_v7 = vpop.eup %4218  ;;  %v3038_v21 = vmul.f32 %v4217_v9, %v5536_v50 }
 0x323   : > { %v2574_v49 = vpop.permute.xlu1 %2573  ;;  %4230 = vrcp.f32 %v2783_v62  ;;  %v2784_v41 = vadd.f32 1.0, %v4219_v7  ;;  %v3501_v37 = vmul.f32 -1.442695, %v2659_v32  ;;  %3103 = vrot.lane.b32.xlu0 %v3037_v23, %s4364_s22  ;;  %v4221_v55 = vpop.eup %4220 }
 0x324   : > { %v2660_v29 = vadd.f32 %v2574_v49, %v4918_v58  ;;  %4232 = vpow2.f32 %v3504_v63  ;;  %3105 = vrot.lane.b32.xlu1 %v3038_v21, %s4364_s22  ;;  %v4223_v4 = vpop.eup %4222  ;;  %v3035_v30 = vmul.f32 %v4221_v55, %v5538_v22 }
 0x325   : > { %4234 = vrcp.f32 %v2784_v41  ;;  %v3036_v47 = vmul.f32 %v4223_v4, %v5540_v59  ;;  %v4225_v58 = vpop.eup %4224 }
 0x326   : > { %v3502_v13 = vmul.f32 -1.442695, %v2660_v29  ;;  %4236 = vpow2.f32 %v3501_v37  ;;  %v3041_v18 = vmul.f32 %v4225_v58, %v5549_v14 }
 0x327   : > { %3099 = vrot.lane.b32.xlu0 %v3035_v30, %s4364_s22 }
 0x328   : > { %4238 = vpow2.f32 %v3502_v13  ;;  %3101 = vrot.lane.b32.xlu1 %v3036_v47, %s4364_s22 }
 0x32b   : > { %v4227_v50 = vpop.eup %4226  ;;  %3111 = vrot.lane.b32.xlu0 %v3041_v18, %s4364_s22  ;;  %v2580_v22 = vpop.permute.xlu0 %2579 }
 0x32c   : > { %v3042_v38 = vmul.f32 %v4227_v50, %v5552_v51  ;;  %v4229_v5 = vpop.eup %4228  ;;  %v2663_v6 = vadd.f32 %v2580_v22, %v4928_v31 }
 0x32d   : > { %v4231_v3 = vpop.eup %4230  ;;  %v2789_v11 = vadd.f32 1.0, %v4229_v5 }
 0x32e   : > { %3113 = vrot.lane.b32.xlu1 %v3042_v38, %s4364_s22  ;;  %v4233_v59 = vpop.eup %4232  ;;  %v3039_v8 = vmul.f32 %v4231_v3, %v5554_v46  ;;  %v3505_v51 = vmul.f32 -1.442695, %v2663_v6 }
 0x32f   : > { %v2582_v39 = vpop.permute.xlu1 %2581  ;;  %4240 = vrcp.f32 %v2789_v11  ;;  %v2790_v62 = vadd.f32 1.0, %v4233_v59  ;;  %v4235_v63 = vpop.eup %4234 }
 0x330   : > { %v2664_v14 = vadd.f32 %v2582_v39, %v4944_v24  ;;  %3107 = vrot.lane.b32.xlu0 %v3039_v8, %s4364_s22  ;;  %v4237_v60 = vpop.eup %4236  ;;  %v3040_v32 = vmul.f32 %v4235_v63, %v5556_v36 }
 0x331   : > { %4242 = vrcp.f32 %v2790_v62  ;;  %v2787_v23 = vadd.f32 1.0, %v4237_v60 }
 0x332   : > { %v3506_v9 = vmul.f32 -1.442695, %v2664_v14  ;;  %v4239_v49 = vpop.eup %4238  ;;  %4244 = vpow2.f32 %v3505_v51  ;;  %3109 = vrot.lane.b32.xlu1 %v3040_v32, %s4364_s22 }
 0x333   : > { %v2788_v31 = vadd.f32 1.0, %v4239_v49 }
 0x334   : > { %4246 = vpow2.f32 %v3506_v9 }
 0x335   : > { %4248 = vrcp.f32 %v2787_v23 }
 0x336   : > { %4250 = vrcp.f32 %v2788_v31 }
 0x337   : > { %v2584_v24 = vpop.permute.xlu0 %2583 }
 0x338   : > { %v2665_v7 = vadd.f32 %v2584_v24, %v5996_v42 }
 0x339   : > { %v4241_v46 = vpop.eup %4240 }
 0x33a   : > { %v3045_v21 = vmul.f32 %v4241_v46, %v5561_v52  ;;  %v3507_v55 = vmul.f32 -1.442695, %v2665_v7 }
 0x33b   : > { %v2586_v29 = vpop.permute.xlu1 %2585  ;;  %v4243_v41 = vpop.eup %4242 }
 0x33c   : > { %v2666_v37 = vadd.f32 %v2586_v29, %v4941_v35  ;;  %v4245_v36 = vpop.eup %4244  ;;  %3119 = vrot.lane.b32.xlu0 %v3045_v21, %s4364_s22  ;;  %v3046_v13 = vmul.f32 %v4243_v41, %v5564_v17  ;;  %4252 = vpow2.f32 %v3507_v55 }
 0x33d   : > { %v2791_v30 = vadd.f32 1.0, %v4245_v36 }
 0x33e   : > { %v4247_v4 = vpop.eup %4246  ;;  %v3508_v47 = vmul.f32 -1.442695, %v2666_v37  ;;  %3121 = vrot.lane.b32.xlu1 %v3046_v13, %s4364_s22 }
 0x33f   : > { %v4249_v58 = vpop.eup %4248  ;;  %v2792_v50 = vadd.f32 1.0, %v4247_v4  ;;  %4254 = vrcp.f32 %v2791_v30  ;;  %v2588_v18 = vpop.permute.xlu0 %2587 }
 0x340   : > { %v4251_v42 = vpop.eup %4250  ;;  %v3043_v52 = vmul.f32 %v4249_v58, %v5566_v44  ;;  %v2667_v17 = vadd.f32 %v2588_v18, %v4957_v28 }
 0x341   : > { %4256 = vrcp.f32 %v2792_v50  ;;  %v3044_v35 = vmul.f32 %v4251_v42, %v5568_v56 }
 0x342   : > { %4258 = vpow2.f32 %v3508_v47  ;;  %3115 = vrot.lane.b32.xlu0 %v3043_v52, %s4364_s22  ;;  %v3509_v3 = vmul.f32 -1.442695, %v2667_v17 }
 0x343   : > { %3117 = vrot.lane.b32.xlu1 %v3044_v35, %s4364_s22  ;;  %v2590_v38 = vpop.permute.xlu1 %2589  ;;  %v6062_v35 = vld [vmem:[#allocation16_spill] sm:$0xff] }
 0x344   : > { %v2668_v5 = vadd.f32 %v2590_v38, %v4959_v57  ;;  %4260 = vpow2.f32 %v3509_v3 }
 0x346   : > { %v3510_v11 = vmul.f32 -1.442695, %v2668_v5  ;;  %v4253_v22 = vpop.eup %4252 }
 0x347   : > { %v2793_v59 = vadd.f32 1.0, %v4253_v22  ;;  %v2592_v6 = vpop.permute.xlu0 %2591 }
 0x348   : > { %4262 = vpow2.f32 %v3510_v11  ;;  %v2669_v39 = vadd.f32 %v2592_v6, %v4970_v2 }
 0x349   : > { %v4255_v44 = vpop.eup %4254  ;;  %4264 = vrcp.f32 %v2793_v59  ;;  %v6064_v59 = vld [vmem:[#allocation43_spill] sm:$0xff] }
 0x34a   : > { %v3047_v62 = vmul.f32 %v4255_v44, %v5573_v10  ;;  %v3511_v51 = vmul.f32 -1.442695, %v2669_v39 }
 0x34b   : > { %v4257_v56 = vpop.eup %4256  ;;  %v2594_v8 = vpop.permute.xlu1 %2593 }
 0x34c   : > { %v4259_v28 = vpop.eup %4258  ;;  %v2670_v14 = vadd.f32 %v2594_v8, %v4985_v53  ;;  %v3048_v57 = vmul.f32 %v4257_v56, %v5576_v33  ;;  %3123 = vrot.lane.b32.xlu0 %v3047_v62, %s4364_s22  ;;  %v2608_v2 = vpop.permute.xlu0 %2607 }
 0x34d   : > { %v2794_v63 = vadd.f32 1.0, %v4259_v28  ;;  %v2677_v53 = vadd.f32 %v2608_v2, %v4979_v16 }
 0x34e   : > { %v3512_v60 = vmul.f32 -1.442695, %v2670_v14  ;;  %3125 = vrot.lane.b32.xlu1 %v3048_v57, %s4364_s22  ;;  %v4261_v9 = vpop.eup %4260  ;;  %v6065_v14 = vld [vmem:[#allocation40_spill] sm:$0xff] }
 0x34f   : > { %4266 = vrcp.f32 %v2794_v63  ;;  %v2795_v10 = vadd.f32 1.0, %v4261_v9  ;;  %v2610_v33 = vpop.permute.xlu1 %2609  ;;  %v3519_v24 = vmul.f32 -1.442695, %v2677_v53 }
 0x350   : > { %4268 = vpow2.f32 %v3511_v51  ;;  %v2678_v4 = vadd.f32 %v2610_v33, %v5000_v19  ;;  %v6063_v19 = vld [vmem:[#allocation39_spill] sm:$0xff] }
 0x351   : > { %4270 = vpow2.f32 %v3512_v60  ;;  %v6066_v60 = vld [vmem:[#allocation47_spill] sm:$0xff] }
 0x352   : > { %v4263_v32 = vpop.eup %4262  ;;  %4272 = vrcp.f32 %v2795_v10  ;;  %v3520_v42 = vmul.f32 -1.442695, %v2678_v4 }
 0x353   : > { %v2796_v49 = vadd.f32 1.0, %v4263_v32  ;;  %v4265_v23 = vpop.eup %4264  ;;  %v2604_v31 = vpop.permute.xlu0 %2603  ;;  %v6067_v32 = vld [vmem:[#allocation49_spill] sm:$0xff] }
 0x354   : > { %v3049_v46 = vmul.f32 %v4265_v23, %v5581_v34  ;;  %v2675_v41 = vadd.f32 %v2604_v31, %v4982_v27 }
 0x355   : > { %4274 = vrcp.f32 %v2796_v49 }
 0x356   : > { %3127 = vrot.lane.b32.xlu0 %v3049_v46, %s4364_s22  ;;  %4276 = vpow2.f32 %v3519_v24  ;;  %v3517_v47 = vmul.f32 -1.442695, %v2675_v41  ;;  %v6068_v24 = vld [vmem:[#allocation44_spill] sm:$0xff] }
 0x357   : > { %v2606_v29 = vpop.permute.xlu1 %2605  ;;  %v2596_v37 = vpop.permute.xlu0 %2595 }
 0x358   : > { %v2671_v34 = vadd.f32 %v2596_v37, %v4994_v1 }
 0x359   : > { %v4267_v7 = vpop.eup %4266 }
 0x35a   : > { %v4269_v21 = vpop.eup %4268  ;;  %v3050_v36 = vmul.f32 %v4267_v7, %v5584_v20  ;;  %v6061_v20 = vld [vmem:[#allocation37_spill] sm:$0xff]  ;;  %v3513_v17 = vmul.f32 -1.442695, %v2671_v34 }
 0x35b   : > { %v4271_v55 = vpop.eup %4270  ;;  %v2797_v13 = vadd.f32 1.0, %v4269_v21  ;;  %v2598_v50 = vpop.permute.xlu1 %2597  ;;  %v2676_v52 = vadd.f32 %v2606_v29, %v6061_v20  ;;  %v6069_v29 = vld [vmem:[#allocation48_spill] sm:$0xff] }
 0x35c   : > { %v2798_v16 = vadd.f32 1.0, %v4271_v55  ;;  %3129 = vrot.lane.b32.xlu1 %v3050_v36, %s4364_s22  ;;  %v4273_v30 = vpop.eup %4272  ;;  %v2672_v38 = vadd.f32 %v2598_v50, %v6063_v19  ;;  %v2616_v5 = vpop.permute.xlu0 %2615 }
 0x35d   : > { %4278 = vrcp.f32 %v2797_v13  ;;  %v3051_v27 = vmul.f32 %v4273_v30, %v5593_v48  ;;  %v3518_v1 = vmul.f32 -1.442695, %v2676_v52  ;;  %v2681_v57 = vadd.f32 %v2616_v5, %v6065_v14 }
 0x35e   : > { %4280 = vrcp.f32 %v2798_v16  ;;  %v3514_v11 = vmul.f32 -1.442695, %v2672_v38 }
 0x35f   : > { %v4275_v58 = vpop.eup %4274  ;;  %3131 = vrot.lane.b32.xlu0 %v3051_v27, %s4364_s22  ;;  %4282 = vpow2.f32 %v3517_v47  ;;  %v2618_v44 = vpop.permute.xlu1 %2617 }
 0x360   : > { %v3052_v18 = vmul.f32 %v4275_v58, %v6062_v35  ;;  %4284 = vpow2.f32 %v3520_v42  ;;  %v4277_v3 = vpop.eup %4276  ;;  %v2682_v7 = vadd.f32 %v2618_v44, %v6068_v24 }
 0x361   : > { %4286 = vpow2.f32 %v3513_v17  ;;  %v2805_v28 = vadd.f32 1.0, %v4277_v3 }
 0x362   : > { %3133 = vrot.lane.b32.xlu1 %v3052_v18, %s4364_s22  ;;  %4288 = vpow2.f32 %v3518_v1  ;;  %v3524_v34 = vmul.f32 -1.442695, %v2682_v7 }
 0x363   : > { %v2612_v48 = vpop.permute.xlu0 %2611  ;;  %4290 = vpow2.f32 %v3514_v11 }
 0x364   : > { %v2679_v6 = vadd.f32 %v2612_v48, %v6064_v59 }
 0x366   : > { %v3521_v8 = vmul.f32 -1.442695, %v2679_v6 }
 0x367   : > { %v4279_v22 = vpop.eup %4278  ;;  %v2600_v63 = vpop.permute.xlu0 %2599 }
 0x368   : > { %v4281_v56 = vpop.eup %4280  ;;  %v3053_v39 = vmul.f32 %v4279_v22, %v5608_v45  ;;  %4292 = vpow2.f32 %v3521_v8  ;;  %v2614_v51 = vpop.permute.xlu1 %2613  ;;  %v2673_v9 = vadd.f32 %v2600_v63, %v6066_v60 }
 0x369   : > { %v3054_v62 = vmul.f32 %v4281_v56, %v5613_v0  ;;  %v4283_v2 = vpop.eup %4282  ;;  %v2680_v10 = vadd.f32 %v2614_v51, %v6067_v32  ;;  %4294 = vrcp.f32 %v2805_v28  ;;  %v3523_v0 = vmul.f32 -1.442695, %v2681_v57 }
 0x36a   : > { %3135 = vrot.lane.b32.xlu0 %v3053_v39, %s4364_s22  ;;  %v3515_v45 = vmul.f32 -1.442695, %v2673_v9  ;;  %v4285_v49 = vpop.eup %4284  ;;  %v2803_v31 = vadd.f32 1.0, %v4283_v2 }
 0x36b   : > { %3137 = vrot.lane.b32.xlu1 %v3054_v62, %s4364_s22  ;;  %v3522_v53 = vmul.f32 -1.442695, %v2680_v10  ;;  %v2980_v33 = vpop.permute.xlu0 %2979  ;;  %v4287_v23 = vpop.eup %4286  ;;  %v2806_v41 = vadd.f32 1.0, %v4285_v49 }
 0x36c   : > { %4296 = vpow2.f32 %v3515_v45  ;;  %v2602_v46 = vpop.permute.xlu1 %2601  ;;  %v4289_v37 = vpop.eup %4288  ;;  %v2799_v36 = vadd.f32 1.0, %v4287_v23 }
 0x36d   : > { %4298 = vpow2.f32 %v3522_v53  ;;  %v2674_v21 = vadd.f32 %v2602_v46, %v6069_v29  ;;  %v4291_v4 = vpop.eup %4290  ;;  %v2804_v47 = vadd.f32 1.0, %v4289_v37 }
 0x36e   : > { %4300 = vpow2.f32 %v3523_v0  ;;  %v2800_v27 = vadd.f32 1.0, %v4291_v4  ;;  %v6072_v4 = vld [vmem:[#allocation3_spill] sm:$0xff] }
 0x36f   : > { %v3516_v55 = vmul.f32 -1.442695, %v2674_v21  ;;  %v2984_v13 = vpop.permute.xlu0 %2983  ;;  %4302 = vrcp.f32 %v2803_v31 }
 0x370   : > { %v2982_v16 = vpop.permute.xlu1 %2981 }
 0x371   : > { %4304 = vpow2.f32 %v3516_v55  ;;  %v6071_v55 = vld [vmem:[#allocation2_spill] sm:$0xff] }
 0x372   : > { %v4293_v30 = vpop.eup %4292  ;;  %4306 = vrcp.f32 %v2806_v41  ;;  %v6070_v41 = vld [vmem:[#allocation4_spill] sm:$0xff] }
 0x373   : > { %4308 = vrcp.f32 %v2799_v36  ;;  %v2807_v58 = vadd.f32 1.0, %v4293_v30  ;;  %v2988_v50 = vpop.permute.xlu0 %2987  ;;  %v4295_v20 = vpop.eup %4294 }
 0x374   : > { %v2986_v42 = vpop.permute.xlu1 %2985  ;;  %4310 = vpow2.f32 %v3524_v34 }
 0x375   : > { %4312 = vrcp.f32 %v2804_v47  ;;  %v6073_v47 = vld [vmem:[#allocation7_spill] sm:$0xff] }
 0x376   : > { %v4297_v52 = vpop.eup %4296  ;;  %4314 = vrcp.f32 %v2807_v58 }
 0x377   : > { %v4299_v35 = vpop.eup %4298  ;;  %v2801_v18 = vadd.f32 1.0, %v4297_v52  ;;  %v2992_v17 = vpop.permute.xlu0 %2991  ;;  %4316 = vrcp.f32 %v2800_v27  ;;  %v6074_v27 = vld [vmem:[#allocation8_spill] sm:$0xff]  ;;  %v6075_v52 = vld [vmem:[#allocation5_spill] sm:$0xff] }
 0x378   : > { %v2808_v19 = vadd.f32 1.0, %v4299_v35  ;;  %v2990_v38 = vpop.permute.xlu1 %2989  ;;  %v3061_v5 = vmul.f32 %v4295_v20, %v2992_v17  ;;  %v4301_v1 = vpop.eup %4300  ;;  %v6076_v17 = vld [vmem:[#allocation6_spill] sm:$0xff] }
 0x379   : > { %v4303_v3 = vpop.eup %4302  ;;  %4318 = vrcp.f32 %v2801_v18  ;;  %v2809_v56 = vadd.f32 1.0, %v4301_v1 }
 0x37a   : > { %3151 = vrot.lane.b32.xlu0 %v3061_v5, %s4364_s22  ;;  %4320 = vrcp.f32 %v2808_v19  ;;  %v3059_v44 = vmul.f32 %v4303_v3, %v2988_v50  ;;  %v6077_v5 = vld [vmem:[#allocation9_spill] sm:$0xff] }
 0x37b   : > { %v4305_v11 = vpop.eup %4304  ;;  %v2996_v60 = vpop.permute.xlu0 %2995 }
 0x37c   : > { %v4307_v48 = vpop.eup %4306  ;;  %v2802_v22 = vadd.f32 1.0, %v4305_v11  ;;  %v2994_v59 = vpop.permute.xlu1 %2993  ;;  %v6078_v11 = vld [vmem:[#allocation10_spill] sm:$0xff] }
 0x37d   : > { %v4309_v6 = vpop.eup %4308  ;;  %v3062_v39 = vmul.f32 %v4307_v48, %v2994_v59 }
 0x37e   : > { %3147 = vrot.lane.b32.xlu0 %v3059_v44, %s4364_s22  ;;  %v4311_v8 = vpop.eup %4310  ;;  %4322 = vrcp.f32 %v2802_v22  ;;  %v3055_v28 = vmul.f32 %v4309_v6, %v2980_v33  ;;  %v6079_v44 = vld [vmem:[#allocation32_spill] sm:$0xff] }
 0x37f   : > { %3153 = vrot.lane.b32.xlu1 %v3062_v39, %s4364_s22  ;;  %v4313_v62 = vpop.eup %4312  ;;  %4324 = vrcp.f32 %v2809_v56  ;;  %v2810_v51 = vadd.f32 1.0, %v4311_v8  ;;  %v3000_v53 = vpop.permute.xlu0 %2999  ;;  %v6080_v56 = vld [vmem:[#allocation33_spill] sm:$0xff] }
 0x380   : > { %v4315_v14 = vpop.eup %4314  ;;  %v3060_v57 = vmul.f32 %v4313_v62, %v2990_v38  ;;  %v2998_v49 = vpop.permute.xlu1 %2997  ;;  %v6081_v62 = vld [vmem:[#allocation30_spill] sm:$0xff] }
 0x381   : > { %v4317_v63 = vpop.eup %4316  ;;  %v3063_v9 = vmul.f32 %v4315_v14, %v2996_v60  ;;  %4326 = vrcp.f32 %v2810_v51  ;;  %v6083_v60 = vld [vmem:[#allocation36_spill] sm:$0xff] }
 0x382   : > { %3139 = vrot.lane.b32.xlu0 %v3055_v28, %s4364_s22  ;;  %v3056_v32 = vmul.f32 %v4317_v63, %v2982_v16 }
 0x383   : > { %3149 = vrot.lane.b32.xlu1 %v3060_v57, %s4364_s22  ;;  %v4319_v2 = vpop.eup %4318  ;;  %v6082_v57 = vld [vmem:[#allocation31_spill] sm:$0xff] }
 0x384   : > { %v4321_v10 = vpop.eup %4320  ;;  %v3057_v45 = vmul.f32 %v4319_v2, %v2984_v13  ;;  %v3002_v24 = vpop.permute.xlu1 %3001 }
 0x385   : > { %v3064_v0 = vmul.f32 %v4321_v10, %v2998_v49  ;;  %v6085_v49 = vld [vmem:[#allocation11_spill] sm:$0xff] }
 0x386   : > { %3155 = vrot.lane.b32.xlu0 %v3063_v9, %s4364_s22 }
 0x387   : > { %3141 = vrot.lane.b32.xlu1 %v3056_v32, %s4364_s22  ;;  %v6084_v32 = vld [vmem:[#allocation29_spill] sm:$0xff] }
 0x388   : > { %v4323_v33 = vpop.eup %4322 }
 0x389   : > { %v4325_v23 = vpop.eup %4324  ;;  %v3058_v46 = vmul.f32 %v4323_v33, %v2986_v42  ;;  %v6086_v33 = vld [vmem:[#allocation34_spill] sm:$0xff] }
 0x38a   : > { %3143 = vrot.lane.b32.xlu0 %v3057_v45, %s4364_s22  ;;  %v3065_v31 = vmul.f32 %v4325_v23, %v3000_v53 }
 0x38b   : > { %3157 = vrot.lane.b32.xlu1 %v3064_v0, %s4364_s22  ;;  %v4327_v7 = vpop.eup %4326 }
 0x38c   : > { %v3066_v29 = vmul.f32 %v4327_v7, %v3002_v24 }
 0x38e   : > { %3159 = vrot.lane.b32.xlu0 %v3065_v31, %s4364_s22 }
 0x38f   : > { %3145 = vrot.lane.b32.xlu1 %v3058_v46, %s4364_s22  ;;  %v6087_v46 = vld [vmem:[#allocation35_spill] sm:$0xff] }
 0x393   : > { %3161 = vrot.lane.b32.xlu1 %v3066_v29, %s4364_s22  ;;  %v6088_v29 = vld [vmem:[#allocation12_spill] sm:$0xff] }
 0x395   : > { %v3104_v21 = vpop.permute.xlu0 %3103 }
 0x396   : > { %v3198_v37 = vsel %vm3195_vm2, %v3104_v21, %v6070_v41  ;;  %v3106_v36 = vpop.permute.xlu1 %3105 }
 0x397   : > { %3231 = vst.msk [vmem:[%s5735_s27 + $0x10] sm:$0xff] %vm3228_vm3, %v3198_v37  ;;  %v3199_v13 = vsel %vm3195_vm2, %v3106_v36, %v6071_v55  ;;  %v6089_v37 = vld [vmem:[#allocation13_spill] sm:$0xff] }
 0x398   : > { %3232 = vst.msk [vmem:[%s5735_s27 + $0x18] sm:$0xff] %vm3228_vm3, %v3199_v13 }
 0x399   : > { %v3100_v16 = vpop.permute.xlu0 %3099 }
 0x39a   : > { %v3196_v34 = vsel %vm3195_vm2, %v3100_v16, %v6072_v4  ;;  %v3102_v30 = vpop.permute.xlu1 %3101 }
 0x39b   : > { %3229 = vst.msk [vmem:[%s5735_s27] sm:$0xff] %vm3228_vm3, %v3196_v34  ;;  %v3197_v58 = vsel %vm3195_vm2, %v3102_v30, %v6073_v47 }
 0x39c   : > { %3230 = vst.msk [vmem:[%s5735_s27 + $0x8] sm:$0xff] %vm3228_vm3, %v3197_v58 }
 0x39d   : > { %v3112_v50 = vpop.permute.xlu0 %3111 }
 0x39e   : > { %v3202_v42 = vsel %vm3195_vm2, %v3112_v50, %v6074_v27 }
 0x39f   : > { %3235 = vst.msk [vmem:[%s5735_s27 + $0x30] sm:$0xff] %vm3228_vm3, %v3202_v42 }
 0x3a0   : > { %v3114_v20 = vpop.permute.xlu1 %3113 }
 0x3a1   : > { %v3203_v35 = vsel %vm3195_vm2, %v3114_v20, %v6075_v52  ;;  %v6090_v20 = vld [vmem:[#allocation42_spill] sm:$0xff] }
 0x3a2   : > { %3236 = vst.msk [vmem:[%s5735_s27 + $0x38] sm:$0xff] %vm3228_vm3, %v3203_v35  ;;  %v3108_v18 = vpop.permute.xlu0 %3107  ;;  %v6091_v35 = vld [vmem:[#allocation45_spill] sm:$0xff] }
 0x3a3   : > { %v3200_v19 = vsel %vm3195_vm2, %v3108_v18, %v6076_v17 }
 0x3a4   : > { %3233 = vst.msk [vmem:[%s5735_s27 + $0x20] sm:$0xff] %vm3228_vm3, %v3200_v19  ;;  %v3110_v38 = vpop.permute.xlu1 %3109 }
 0x3a5   : > { %v3201_v1 = vsel %vm3195_vm2, %v3110_v38, %v6077_v5  ;;  %v6093_v38 = vld [vmem:[#allocation15_spill] sm:$0xff] }
 0x3a6   : > { %3234 = vst.msk [vmem:[%s5735_s27 + $0x28] sm:$0xff] %vm3228_vm3, %v3201_v1 }
 0x3ae   : > { %v3120_v3 = vpop.permute.xlu0 %3119 }
 0x3af   : > { %v3206_v48 = vsel %vm3195_vm2, %v3120_v3, %v6078_v11 }
 0x3b0   : > { %3239 = vst.msk [vmem:[%s5735_s27 + $0x50] sm:$0xff] %vm3228_vm3, %v3206_v48  ;;  %v3122_v22 = vpop.permute.xlu1 %3121 }
 0x3b1   : > { %v3207_v59 = vsel %vm3195_vm2, %v3122_v22, %v6079_v44 }
 0x3b2   : > { %3240 = vst.msk [vmem:[%s5735_s27 + $0x58] sm:$0xff] %vm3228_vm3, %v3207_v59 }
 0x3b4   : > { %v3116_v6 = vpop.permute.xlu0 %3115 }
 0x3b5   : > { %v3204_v39 = vsel %vm3195_vm2, %v3116_v6, %v6080_v56  ;;  %v3118_v8 = vpop.permute.xlu1 %3117 }
 0x3b6   : > { %3237 = vst.msk [vmem:[%s5735_s27 + $0x40] sm:$0xff] %vm3228_vm3, %v3204_v39  ;;  %v3205_v28 = vsel %vm3195_vm2, %v3118_v8, %v6081_v62 }
 0x3b7   : > { %3238 = vst.msk [vmem:[%s5735_s27 + $0x48] sm:$0xff] %vm3228_vm3, %v3205_v28 }
 0x3be   : > { %v3124_v14 = vpop.permute.xlu0 %3123 }
 0x3bf   : > { %v3208_v63 = vsel %vm3195_vm2, %v3124_v14, %v6082_v57 }
 0x3c0   : > { %v3126_v51 = vpop.permute.xlu1 %3125  ;;  %3241 = vst.msk [vmem:[%s5735_s27 + $0x60] sm:$0xff] %vm3228_vm3, %v3208_v63 }
 0x3c1   : > { %v3209_v9 = vsel %vm3195_vm2, %v3126_v51, %v6083_v60 }
 0x3c2   : > { %3242 = vst.msk [vmem:[%s5735_s27 + $0x68] sm:$0xff] %vm3228_vm3, %v3209_v9 }
 0x3c8   : > { %v3128_v2 = vpop.permute.xlu0 %3127 }
 0x3c9   : > { %v3210_v10 = vsel %vm3195_vm2, %v3128_v2, %v6084_v32 }
 0x3ca   : > { %3243 = vst.msk [vmem:[%s5735_s27 + $0x70] sm:$0xff] %vm3228_vm3, %v3210_v10 }
 0x3ce   : > { %v3130_v45 = vpop.permute.xlu1 %3129 }
 0x3cf   : > { %v3211_v0 = vsel %vm3195_vm2, %v3130_v45, %v6085_v49 }
 0x3d0   : > { %3244 = vst.msk [vmem:[%s5735_s27 + $0x78] sm:$0xff] %vm3228_vm3, %v3211_v0 }
 0x3d1   : > { %v3132_v53 = vpop.permute.xlu0 %3131 }
 0x3d2   : > { %v3212_v23 = vsel %vm3195_vm2, %v3132_v53, %v6086_v33 }
 0x3d3   : > { %3245 = vst.msk [vmem:[%s5735_s27 + $0x80] sm:$0xff] %vm3228_vm3, %v3212_v23 }
 0x3d4   : > { %v3134_v31 = vpop.permute.xlu1 %3133 }
 0x3d5   : > { %v3213_v24 = vsel %vm3195_vm2, %v3134_v31, %v6087_v46 }
 0x3d6   : > { %3246 = vst.msk [vmem:[%s5735_s27 + $0x88] sm:$0xff] %vm3228_vm3, %v3213_v24 }
 0x3dc   : > { %v3136_v7 = vpop.permute.xlu0 %3135 }
 0x3dd   : > { %v3214_v21 = vsel %vm3195_vm2, %v3136_v7, %v6088_v29  ;;  %v3138_v41 = vpop.permute.xlu1 %3137 }
 0x3de   : > { %3247 = vst.msk [vmem:[%s5735_s27 + $0x90] sm:$0xff] %vm3228_vm3, %v3214_v21  ;;  %v3215_v36 = vsel %vm3195_vm2, %v3138_v41, %v6089_v37 }
 0x3df   : > { %3248 = vst.msk [vmem:[%s5735_s27 + $0x98] sm:$0xff] %vm3228_vm3, %v3215_v36 }
 0x3ec   : > { %v3152_v55 = vpop.permute.xlu0 %3151 }
 0x3ed   : > { %v3222_v13 = vsel %vm3195_vm2, %v3152_v55, %v5449_v61 }
 0x3ee   : > { %3255 = vst.msk [vmem:[%s5735_s27 + $0xd0] sm:$0xff] %vm3228_vm3, %v3222_v13 }
 0x3f0   : > { %v3148_v16 = vpop.permute.xlu0 %3147 }
 0x3f1   : > { %v3154_v4 = vpop.permute.xlu1 %3153  ;;  %v3220_v34 = vsel %vm3195_vm2, %v3148_v16, %v5461_v26 }
 0x3f2   : > { %v3223_v30 = vsel %vm3195_vm2, %v3154_v4, %v5451_v54  ;;  %3253 = vst.msk [vmem:[%s5735_s27 + $0xc0] sm:$0xff] %vm3228_vm3, %v3220_v34 }
 0x3f3   : > { %3256 = vst.msk [vmem:[%s5735_s27 + $0xd8] sm:$0xff] %vm3228_vm3, %v3223_v30 }
 0x3f4   : > { %v3140_v47 = vpop.permute.xlu0 %3139 }
 0x3f5   : > { %v3150_v58 = vpop.permute.xlu1 %3149  ;;  %v3216_v61 = vsel %vm3195_vm2, %v3140_v47, %v5472_v43 }
 0x3f6   : > { %v3221_v50 = vsel %vm3195_vm2, %v3150_v58, %v5463_v25  ;;  %3249 = vst.msk [vmem:[%s5735_s27 + $0xa0] sm:$0xff] %vm3228_vm3, %v3216_v61 }
 0x3f7   : > { %3254 = vst.msk [vmem:[%s5735_s27 + $0xc8] sm:$0xff] %vm3228_vm3, %v3221_v50 }
 0x3f8   : > { %v3156_v26 = vpop.permute.xlu0 %3155 }
 0x3f9   : > { %v3142_v54 = vpop.permute.xlu1 %3141  ;;  %v3224_v27 = vsel %vm3195_vm2, %v3156_v26, %v5493_v40 }
 0x3fa   : > { %v3217_v42 = vsel %vm3195_vm2, %v3142_v54, %v5474_v15  ;;  %3257 = vst.msk [vmem:[%s5735_s27 + $0xe0] sm:$0xff] %vm3228_vm3, %v3224_v27  ;;  %v6092_v15 = vld [vmem:[#allocation14_spill] sm:$0xff] }
 0x3fb   : > { %3250 = vst.msk [vmem:[%s5735_s27 + $0xa8] sm:$0xff] %vm3228_vm3, %v3217_v42 }
 0x3fc   : > { %v3144_v25 = vpop.permute.xlu0 %3143 }
 0x3fd   : > { %v3158_v43 = vpop.permute.xlu1 %3157  ;;  %v3218_v52 = vsel %vm3195_vm2, %v3144_v25, %v6090_v20 }
 0x3fe   : > { %v3225_v18 = vsel %vm3195_vm2, %v3158_v43, %v6091_v35  ;;  %3251 = vst.msk [vmem:[%s5735_s27 + $0xb0] sm:$0xff] %vm3228_vm3, %v3218_v52 }
 0x3ff   : > { %3258 = vst.msk [vmem:[%s5735_s27 + $0xe8] sm:$0xff] %vm3228_vm3, %v3225_v18 }
 0x400   : > { %v3160_v40 = vpop.permute.xlu0 %3159 }
 0x401   : > { %v3146_v17 = vpop.permute.xlu1 %3145  ;;  %v3226_v19 = vsel %vm3195_vm2, %v3160_v40, %v6092_v15 }
 0x402   : > { %v3219_v5 = vsel %vm3195_vm2, %v3146_v17, %v6093_v38  ;;  %3259 = vst.msk [vmem:[%s5735_s27 + $0xf0] sm:$0xff] %vm3228_vm3, %v3226_v19 }
 0x403   : > { %3252 = vst.msk [vmem:[%s5735_s27 + $0xb8] sm:$0xff] %vm3228_vm3, %v3219_v5 }
 0x405   : > { %v3162_v1 = vpop.permute.xlu1 %3161 }
 0x406   : > { %v3227_v3 = vsel %vm3195_vm2, %v3162_v1, %v5487_v12 }
 0x407   : > { %3260 = vst.msk [vmem:[%s5735_s27 + $0xf8] sm:$0xff] %vm3228_vm3, %v3227_v3 }
 0x408 PF: > { %s17_s24 = sadd.s32 1, %s4360_s24  }
 0x409   : > { %p14_p4 = scmp.ge.s32.totalorder %s17_s24, 4  }
 0x40b   :  { %16 = sbr.rel (!%p14_p4) target bundleno = 1 (0x1), region = 81 }

</bundles_post_ra>
